<compile_context>
chip_gen: v7x
topology: tpu7x:2x2x1
jax: 0.10.0
libtpu: 0.0.40
codegen_flags: <defaults>
</compile_context>

<pallas_src>
import jax
import jax.numpy as jnp
from jax.experimental import pallas as pl
from jax.experimental.pallas import tpu as pltpu

IN_DIM = 128
HID_DIM = 9216
OUT_DIM = 64
TK = 4608  # hidden-dim tile; 9216 / 4608 = 2 grid steps (multiple of 128)


def mlp_kernel(x_ref, w1_ref, b1_ref, w2_ref, b2_ref, o_ref):
    k = pl.program_id(0)

    @pl.when(k == 0)
    def _init():
        o_ref[...] = jnp.zeros_like(o_ref)

    # fc1 chunk + bias + ReLU: (B, 128) @ (128, TK) -> (B, TK), f32 acc.
    h = jnp.dot(x_ref[...], w1_ref[...], preferred_element_type=jnp.float32)
    h = jnp.maximum(h + b1_ref[...], 0.0)          # bias chunk (1, TK) broadcasts

    # fc2 partial: (B, TK) @ (TK, 64) -> (B, 64), accumulated into resident o_ref.
    # (h -> bf16 is a deliberate precision trade-off matching reference_forward.)
    o_ref[...] += jnp.dot(h.astype(jnp.bfloat16), w2_ref[...],
                          preferred_element_type=jnp.float32)

    @pl.when(k == pl.num_programs(0) - 1)
    def _finalize():
        z = o_ref[...] + b2_ref[...]               # (1, 64) broadcasts over batch
        # log_softmax along dim=1 (feature/lane axis), numerically stable, f32.
        m = jnp.max(z, axis=-1, keepdims=True)
        shifted = z - m
        lse = jnp.log(jnp.sum(jnp.exp(shifted), axis=-1, keepdims=True))
        o_ref[...] = shifted - lse


def net_forward(x, w1_bf16, b1, w2_bf16, b2, *, tk=TK):
    B = x.shape[0]
    assert x.shape == (B, IN_DIM)
    assert HID_DIM % tk == 0 and tk % 128 == 0
    nk = HID_DIM // tk
    x_bf = x.astype(jnp.bfloat16)                  # single upfront cast
    return pl.pallas_call(
        mlp_kernel,
        out_shape=jax.ShapeDtypeStruct((B, OUT_DIM), jnp.float32),
        grid_spec=pltpu.PrefetchScalarGridSpec(
            num_scalar_prefetch=0,
            grid=(nk,),
            in_specs=[
                pl.BlockSpec((B, IN_DIM), lambda k: (0, 0)),    # x (whole, tiny)
                pl.BlockSpec((IN_DIM, tk), lambda k: (0, k)),   # W1 chunk
                pl.BlockSpec((1, tk), lambda k: (0, k)),        # b1 chunk
                pl.BlockSpec((tk, OUT_DIM), lambda k: (k, 0)),  # W2 chunk
                pl.BlockSpec((1, OUT_DIM), lambda k: (0, 0)),   # b2 (whole)
            ],
            out_specs=pl.BlockSpec((B, OUT_DIM), lambda k: (0, 0)),
        ),
        compiler_params=pltpu.CompilerParams(
            dimension_semantics=("arbitrary",),    # sequential reduction axis
        ),
    )(x_bf, w1_bf16, b1, w2_bf16, b2)


def init_params(key):
    """PyTorch nn.Linear-style init U(-1/sqrt(fan_in), 1/sqrt(fan_in)).

    Weights are stored as (in_features, out_features) (i.e. W.T vs torch) and
    cast to bf16 for streaming; biases stay f32.
    """
    k1, k2, k3, k4 = jax.random.split(key, 4)
    bound1 = 1.0 / jnp.sqrt(jnp.float32(IN_DIM))
    bound2 = 1.0 / jnp.sqrt(jnp.float32(HID_DIM))
    w1 = jax.random.uniform(k1, (IN_DIM, HID_DIM), jnp.float32, -bound1, bound1)
    b1 = jax.random.uniform(k2, (1, HID_DIM), jnp.float32, -bound1, bound1)
    w2 = jax.random.uniform(k3, (HID_DIM, OUT_DIM), jnp.float32, -bound2, bound2)
    b2 = jax.random.uniform(k4, (1, OUT_DIM), jnp.float32, -bound2, bound2)
    return w1.astype(jnp.bfloat16), b1, w2.astype(jnp.bfloat16), b2


def reference_forward(x, w1_bf16, b1, w2_bf16, b2):
    """Pure-JAX reference with the same mixed precision (bf16 operands, f32 acc)."""
    h = jnp.dot(x.astype(jnp.bfloat16), w1_bf16,
                preferred_element_type=jnp.float32) + b1
    h = jnp.maximum(h, 0.0)
    z = jnp.dot(h.astype(jnp.bfloat16), w2_bf16,
                preferred_element_type=jnp.float32) + b2
    return jax.nn.log_softmax(z, axis=1)


if __name__ == "__main__":
    key = jax.random.PRNGKey(0)
    kx, kp = jax.random.split(key)

    B = 8  # small demo batch; wrapper supports any B
    x = jax.random.normal(kx, (B, IN_DIM), jnp.float32)
    w1, b1, w2, b2 = init_params(kp)

    out = net_forward(x, w1, b1, w2, b2)
    out = jax.block_until_ready(out)

    ref = reference_forward(x, w1, b1, w2, b2)
    assert out.shape == (B, OUT_DIM)
    assert jnp.allclose(out, ref, atol=1e-3, rtol=1e-3), "mismatch vs JAX reference"

    print("KERNEL_OK")
</pallas_src>

<mosaic_0001>
module attributes {stable_mosaic.version = 11 : i64} {
  func.func @mlp_kernel(%arg0: i32, %arg1: memref<8x128xbf16, #tpu.memory_space<vmem>>, %arg2: memref<128x4608xbf16, #tpu.memory_space<vmem>>, %arg3: memref<1x4608xf32, #tpu.memory_space<vmem>>, %arg4: memref<4608x64xbf16, #tpu.memory_space<vmem>>, %arg5: memref<1x64xf32, #tpu.memory_space<vmem>>, %arg6: memref<8x64xf32, #tpu.memory_space<vmem>>) attributes {dimension_semantics = [#tpu.dimension_semantics<arbitrary>], iteration_bounds = array<i64: 2>, scalar_prefetch = 0 : i64, scratch_operands = 0 : i64, tpu.core_type = #tpu.core_type<tc>, window_params = [{pipeline_mode = #tpu.pipeline_mode<synchronous>, transform_indices = @transform_0, window_bounds = array<i64: 8, 128>}, {transform_indices = @transform_1, window_bounds = array<i64: 128, 4608>}, {transform_indices = @transform_2, window_bounds = array<i64: 1, 4608>}, {transform_indices = @transform_3, window_bounds = array<i64: 4608, 64>}, {pipeline_mode = #tpu.pipeline_mode<synchronous>, transform_indices = @transform_4, window_bounds = array<i64: 1, 64>}, {pipeline_mode = #tpu.pipeline_mode<synchronous>, transform_indices = @transform_5, window_bounds = array<i64: 8, 64>}]} {
    %c0_i32 = arith.constant 0 : i32
    %0 = arith.cmpi eq, %arg0, %c0_i32 : i32
    %1 = arith.extui %0 : i1 to i32
    %c0_i32_0 = arith.constant 0 : i32
    %2 = arith.cmpi ne, %1, %c0_i32_0 : i32
    scf.if %2 {
      %cst_15 = arith.constant 0.000000e+00 : f32
      %20 = vector.broadcast %cst_15 : f32 to vector<8x64xf32>
      %c0_16 = arith.constant 0 : index
      %c0_17 = arith.constant 0 : index
      %21 = vector.load %arg6[%c0_16, %c0_17] : memref<8x64xf32, #tpu.memory_space<vmem>>, vector<8x64xf32>
      tpu.vector_store %arg6[%c0_16, %c0_17], %20 {strides = array<i32>} : memref<8x64xf32, #tpu.memory_space<vmem>>, vector<8x64xf32>,
    } else {
    }
    %c0 = arith.constant 0 : index
    %c0_1 = arith.constant 0 : index
    %3 = vector.load %arg1[%c0, %c0_1] : memref<8x128xbf16, #tpu.memory_space<vmem>>, vector<8x128xbf16>
    %c0_2 = arith.constant 0 : index
    %c0_3 = arith.constant 0 : index
    %4 = vector.load %arg2[%c0_2, %c0_3] : memref<128x4608xbf16, #tpu.memory_space<vmem>>, vector<128x4608xbf16>
    %cst = arith.constant dense<0.000000e+00> : vector<8x4608xf32>
    %5 = tpu.matmul %3, %4, %cst {dimension_numbers = #tpu.dot_dimension_numbers<[1], [0], [0], [1], [0, 0, 1, 1], [], []>} : vector<8x128xbf16>, vector<128x4608xbf16>, vector<8x4608xf32> -> vector<8x4608xf32>
    %c0_4 = arith.constant 0 : index
    %c0_5 = arith.constant 0 : index
    %6 = vector.load %arg3[%c0_4, %c0_5] : memref<1x4608xf32, #tpu.memory_space<vmem>>, vector<1x4608xf32>
    %7 = vector.broadcast %6 : vector<1x4608xf32> to vector<8x4608xf32>
    %8 = arith.addf %5, %7 : vector<8x4608xf32>
    %cst_6 = arith.constant 0.000000e+00 : f32
    %9 = vector.broadcast %cst_6 : f32 to vector<8x4608xf32>
    %10 = arith.maximumf %8, %9 : vector<8x4608xf32>
    %c0_7 = arith.constant 0 : index
    %c0_8 = arith.constant 0 : index
    %11 = vector.load %arg6[%c0_7, %c0_8] : memref<8x64xf32, #tpu.memory_space<vmem>>, vector<8x64xf32>
    %12 = arith.truncf %10 : vector<8x4608xf32> to vector<8x4608xbf16>
    %c0_9 = arith.constant 0 : index
    %c0_10 = arith.constant 0 : index
    %13 = vector.load %arg4[%c0_9, %c0_10] : memref<4608x64xbf16, #tpu.memory_space<vmem>>, vector<4608x64xbf16>
    %cst_11 = arith.constant dense<0.000000e+00> : vector<8x64xf32>
    %14 = tpu.matmul %12, %13, %cst_11 {dimension_numbers = #tpu.dot_dimension_numbers<[1], [0], [0], [1], [0, 0, 1, 1], [], []>} : vector<8x4608xbf16>, vector<4608x64xbf16>, vector<8x64xf32> -> vector<8x64xf32>
    %15 = arith.addf %11, %14 : vector<8x64xf32>
    %c0_12 = arith.constant 0 : index
    %c0_13 = arith.constant 0 : index
    %16 = vector.load %arg6[%c0_12, %c0_13] : memref<8x64xf32, #tpu.memory_space<vmem>>, vector<8x64xf32>
    tpu.vector_store %arg6[%c0_12, %c0_13], %15 {strides = array<i32>} : memref<8x64xf32, #tpu.memory_space<vmem>>, vector<8x64xf32>,
    %c1_i32 = arith.constant 1 : i32
    %17 = arith.cmpi eq, %arg0, %c1_i32 : i32
    %18 = arith.extui %17 : i1 to i32
    %c0_i32_14 = arith.constant 0 : i32
    %19 = arith.cmpi ne, %18, %c0_i32_14 : i32
    scf.if %19 {
      %c0_15 = arith.constant 0 : index
      %c0_16 = arith.constant 0 : index
      %20 = vector.load %arg6[%c0_15, %c0_16] : memref<8x64xf32, #tpu.memory_space<vmem>>, vector<8x64xf32>
      %c0_17 = arith.constant 0 : index
      %c0_18 = arith.constant 0 : index
      %21 = vector.load %arg5[%c0_17, %c0_18] : memref<1x64xf32, #tpu.memory_space<vmem>>, vector<1x64xf32>
      %22 = vector.broadcast %21 : vector<1x64xf32> to vector<8x64xf32>
      %23 = arith.addf %20, %22 : vector<8x64xf32>
      %cst_19 = arith.constant dense<0xFF800000> : vector<8xf32>
      %24 = vector.multi_reduction <maximumf>, %23, %cst_19 [1] : vector<8x64xf32> to vector<8xf32>
      %25 = vector.shape_cast %24 : vector<8xf32> to vector<8x1xf32>
      %26 = vector.broadcast %25 : vector<8x1xf32> to vector<8x64xf32>
      %27 = arith.subf %23, %26 : vector<8x64xf32>
      %28 = math.exp %27 : vector<8x64xf32>
      %cst_20 = arith.constant dense<0.000000e+00> : vector<8xf32>
      %29 = vector.multi_reduction <add>, %28, %cst_20 [1] : vector<8x64xf32> to vector<8xf32>
      %30 = vector.shape_cast %29 : vector<8xf32> to vector<8x1xf32>
      %31 = math.log %30 : vector<8x1xf32>
      %32 = vector.broadcast %31 : vector<8x1xf32> to vector<8x64xf32>
      %33 = arith.subf %27, %32 : vector<8x64xf32>
      %c0_21 = arith.constant 0 : index
      %c0_22 = arith.constant 0 : index
      %34 = vector.load %arg6[%c0_21, %c0_22] : memref<8x64xf32, #tpu.memory_space<vmem>>, vector<8x64xf32>
      tpu.vector_store %arg6[%c0_21, %c0_22], %33 {strides = array<i32>} : memref<8x64xf32, #tpu.memory_space<vmem>>, vector<8x64xf32>,
    } else {
    }
    return
  }
  func.func @transform_0(%arg0: i32) -> (i32, i32) {
    %c0_i32 = arith.constant 0 : i32
    %c0_i32_0 = arith.constant 0 : i32
    %c0_i32_1 = arith.constant 0 : i32
    return %c0_i32, %c0_i32_0 : i32, i32
  }
  func.func @transform_1(%arg0: i32) -> (i32, i32) {
    %c0_i32 = arith.constant 0 : i32
    %c0_i32_0 = arith.constant 0 : i32
    return %c0_i32, %arg0 : i32, i32
  }
  func.func @transform_2(%arg0: i32) -> (i32, i32) {
    %c0_i32 = arith.constant 0 : i32
    %c0_i32_0 = arith.constant 0 : i32
    return %c0_i32, %arg0 : i32, i32
  }
  func.func @transform_3(%arg0: i32) -> (i32, i32) {
    %c0_i32 = arith.constant 0 : i32
    %c0_i32_0 = arith.constant 0 : i32
    return %arg0, %c0_i32 : i32, i32
  }
  func.func @transform_4(%arg0: i32) -> (i32, i32) {
    %c0_i32 = arith.constant 0 : i32
    %c0_i32_0 = arith.constant 0 : i32
    %c0_i32_1 = arith.constant 0 : i32
    return %c0_i32, %c0_i32_0 : i32, i32
  }
  func.func @transform_5(%arg0: i32) -> (i32, i32) {
    %c0_i32 = arith.constant 0 : i32
    %c0_i32_0 = arith.constant 0 : i32
    %c0_i32_1 = arith.constant 0 : i32
    return %c0_i32, %c0_i32_0 : i32, i32
  }
}

</mosaic_0001>

<bundles_post_ra>
// kernel: tpu_custom_call.1
= control target key start
LH: loop header
LB: loop body
LE: loop exit
PB: predicated region body
PF: predicated region fallthrough
CT: control target
= control target key end

     0   :  { %10 = vsyncpa [#allocation4], 0  ;;  %s8543_s18 = smov 0   ;;  %s8545_s19 = smov 0   ;;  %s10064_s0 = inlined_call_operand.vmem [shape: bf16[8,128], index: 0, kind: input, shape index: {}]   ;;  %s10065_s1 = inlined_call_operand.vmem [shape: bf16[128,9216], index: 1, kind: input, shape index: {}]   ;;  %s10066_s2 = inlined_call_operand.vmem [shape: f32[1,9216], index: 2, kind: input, shape index: {}]   ;;  %s10067_s3 = inlined_call_operand.vmem [shape: bf16[9216,64], index: 3, kind: input, shape index: {}]   ;;  %s10068_s4 = inlined_call_operand.vmem [shape: f32[1,64], index: 4, kind: input, shape index: {}]   ;;  %s10069_s5 = inlined_call_operand.hbm [shape: f32[8,64], index: 5, kind: output, shape index: {}]  }
   0x1   :  { %s8547_s20 = smov 0  }
   0x2 LB: > { %s8559_s21 = sadd.s32 4294967295, %s8508_s20   ;;  %s8562_s22 = sadd.s32 1, %s8508_s20   ;;  %s8508_s20 = sphi %s8547_s20, %s10072_s20   ;;  %s8504_s19 = sphi %s8545_s19, %s10071_s19   ;;  %s8500_s18 = sphi %s8543_s18, %s10070_s18  }
   0x3   : > { %s41_s23 = ssub.s32 %s8508_s20, %s8562_s22  ;;  %s44_s24 = sadd.s32 1, %s8504_s19 }
   0x4   : > { %p42_p0 = scmp.eq.s32.totalorder %s41_s23, 0  ;;  %p51_p1 = scmp.ne.s32.totalorder %s8504_s19, %s8500_s18 }
   0x5   : > { %p52_p2 = scmp.eq.s32.totalorder %s8508_s20, 0  ;;  %p6712_p4 = scmp.ge.s32.totalorder %s8508_s20, 2 }
   0x6   : > { %s8571_s25 = scalar_select %p42_p0, %s8504_s19, %s44_s24  }
   0x7   : > { %p53_p3 = por %p52_p2, %p51_p1  ;;  %177 = sbr.rel (%p6712_p4) target bundleno = 163 (0xa3), region = 24 }
   0xe   : > { %180 = sbr.rel (!%p53_p3) target bundleno = 163 (0xa3), region = 28  ;;  %s182_s26 = sand.u32 (%p53_p3), 1, %s8504_s19  }
   0xf   : > { %s7299_s27 = smul.u32 (%p53_p3), 144, %s8508_s20 }
  0x10   : > { %s7696_s28 = smul.u32 (%p53_p3), 2304, %s182_s26 }
  0x11   : > { %s8579_s6 = scalar_lea.vmem (%p53_p3), %s10065_s1, %s7299_s27 }
  0x12   : > { %v200_v0 = vld [vmem:[%s8579_s6] sm:$0xff] (%p53_p3)  ;;  %v202_v1 = vld [vmem:[%s8579_s6 + $0x8] sm:$0xff] (%p53_p3)  ;;  %v204_v2 = vld [vmem:[%s8579_s6 + $0x10] sm:$0xff] (%p53_p3)  ;;  %s8584_s7 = scalar_lea.vmem (%p53_p3), [#allocation2], %s7696_s28 }
  0x13   : > { %201 = vst [vmem:[%s8584_s7] sm:$0xff] (%p53_p3), %v200_v0  ;;  %203 = vst [vmem:[%s8584_s7 + $0x8] sm:$0xff] (%p53_p3), %v202_v1  ;;  %v206_v3 = vld [vmem:[%s8579_s6 + $0x18] sm:$0xff] (%p53_p3)  ;;  %v208_v4 = vld [vmem:[%s8579_s6 + $0x20] sm:$0xff] (%p53_p3) }
  0x14   : > { %205 = vst [vmem:[%s8584_s7 + $0x10] sm:$0xff] (%p53_p3), %v204_v2  ;;  %v210_v5 = vld [vmem:[%s8579_s6 + $0x28] sm:$0xff] (%p53_p3)  ;;  %207 = vst [vmem:[%s8584_s7 + $0x18] sm:$0xff] (%p53_p3), %v206_v3  ;;  %v212_v6 = vld [vmem:[%s8579_s6 + $0x30] sm:$0xff] (%p53_p3) }
  0x15   : > { %209 = vst [vmem:[%s8584_s7 + $0x20] sm:$0xff] %v208_v4  ;;  %211 = vst [vmem:[%s8584_s7 + $0x28] sm:$0xff] %v210_v5  ;;  %v214_v7 = vld [vmem:[%s8579_s6 + $0x38] sm:$0xff]  ;;  %v216_v8 = vld [vmem:[%s8579_s6 + $0x40] sm:$0xff] }
  0x16   : > { %213 = vst [vmem:[%s8584_s7 + $0x30] sm:$0xff] %v212_v6  ;;  %215 = vst [vmem:[%s8584_s7 + $0x38] sm:$0xff] %v214_v7  ;;  %v218_v9 = vld [vmem:[%s8579_s6 + $0x48] sm:$0xff]  ;;  %v220_v10 = vld [vmem:[%s8579_s6 + $0x50] sm:$0xff] }
  0x17   : > { %217 = vst [vmem:[%s8584_s7 + $0x40] sm:$0xff] %v216_v8  ;;  %v222_v11 = vld [vmem:[%s8579_s6 + $0x58] sm:$0xff]  ;;  %219 = vst [vmem:[%s8584_s7 + $0x48] sm:$0xff] %v218_v9  ;;  %v224_v12 = vld [vmem:[%s8579_s6 + $0x60] sm:$0xff] }
  0x18   : > { %221 = vst [vmem:[%s8584_s7 + $0x50] sm:$0xff] %v220_v10  ;;  %223 = vst [vmem:[%s8584_s7 + $0x58] sm:$0xff] %v222_v11  ;;  %v226_v13 = vld [vmem:[%s8579_s6 + $0x68] sm:$0xff]  ;;  %v228_v14 = vld [vmem:[%s8579_s6 + $0x70] sm:$0xff] }
  0x19   : > { %225 = vst [vmem:[%s8584_s7 + $0x60] sm:$0xff] %v224_v12  ;;  %227 = vst [vmem:[%s8584_s7 + $0x68] sm:$0xff] %v226_v13  ;;  %v230_v15 = vld [vmem:[%s8579_s6 + $0x78] sm:$0xff]  ;;  %v232_v16 = vld [vmem:[%s8579_s6 + $0x80] sm:$0xff] }
  0x1a   : > { %229 = vst [vmem:[%s8584_s7 + $0x70] sm:$0xff] %v228_v14  ;;  %v234_v17 = vld [vmem:[%s8579_s6 + $0x88] sm:$0xff]  ;;  %231 = vst [vmem:[%s8584_s7 + $0x78] sm:$0xff] %v230_v15  ;;  %v236_v18 = vld [vmem:[%s8579_s6 + $0x120] sm:$0xff] }
  0x1b   : > { %233 = vst [vmem:[%s8584_s7 + $0x80] sm:$0xff] %v232_v16  ;;  %235 = vst [vmem:[%s8584_s7 + $0x88] sm:$0xff] %v234_v17  ;;  %v238_v19 = vld [vmem:[%s8579_s6 + $0x128] sm:$0xff]  ;;  %v240_v20 = vld [vmem:[%s8579_s6 + $0x130] sm:$0xff] }
  0x1c   : > { %237 = vst [vmem:[%s8584_s7 + $0x90] sm:$0xff] %v236_v18  ;;  %239 = vst [vmem:[%s8584_s7 + $0x98] sm:$0xff] %v238_v19  ;;  %v242_v21 = vld [vmem:[%s8579_s6 + $0x138] sm:$0xff]  ;;  %v244_v22 = vld [vmem:[%s8579_s6 + $0x140] sm:$0xff] }
  0x1d   : > { %241 = vst [vmem:[%s8584_s7 + $0xa0] sm:$0xff] %v240_v20  ;;  %v246_v23 = vld [vmem:[%s8579_s6 + $0x148] sm:$0xff]  ;;  %243 = vst [vmem:[%s8584_s7 + $0xa8] sm:$0xff] %v242_v21  ;;  %v248_v24 = vld [vmem:[%s8579_s6 + $0x150] sm:$0xff] }
  0x1e   : > { %245 = vst [vmem:[%s8584_s7 + $0xb0] sm:$0xff] %v244_v22  ;;  %247 = vst [vmem:[%s8584_s7 + $0xb8] sm:$0xff] %v246_v23  ;;  %v250_v25 = vld [vmem:[%s8579_s6 + $0x158] sm:$0xff]  ;;  %v252_v26 = vld [vmem:[%s8579_s6 + $0x160] sm:$0xff] }
  0x1f   : > { %249 = vst [vmem:[%s8584_s7 + $0xc0] sm:$0xff] %v248_v24  ;;  %251 = vst [vmem:[%s8584_s7 + $0xc8] sm:$0xff] %v250_v25  ;;  %v254_v27 = vld [vmem:[%s8579_s6 + $0x168] sm:$0xff]  ;;  %v256_v28 = vld [vmem:[%s8579_s6 + $0x170] sm:$0xff] }
  0x20   : > { %253 = vst [vmem:[%s8584_s7 + $0xd0] sm:$0xff] %v252_v26  ;;  %v258_v29 = vld [vmem:[%s8579_s6 + $0x178] sm:$0xff]  ;;  %255 = vst [vmem:[%s8584_s7 + $0xd8] sm:$0xff] %v254_v27  ;;  %v260_v30 = vld [vmem:[%s8579_s6 + $0x180] sm:$0xff] }
  0x21   : > { %257 = vst [vmem:[%s8584_s7 + $0xe0] sm:$0xff] %v256_v28  ;;  %259 = vst [vmem:[%s8584_s7 + $0xe8] sm:$0xff] %v258_v29  ;;  %v262_v31 = vld [vmem:[%s8579_s6 + $0x188] sm:$0xff]  ;;  %v264_v32 = vld [vmem:[%s8579_s6 + $0x190] sm:$0xff] }
  0x22   : > { %261 = vst [vmem:[%s8584_s7 + $0xf0] sm:$0xff] %v260_v30  ;;  %263 = vst [vmem:[%s8584_s7 + $0xf8] sm:$0xff] %v262_v31  ;;  %v266_v33 = vld [vmem:[%s8579_s6 + $0x198] sm:$0xff]  ;;  %v268_v34 = vld [vmem:[%s8579_s6 + $0x1a0] sm:$0xff] }
  0x23   : > { %265 = vst [vmem:[%s8584_s7 + $0x100] sm:$0xff] %v264_v32  ;;  %v270_v35 = vld [vmem:[%s8579_s6 + $0x1a8] sm:$0xff]  ;;  %267 = vst [vmem:[%s8584_s7 + $0x108] sm:$0xff] %v266_v33  ;;  %v272_v36 = vld [vmem:[%s8579_s6 + $0x240] sm:$0xff] }
  0x24   : > { %269 = vst [vmem:[%s8584_s7 + $0x110] sm:$0xff] %v268_v34  ;;  %271 = vst [vmem:[%s8584_s7 + $0x118] sm:$0xff] %v270_v35  ;;  %v274_v37 = vld [vmem:[%s8579_s6 + $0x248] sm:$0xff]  ;;  %v276_v38 = vld [vmem:[%s8579_s6 + $0x250] sm:$0xff] }
  0x25   : > { %273 = vst [vmem:[%s8584_s7 + $0x120] sm:$0xff] %v272_v36  ;;  %275 = vst [vmem:[%s8584_s7 + $0x128] sm:$0xff] %v274_v37  ;;  %v278_v39 = vld [vmem:[%s8579_s6 + $0x258] sm:$0xff]  ;;  %v280_v40 = vld [vmem:[%s8579_s6 + $0x260] sm:$0xff] }
  0x26   : > { %277 = vst [vmem:[%s8584_s7 + $0x130] sm:$0xff] %v276_v38  ;;  %v282_v41 = vld [vmem:[%s8579_s6 + $0x268] sm:$0xff]  ;;  %279 = vst [vmem:[%s8584_s7 + $0x138] sm:$0xff] %v278_v39  ;;  %v284_v42 = vld [vmem:[%s8579_s6 + $0x270] sm:$0xff] }
  0x27   : > { %281 = vst [vmem:[%s8584_s7 + $0x140] sm:$0xff] %v280_v40  ;;  %283 = vst [vmem:[%s8584_s7 + $0x148] sm:$0xff] %v282_v41  ;;  %v286_v43 = vld [vmem:[%s8579_s6 + $0x278] sm:$0xff]  ;;  %v288_v44 = vld [vmem:[%s8579_s6 + $0x280] sm:$0xff] }
  0x28   : > { %285 = vst [vmem:[%s8584_s7 + $0x150] sm:$0xff] %v284_v42  ;;  %287 = vst [vmem:[%s8584_s7 + $0x158] sm:$0xff] %v286_v43  ;;  %v290_v45 = vld [vmem:[%s8579_s6 + $0x288] sm:$0xff]  ;;  %v292_v46 = vld [vmem:[%s8579_s6 + $0x290] sm:$0xff] }
  0x29   : > { %289 = vst [vmem:[%s8584_s7 + $0x160] sm:$0xff] %v288_v44  ;;  %v294_v47 = vld [vmem:[%s8579_s6 + $0x298] sm:$0xff]  ;;  %291 = vst [vmem:[%s8584_s7 + $0x168] sm:$0xff] %v290_v45  ;;  %v296_v48 = vld [vmem:[%s8579_s6 + $0x2a0] sm:$0xff] }
  0x2a   : > { %293 = vst [vmem:[%s8584_s7 + $0x170] sm:$0xff] %v292_v46  ;;  %295 = vst [vmem:[%s8584_s7 + $0x178] sm:$0xff] %v294_v47  ;;  %v298_v49 = vld [vmem:[%s8579_s6 + $0x2a8] sm:$0xff]  ;;  %v300_v50 = vld [vmem:[%s8579_s6 + $0x2b0] sm:$0xff] }
  0x2b   : > { %297 = vst [vmem:[%s8584_s7 + $0x180] sm:$0xff] %v296_v48  ;;  %299 = vst [vmem:[%s8584_s7 + $0x188] sm:$0xff] %v298_v49  ;;  %v302_v51 = vld [vmem:[%s8579_s6 + $0x2b8] sm:$0xff]  ;;  %v304_v52 = vld [vmem:[%s8579_s6 + $0x2c0] sm:$0xff] }
  0x2c   : > { %301 = vst [vmem:[%s8584_s7 + $0x190] sm:$0xff] %v300_v50  ;;  %v306_v53 = vld [vmem:[%s8579_s6 + $0x2c8] sm:$0xff]  ;;  %303 = vst [vmem:[%s8584_s7 + $0x198] sm:$0xff] %v302_v51  ;;  %v308_v54 = vld [vmem:[%s8579_s6 + $0x360] sm:$0xff] }
  0x2d   : > { %305 = vst [vmem:[%s8584_s7 + $0x1a0] sm:$0xff] %v304_v52  ;;  %307 = vst [vmem:[%s8584_s7 + $0x1a8] sm:$0xff] %v306_v53  ;;  %v310_v55 = vld [vmem:[%s8579_s6 + $0x368] sm:$0xff]  ;;  %v312_v56 = vld [vmem:[%s8579_s6 + $0x370] sm:$0xff] }
  0x2e   : > { %309 = vst [vmem:[%s8584_s7 + $0x1b0] sm:$0xff] %v308_v54  ;;  %311 = vst [vmem:[%s8584_s7 + $0x1b8] sm:$0xff] %v310_v55  ;;  %v314_v57 = vld [vmem:[%s8579_s6 + $0x378] sm:$0xff]  ;;  %v316_v58 = vld [vmem:[%s8579_s6 + $0x380] sm:$0xff] }
  0x2f   : > { %313 = vst [vmem:[%s8584_s7 + $0x1c0] sm:$0xff] %v312_v56  ;;  %v318_v59 = vld [vmem:[%s8579_s6 + $0x388] sm:$0xff]  ;;  %315 = vst [vmem:[%s8584_s7 + $0x1c8] sm:$0xff] %v314_v57  ;;  %v320_v60 = vld [vmem:[%s8579_s6 + $0x390] sm:$0xff] }
  0x30   : > { %317 = vst [vmem:[%s8584_s7 + $0x1d0] sm:$0xff] %v316_v58  ;;  %319 = vst [vmem:[%s8584_s7 + $0x1d8] sm:$0xff] %v318_v59  ;;  %v322_v61 = vld [vmem:[%s8579_s6 + $0x398] sm:$0xff]  ;;  %v324_v62 = vld [vmem:[%s8579_s6 + $0x3a0] sm:$0xff] }
  0x31   : > { %321 = vst [vmem:[%s8584_s7 + $0x1e0] sm:$0xff] %v320_v60  ;;  %323 = vst [vmem:[%s8584_s7 + $0x1e8] sm:$0xff] %v322_v61  ;;  %v326_v63 = vld [vmem:[%s8579_s6 + $0x3a8] sm:$0xff]  ;;  %v328_v0 = vld [vmem:[%s8579_s6 + $0x3b0] sm:$0xff] }
  0x32   : > { %325 = vst [vmem:[%s8584_s7 + $0x1f0] sm:$0xff] %v324_v62  ;;  %v330_v1 = vld [vmem:[%s8579_s6 + $0x3b8] sm:$0xff]  ;;  %327 = vst [vmem:[%s8584_s7 + $0x1f8] sm:$0xff] %v326_v63  ;;  %v332_v2 = vld [vmem:[%s8579_s6 + $0x3c0] sm:$0xff] }
  0x33   : > { %329 = vst [vmem:[%s8584_s7 + $0x200] sm:$0xff] %v328_v0  ;;  %331 = vst [vmem:[%s8584_s7 + $0x208] sm:$0xff] %v330_v1  ;;  %v334_v3 = vld [vmem:[%s8579_s6 + $0x3c8] sm:$0xff]  ;;  %v336_v4 = vld [vmem:[%s8579_s6 + $0x3d0] sm:$0xff] }
  0x34   : > { %333 = vst [vmem:[%s8584_s7 + $0x210] sm:$0xff] %v332_v2  ;;  %335 = vst [vmem:[%s8584_s7 + $0x218] sm:$0xff] %v334_v3  ;;  %v338_v5 = vld [vmem:[%s8579_s6 + $0x3d8] sm:$0xff]  ;;  %v340_v6 = vld [vmem:[%s8579_s6 + $0x3e0] sm:$0xff] }
  0x35   : > { %337 = vst [vmem:[%s8584_s7 + $0x220] sm:$0xff] %v336_v4  ;;  %v342_v7 = vld [vmem:[%s8579_s6 + $0x3e8] sm:$0xff]  ;;  %339 = vst [vmem:[%s8584_s7 + $0x228] sm:$0xff] %v338_v5  ;;  %v344_v8 = vld [vmem:[%s8579_s6 + $0x480] sm:$0xff] }
  0x36   : > { %341 = vst [vmem:[%s8584_s7 + $0x230] sm:$0xff] %v340_v6  ;;  %343 = vst [vmem:[%s8584_s7 + $0x238] sm:$0xff] %v342_v7  ;;  %v346_v9 = vld [vmem:[%s8579_s6 + $0x488] sm:$0xff]  ;;  %v348_v10 = vld [vmem:[%s8579_s6 + $0x490] sm:$0xff] }
  0x37   : > { %345 = vst [vmem:[%s8584_s7 + $0x240] sm:$0xff] %v344_v8  ;;  %347 = vst [vmem:[%s8584_s7 + $0x248] sm:$0xff] %v346_v9  ;;  %v350_v11 = vld [vmem:[%s8579_s6 + $0x498] sm:$0xff]  ;;  %v352_v12 = vld [vmem:[%s8579_s6 + $0x4a0] sm:$0xff] }
  0x38   : > { %349 = vst [vmem:[%s8584_s7 + $0x250] sm:$0xff] %v348_v10  ;;  %v354_v13 = vld [vmem:[%s8579_s6 + $0x4a8] sm:$0xff]  ;;  %351 = vst [vmem:[%s8584_s7 + $0x258] sm:$0xff] %v350_v11  ;;  %v356_v14 = vld [vmem:[%s8579_s6 + $0x4b0] sm:$0xff] }
  0x39   : > { %353 = vst [vmem:[%s8584_s7 + $0x260] sm:$0xff] %v352_v12  ;;  %355 = vst [vmem:[%s8584_s7 + $0x268] sm:$0xff] %v354_v13  ;;  %v358_v15 = vld [vmem:[%s8579_s6 + $0x4b8] sm:$0xff]  ;;  %v360_v16 = vld [vmem:[%s8579_s6 + $0x4c0] sm:$0xff] }
  0x3a   : > { %357 = vst [vmem:[%s8584_s7 + $0x270] sm:$0xff] %v356_v14  ;;  %359 = vst [vmem:[%s8584_s7 + $0x278] sm:$0xff] %v358_v15  ;;  %v362_v17 = vld [vmem:[%s8579_s6 + $0x4c8] sm:$0xff]  ;;  %v364_v18 = vld [vmem:[%s8579_s6 + $0x4d0] sm:$0xff] }
  0x3b   : > { %361 = vst [vmem:[%s8584_s7 + $0x280] sm:$0xff] %v360_v16  ;;  %v366_v19 = vld [vmem:[%s8579_s6 + $0x4d8] sm:$0xff]  ;;  %363 = vst [vmem:[%s8584_s7 + $0x288] sm:$0xff] %v362_v17  ;;  %v368_v20 = vld [vmem:[%s8579_s6 + $0x4e0] sm:$0xff] }
  0x3c   : > { %365 = vst [vmem:[%s8584_s7 + $0x290] sm:$0xff] %v364_v18  ;;  %367 = vst [vmem:[%s8584_s7 + $0x298] sm:$0xff] %v366_v19  ;;  %v370_v21 = vld [vmem:[%s8579_s6 + $0x4e8] sm:$0xff]  ;;  %v372_v22 = vld [vmem:[%s8579_s6 + $0x4f0] sm:$0xff] }
  0x3d   : > { %369 = vst [vmem:[%s8584_s7 + $0x2a0] sm:$0xff] %v368_v20  ;;  %371 = vst [vmem:[%s8584_s7 + $0x2a8] sm:$0xff] %v370_v21  ;;  %v374_v23 = vld [vmem:[%s8579_s6 + $0x4f8] sm:$0xff]  ;;  %v376_v24 = vld [vmem:[%s8579_s6 + $0x500] sm:$0xff] }
  0x3e   : > { %373 = vst [vmem:[%s8584_s7 + $0x2b0] sm:$0xff] %v372_v22  ;;  %v378_v25 = vld [vmem:[%s8579_s6 + $0x508] sm:$0xff]  ;;  %375 = vst [vmem:[%s8584_s7 + $0x2b8] sm:$0xff] %v374_v23  ;;  %v380_v26 = vld [vmem:[%s8579_s6 + $0x5a0] sm:$0xff] }
  0x3f   : > { %377 = vst [vmem:[%s8584_s7 + $0x2c0] sm:$0xff] %v376_v24  ;;  %379 = vst [vmem:[%s8584_s7 + $0x2c8] sm:$0xff] %v378_v25  ;;  %v382_v27 = vld [vmem:[%s8579_s6 + $0x5a8] sm:$0xff]  ;;  %v384_v28 = vld [vmem:[%s8579_s6 + $0x5b0] sm:$0xff] }
  0x40   : > { %381 = vst [vmem:[%s8584_s7 + $0x2d0] sm:$0xff] %v380_v26  ;;  %383 = vst [vmem:[%s8584_s7 + $0x2d8] sm:$0xff] %v382_v27  ;;  %v386_v29 = vld [vmem:[%s8579_s6 + $0x5b8] sm:$0xff]  ;;  %v388_v30 = vld [vmem:[%s8579_s6 + $0x5c0] sm:$0xff] }
  0x41   : > { %385 = vst [vmem:[%s8584_s7 + $0x2e0] sm:$0xff] %v384_v28  ;;  %v390_v31 = vld [vmem:[%s8579_s6 + $0x5c8] sm:$0xff]  ;;  %387 = vst [vmem:[%s8584_s7 + $0x2e8] sm:$0xff] %v386_v29  ;;  %v392_v32 = vld [vmem:[%s8579_s6 + $0x5d0] sm:$0xff] }
  0x42   : > { %389 = vst [vmem:[%s8584_s7 + $0x2f0] sm:$0xff] %v388_v30  ;;  %391 = vst [vmem:[%s8584_s7 + $0x2f8] sm:$0xff] %v390_v31  ;;  %v394_v33 = vld [vmem:[%s8579_s6 + $0x5d8] sm:$0xff]  ;;  %v396_v34 = vld [vmem:[%s8579_s6 + $0x5e0] sm:$0xff] }
  0x43   : > { %393 = vst [vmem:[%s8584_s7 + $0x300] sm:$0xff] %v392_v32  ;;  %395 = vst [vmem:[%s8584_s7 + $0x308] sm:$0xff] %v394_v33  ;;  %v398_v35 = vld [vmem:[%s8579_s6 + $0x5e8] sm:$0xff]  ;;  %v400_v36 = vld [vmem:[%s8579_s6 + $0x5f0] sm:$0xff] }
  0x44   : > { %397 = vst [vmem:[%s8584_s7 + $0x310] sm:$0xff] %v396_v34  ;;  %v402_v37 = vld [vmem:[%s8579_s6 + $0x5f8] sm:$0xff]  ;;  %399 = vst [vmem:[%s8584_s7 + $0x318] sm:$0xff] %v398_v35  ;;  %v404_v38 = vld [vmem:[%s8579_s6 + $0x600] sm:$0xff] }
  0x45   : > { %401 = vst [vmem:[%s8584_s7 + $0x320] sm:$0xff] %v400_v36  ;;  %403 = vst [vmem:[%s8584_s7 + $0x328] sm:$0xff] %v402_v37  ;;  %v406_v39 = vld [vmem:[%s8579_s6 + $0x608] sm:$0xff]  ;;  %v408_v40 = vld [vmem:[%s8579_s6 + $0x610] sm:$0xff] }
  0x46   : > { %405 = vst [vmem:[%s8584_s7 + $0x330] sm:$0xff] %v404_v38  ;;  %407 = vst [vmem:[%s8584_s7 + $0x338] sm:$0xff] %v406_v39  ;;  %v410_v41 = vld [vmem:[%s8579_s6 + $0x618] sm:$0xff]  ;;  %v412_v42 = vld [vmem:[%s8579_s6 + $0x620] sm:$0xff] }
  0x47   : > { %409 = vst [vmem:[%s8584_s7 + $0x340] sm:$0xff] %v408_v40  ;;  %v414_v43 = vld [vmem:[%s8579_s6 + $0x628] sm:$0xff]  ;;  %411 = vst [vmem:[%s8584_s7 + $0x348] sm:$0xff] %v410_v41  ;;  %v416_v44 = vld [vmem:[%s8579_s6 + $0x6c0] sm:$0xff] }
  0x48   : > { %413 = vst [vmem:[%s8584_s7 + $0x350] sm:$0xff] %v412_v42  ;;  %415 = vst [vmem:[%s8584_s7 + $0x358] sm:$0xff] %v414_v43  ;;  %v418_v45 = vld [vmem:[%s8579_s6 + $0x6c8] sm:$0xff]  ;;  %v420_v46 = vld [vmem:[%s8579_s6 + $0x6d0] sm:$0xff] }
  0x49   : > { %417 = vst [vmem:[%s8584_s7 + $0x360] sm:$0xff] %v416_v44  ;;  %419 = vst [vmem:[%s8584_s7 + $0x368] sm:$0xff] %v418_v45  ;;  %v422_v47 = vld [vmem:[%s8579_s6 + $0x6d8] sm:$0xff]  ;;  %v424_v48 = vld [vmem:[%s8579_s6 + $0x6e0] sm:$0xff] }
  0x4a   : > { %421 = vst [vmem:[%s8584_s7 + $0x370] sm:$0xff] %v420_v46  ;;  %v426_v49 = vld [vmem:[%s8579_s6 + $0x6e8] sm:$0xff]  ;;  %423 = vst [vmem:[%s8584_s7 + $0x378] sm:$0xff] %v422_v47  ;;  %v428_v50 = vld [vmem:[%s8579_s6 + $0x6f0] sm:$0xff] }
  0x4b   : > { %425 = vst [vmem:[%s8584_s7 + $0x380] sm:$0xff] %v424_v48  ;;  %427 = vst [vmem:[%s8584_s7 + $0x388] sm:$0xff] %v426_v49  ;;  %v430_v51 = vld [vmem:[%s8579_s6 + $0x6f8] sm:$0xff]  ;;  %v432_v52 = vld [vmem:[%s8579_s6 + $0x700] sm:$0xff] }
  0x4c   : > { %429 = vst [vmem:[%s8584_s7 + $0x390] sm:$0xff] %v428_v50  ;;  %431 = vst [vmem:[%s8584_s7 + $0x398] sm:$0xff] %v430_v51  ;;  %v434_v53 = vld [vmem:[%s8579_s6 + $0x708] sm:$0xff]  ;;  %v436_v54 = vld [vmem:[%s8579_s6 + $0x710] sm:$0xff] }
  0x4d   : > { %433 = vst [vmem:[%s8584_s7 + $0x3a0] sm:$0xff] %v432_v52  ;;  %v438_v55 = vld [vmem:[%s8579_s6 + $0x718] sm:$0xff]  ;;  %435 = vst [vmem:[%s8584_s7 + $0x3a8] sm:$0xff] %v434_v53  ;;  %v440_v56 = vld [vmem:[%s8579_s6 + $0x720] sm:$0xff] }
  0x4e   : > { %437 = vst [vmem:[%s8584_s7 + $0x3b0] sm:$0xff] %v436_v54  ;;  %439 = vst [vmem:[%s8584_s7 + $0x3b8] sm:$0xff] %v438_v55  ;;  %v442_v57 = vld [vmem:[%s8579_s6 + $0x728] sm:$0xff]  ;;  %v444_v58 = vld [vmem:[%s8579_s6 + $0x730] sm:$0xff] }
  0x4f   : > { %441 = vst [vmem:[%s8584_s7 + $0x3c0] sm:$0xff] %v440_v56  ;;  %443 = vst [vmem:[%s8584_s7 + $0x3c8] sm:$0xff] %v442_v57  ;;  %v446_v59 = vld [vmem:[%s8579_s6 + $0x738] sm:$0xff]  ;;  %v448_v60 = vld [vmem:[%s8579_s6 + $0x740] sm:$0xff] }
  0x50   : > { %445 = vst [vmem:[%s8584_s7 + $0x3d0] sm:$0xff] %v444_v58  ;;  %v450_v61 = vld [vmem:[%s8579_s6 + $0x748] sm:$0xff]  ;;  %447 = vst [vmem:[%s8584_s7 + $0x3d8] sm:$0xff] %v446_v59  ;;  %v452_v62 = vld [vmem:[%s8579_s6 + $0x7e0] sm:$0xff] }
  0x51   : > { %449 = vst [vmem:[%s8584_s7 + $0x3e0] sm:$0xff] %v448_v60  ;;  %451 = vst [vmem:[%s8584_s7 + $0x3e8] sm:$0xff] %v450_v61  ;;  %v454_v63 = vld [vmem:[%s8579_s6 + $0x7e8] sm:$0xff]  ;;  %v456_v0 = vld [vmem:[%s8579_s6 + $0x7f0] sm:$0xff] }
  0x52   : > { %453 = vst [vmem:[%s8584_s7 + $0x3f0] sm:$0xff] %v452_v62  ;;  %455 = vst [vmem:[%s8584_s7 + $0x3f8] sm:$0xff] %v454_v63  ;;  %v458_v1 = vld [vmem:[%s8579_s6 + $0x7f8] sm:$0xff]  ;;  %v460_v2 = vld [vmem:[%s8579_s6 + $0x800] sm:$0xff] }
  0x53   : > { %457 = vst [vmem:[%s8584_s7 + $0x400] sm:$0xff] %v456_v0  ;;  %v462_v3 = vld [vmem:[%s8579_s6 + $0x808] sm:$0xff]  ;;  %459 = vst [vmem:[%s8584_s7 + $0x408] sm:$0xff] %v458_v1  ;;  %v464_v4 = vld [vmem:[%s8579_s6 + $0x810] sm:$0xff] }
  0x54   : > { %461 = vst [vmem:[%s8584_s7 + $0x410] sm:$0xff] %v460_v2  ;;  %463 = vst [vmem:[%s8584_s7 + $0x418] sm:$0xff] %v462_v3  ;;  %v466_v5 = vld [vmem:[%s8579_s6 + $0x818] sm:$0xff]  ;;  %v468_v6 = vld [vmem:[%s8579_s6 + $0x820] sm:$0xff] }
  0x55   : > { %465 = vst [vmem:[%s8584_s7 + $0x420] sm:$0xff] %v464_v4  ;;  %467 = vst [vmem:[%s8584_s7 + $0x428] sm:$0xff] %v466_v5  ;;  %v470_v7 = vld [vmem:[%s8579_s6 + $0x828] sm:$0xff]  ;;  %v472_v8 = vld [vmem:[%s8579_s6 + $0x830] sm:$0xff] }
  0x56   : > { %469 = vst [vmem:[%s8584_s7 + $0x430] sm:$0xff] %v468_v6  ;;  %v474_v9 = vld [vmem:[%s8579_s6 + $0x838] sm:$0xff]  ;;  %471 = vst [vmem:[%s8584_s7 + $0x438] sm:$0xff] %v470_v7  ;;  %v476_v10 = vld [vmem:[%s8579_s6 + $0x840] sm:$0xff] }
  0x57   : > { %473 = vst [vmem:[%s8584_s7 + $0x440] sm:$0xff] %v472_v8  ;;  %475 = vst [vmem:[%s8584_s7 + $0x448] sm:$0xff] %v474_v9  ;;  %v478_v11 = vld [vmem:[%s8579_s6 + $0x848] sm:$0xff]  ;;  %v480_v12 = vld [vmem:[%s8579_s6 + $0x850] sm:$0xff] }
  0x58   : > { %477 = vst [vmem:[%s8584_s7 + $0x450] sm:$0xff] %v476_v10  ;;  %479 = vst [vmem:[%s8584_s7 + $0x458] sm:$0xff] %v478_v11  ;;  %v482_v13 = vld [vmem:[%s8579_s6 + $0x858] sm:$0xff]  ;;  %v484_v14 = vld [vmem:[%s8579_s6 + $0x860] sm:$0xff] }
  0x59   : > { %481 = vst [vmem:[%s8584_s7 + $0x460] sm:$0xff] %v480_v12  ;;  %v486_v15 = vld [vmem:[%s8579_s6 + $0x868] sm:$0xff]  ;;  %483 = vst [vmem:[%s8584_s7 + $0x468] sm:$0xff] %v482_v13  ;;  %v488_v16 = vld [vmem:[%s8579_s6 + $0x900] sm:$0xff] }
  0x5a   : > { %485 = vst [vmem:[%s8584_s7 + $0x470] sm:$0xff] %v484_v14  ;;  %487 = vst [vmem:[%s8584_s7 + $0x478] sm:$0xff] %v486_v15  ;;  %v490_v17 = vld [vmem:[%s8579_s6 + $0x908] sm:$0xff]  ;;  %v492_v18 = vld [vmem:[%s8579_s6 + $0x910] sm:$0xff] }
  0x5b   : > { %489 = vst [vmem:[%s8584_s7 + $0x480] sm:$0xff] %v488_v16  ;;  %491 = vst [vmem:[%s8584_s7 + $0x488] sm:$0xff] %v490_v17  ;;  %v494_v19 = vld [vmem:[%s8579_s6 + $0x918] sm:$0xff]  ;;  %v496_v20 = vld [vmem:[%s8579_s6 + $0x920] sm:$0xff] }
  0x5c   : > { %493 = vst [vmem:[%s8584_s7 + $0x490] sm:$0xff] %v492_v18  ;;  %v498_v21 = vld [vmem:[%s8579_s6 + $0x928] sm:$0xff]  ;;  %495 = vst [vmem:[%s8584_s7 + $0x498] sm:$0xff] %v494_v19  ;;  %v500_v22 = vld [vmem:[%s8579_s6 + $0x930] sm:$0xff] }
  0x5d   : > { %497 = vst [vmem:[%s8584_s7 + $0x4a0] sm:$0xff] %v496_v20  ;;  %499 = vst [vmem:[%s8584_s7 + $0x4a8] sm:$0xff] %v498_v21  ;;  %v502_v23 = vld [vmem:[%s8579_s6 + $0x938] sm:$0xff]  ;;  %v504_v24 = vld [vmem:[%s8579_s6 + $0x940] sm:$0xff] }
  0x5e   : > { %501 = vst [vmem:[%s8584_s7 + $0x4b0] sm:$0xff] %v500_v22  ;;  %503 = vst [vmem:[%s8584_s7 + $0x4b8] sm:$0xff] %v502_v23  ;;  %v506_v25 = vld [vmem:[%s8579_s6 + $0x948] sm:$0xff]  ;;  %v508_v26 = vld [vmem:[%s8579_s6 + $0x950] sm:$0xff] }
  0x5f   : > { %505 = vst [vmem:[%s8584_s7 + $0x4c0] sm:$0xff] %v504_v24  ;;  %v510_v27 = vld [vmem:[%s8579_s6 + $0x958] sm:$0xff]  ;;  %507 = vst [vmem:[%s8584_s7 + $0x4c8] sm:$0xff] %v506_v25  ;;  %v512_v28 = vld [vmem:[%s8579_s6 + $0x960] sm:$0xff] }
  0x60   : > { %509 = vst [vmem:[%s8584_s7 + $0x4d0] sm:$0xff] %v508_v26  ;;  %511 = vst [vmem:[%s8584_s7 + $0x4d8] sm:$0xff] %v510_v27  ;;  %v514_v29 = vld [vmem:[%s8579_s6 + $0x968] sm:$0xff]  ;;  %v516_v30 = vld [vmem:[%s8579_s6 + $0x970] sm:$0xff] }
  0x61   : > { %513 = vst [vmem:[%s8584_s7 + $0x4e0] sm:$0xff] %v512_v28  ;;  %515 = vst [vmem:[%s8584_s7 + $0x4e8] sm:$0xff] %v514_v29  ;;  %v518_v31 = vld [vmem:[%s8579_s6 + $0x978] sm:$0xff]  ;;  %v520_v32 = vld [vmem:[%s8579_s6 + $0x980] sm:$0xff] }
  0x62   : > { %517 = vst [vmem:[%s8584_s7 + $0x4f0] sm:$0xff] %v516_v30  ;;  %v522_v33 = vld [vmem:[%s8579_s6 + $0x988] sm:$0xff]  ;;  %519 = vst [vmem:[%s8584_s7 + $0x4f8] sm:$0xff] %v518_v31  ;;  %v524_v34 = vld [vmem:[%s8579_s6 + $0xa20] sm:$0xff] }
  0x63   : > { %521 = vst [vmem:[%s8584_s7 + $0x500] sm:$0xff] %v520_v32  ;;  %523 = vst [vmem:[%s8584_s7 + $0x508] sm:$0xff] %v522_v33  ;;  %v526_v35 = vld [vmem:[%s8579_s6 + $0xa28] sm:$0xff]  ;;  %v528_v36 = vld [vmem:[%s8579_s6 + $0xa30] sm:$0xff] }
  0x64   : > { %525 = vst [vmem:[%s8584_s7 + $0x510] sm:$0xff] %v524_v34  ;;  %527 = vst [vmem:[%s8584_s7 + $0x518] sm:$0xff] %v526_v35  ;;  %v530_v37 = vld [vmem:[%s8579_s6 + $0xa38] sm:$0xff]  ;;  %v532_v38 = vld [vmem:[%s8579_s6 + $0xa40] sm:$0xff] }
  0x65   : > { %529 = vst [vmem:[%s8584_s7 + $0x520] sm:$0xff] %v528_v36  ;;  %v534_v39 = vld [vmem:[%s8579_s6 + $0xa48] sm:$0xff]  ;;  %531 = vst [vmem:[%s8584_s7 + $0x528] sm:$0xff] %v530_v37  ;;  %v536_v40 = vld [vmem:[%s8579_s6 + $0xa50] sm:$0xff] }
  0x66   : > { %533 = vst [vmem:[%s8584_s7 + $0x530] sm:$0xff] %v532_v38  ;;  %535 = vst [vmem:[%s8584_s7 + $0x538] sm:$0xff] %v534_v39  ;;  %v538_v41 = vld [vmem:[%s8579_s6 + $0xa58] sm:$0xff]  ;;  %v540_v42 = vld [vmem:[%s8579_s6 + $0xa60] sm:$0xff] }
  0x67   : > { %537 = vst [vmem:[%s8584_s7 + $0x540] sm:$0xff] %v536_v40  ;;  %539 = vst [vmem:[%s8584_s7 + $0x548] sm:$0xff] %v538_v41  ;;  %v542_v43 = vld [vmem:[%s8579_s6 + $0xa68] sm:$0xff]  ;;  %v544_v44 = vld [vmem:[%s8579_s6 + $0xa70] sm:$0xff] }
  0x68   : > { %541 = vst [vmem:[%s8584_s7 + $0x550] sm:$0xff] %v540_v42  ;;  %v546_v45 = vld [vmem:[%s8579_s6 + $0xa78] sm:$0xff]  ;;  %543 = vst [vmem:[%s8584_s7 + $0x558] sm:$0xff] %v542_v43  ;;  %v548_v46 = vld [vmem:[%s8579_s6 + $0xa80] sm:$0xff] }
  0x69   : > { %545 = vst [vmem:[%s8584_s7 + $0x560] sm:$0xff] %v544_v44  ;;  %547 = vst [vmem:[%s8584_s7 + $0x568] sm:$0xff] %v546_v45  ;;  %v550_v47 = vld [vmem:[%s8579_s6 + $0xa88] sm:$0xff]  ;;  %v552_v48 = vld [vmem:[%s8579_s6 + $0xa90] sm:$0xff] }
  0x6a   : > { %549 = vst [vmem:[%s8584_s7 + $0x570] sm:$0xff] %v548_v46  ;;  %551 = vst [vmem:[%s8584_s7 + $0x578] sm:$0xff] %v550_v47  ;;  %v554_v49 = vld [vmem:[%s8579_s6 + $0xa98] sm:$0xff]  ;;  %v556_v50 = vld [vmem:[%s8579_s6 + $0xaa0] sm:$0xff] }
  0x6b   : > { %553 = vst [vmem:[%s8584_s7 + $0x580] sm:$0xff] %v552_v48  ;;  %v558_v51 = vld [vmem:[%s8579_s6 + $0xaa8] sm:$0xff]  ;;  %555 = vst [vmem:[%s8584_s7 + $0x588] sm:$0xff] %v554_v49  ;;  %v560_v52 = vld [vmem:[%s8579_s6 + $0xb40] sm:$0xff] }
  0x6c   : > { %557 = vst [vmem:[%s8584_s7 + $0x590] sm:$0xff] %v556_v50  ;;  %559 = vst [vmem:[%s8584_s7 + $0x598] sm:$0xff] %v558_v51  ;;  %v562_v53 = vld [vmem:[%s8579_s6 + $0xb48] sm:$0xff]  ;;  %v564_v54 = vld [vmem:[%s8579_s6 + $0xb50] sm:$0xff] }
  0x6d   : > { %561 = vst [vmem:[%s8584_s7 + $0x5a0] sm:$0xff] %v560_v52  ;;  %563 = vst [vmem:[%s8584_s7 + $0x5a8] sm:$0xff] %v562_v53  ;;  %v566_v55 = vld [vmem:[%s8579_s6 + $0xb58] sm:$0xff]  ;;  %v568_v56 = vld [vmem:[%s8579_s6 + $0xb60] sm:$0xff] }
  0x6e   : > { %565 = vst [vmem:[%s8584_s7 + $0x5b0] sm:$0xff] %v564_v54  ;;  %v570_v57 = vld [vmem:[%s8579_s6 + $0xb68] sm:$0xff]  ;;  %567 = vst [vmem:[%s8584_s7 + $0x5b8] sm:$0xff] %v566_v55  ;;  %v572_v58 = vld [vmem:[%s8579_s6 + $0xb70] sm:$0xff] }
  0x6f   : > { %569 = vst [vmem:[%s8584_s7 + $0x5c0] sm:$0xff] %v568_v56  ;;  %571 = vst [vmem:[%s8584_s7 + $0x5c8] sm:$0xff] %v570_v57  ;;  %v574_v59 = vld [vmem:[%s8579_s6 + $0xb78] sm:$0xff]  ;;  %v576_v60 = vld [vmem:[%s8579_s6 + $0xb80] sm:$0xff] }
  0x70   : > { %573 = vst [vmem:[%s8584_s7 + $0x5d0] sm:$0xff] %v572_v58  ;;  %575 = vst [vmem:[%s8584_s7 + $0x5d8] sm:$0xff] %v574_v59  ;;  %v578_v61 = vld [vmem:[%s8579_s6 + $0xb88] sm:$0xff]  ;;  %v580_v62 = vld [vmem:[%s8579_s6 + $0xb90] sm:$0xff] }
  0x71   : > { %577 = vst [vmem:[%s8584_s7 + $0x5e0] sm:$0xff] %v576_v60  ;;  %v582_v63 = vld [vmem:[%s8579_s6 + $0xb98] sm:$0xff]  ;;  %579 = vst [vmem:[%s8584_s7 + $0x5e8] sm:$0xff] %v578_v61  ;;  %v584_v0 = vld [vmem:[%s8579_s6 + $0xba0] sm:$0xff] }
  0x72   : > { %581 = vst [vmem:[%s8584_s7 + $0x5f0] sm:$0xff] %v580_v62  ;;  %583 = vst [vmem:[%s8584_s7 + $0x5f8] sm:$0xff] %v582_v63  ;;  %v586_v1 = vld [vmem:[%s8579_s6 + $0xba8] sm:$0xff]  ;;  %v588_v2 = vld [vmem:[%s8579_s6 + $0xbb0] sm:$0xff] }
  0x73   : > { %585 = vst [vmem:[%s8584_s7 + $0x600] sm:$0xff] %v584_v0  ;;  %587 = vst [vmem:[%s8584_s7 + $0x608] sm:$0xff] %v586_v1  ;;  %v590_v3 = vld [vmem:[%s8579_s6 + $0xbb8] sm:$0xff]  ;;  %v592_v4 = vld [vmem:[%s8579_s6 + $0xbc0] sm:$0xff] }
  0x74   : > { %589 = vst [vmem:[%s8584_s7 + $0x610] sm:$0xff] %v588_v2  ;;  %v594_v5 = vld [vmem:[%s8579_s6 + $0xbc8] sm:$0xff]  ;;  %591 = vst [vmem:[%s8584_s7 + $0x618] sm:$0xff] %v590_v3  ;;  %v596_v6 = vld [vmem:[%s8579_s6 + $0xc60] sm:$0xff] }
  0x75   : > { %593 = vst [vmem:[%s8584_s7 + $0x620] sm:$0xff] %v592_v4  ;;  %595 = vst [vmem:[%s8584_s7 + $0x628] sm:$0xff] %v594_v5  ;;  %v598_v7 = vld [vmem:[%s8579_s6 + $0xc68] sm:$0xff]  ;;  %v600_v8 = vld [vmem:[%s8579_s6 + $0xc70] sm:$0xff] }
  0x76   : > { %597 = vst [vmem:[%s8584_s7 + $0x630] sm:$0xff] %v596_v6  ;;  %599 = vst [vmem:[%s8584_s7 + $0x638] sm:$0xff] %v598_v7  ;;  %v602_v9 = vld [vmem:[%s8579_s6 + $0xc78] sm:$0xff]  ;;  %v604_v10 = vld [vmem:[%s8579_s6 + $0xc80] sm:$0xff] }
  0x77   : > { %601 = vst [vmem:[%s8584_s7 + $0x640] sm:$0xff] %v600_v8  ;;  %v606_v11 = vld [vmem:[%s8579_s6 + $0xc88] sm:$0xff]  ;;  %603 = vst [vmem:[%s8584_s7 + $0x648] sm:$0xff] %v602_v9  ;;  %v608_v12 = vld [vmem:[%s8579_s6 + $0xc90] sm:$0xff] }
  0x78   : > { %605 = vst [vmem:[%s8584_s7 + $0x650] sm:$0xff] %v604_v10  ;;  %607 = vst [vmem:[%s8584_s7 + $0x658] sm:$0xff] %v606_v11  ;;  %v610_v13 = vld [vmem:[%s8579_s6 + $0xc98] sm:$0xff]  ;;  %v612_v14 = vld [vmem:[%s8579_s6 + $0xca0] sm:$0xff] }
  0x79   : > { %609 = vst [vmem:[%s8584_s7 + $0x660] sm:$0xff] %v608_v12  ;;  %611 = vst [vmem:[%s8584_s7 + $0x668] sm:$0xff] %v610_v13  ;;  %v614_v15 = vld [vmem:[%s8579_s6 + $0xca8] sm:$0xff]  ;;  %v616_v16 = vld [vmem:[%s8579_s6 + $0xcb0] sm:$0xff] }
  0x7a   : > { %613 = vst [vmem:[%s8584_s7 + $0x670] sm:$0xff] %v612_v14  ;;  %v618_v17 = vld [vmem:[%s8579_s6 + $0xcb8] sm:$0xff]  ;;  %615 = vst [vmem:[%s8584_s7 + $0x678] sm:$0xff] %v614_v15  ;;  %v620_v18 = vld [vmem:[%s8579_s6 + $0xcc0] sm:$0xff] }
  0x7b   : > { %617 = vst [vmem:[%s8584_s7 + $0x680] sm:$0xff] %v616_v16  ;;  %619 = vst [vmem:[%s8584_s7 + $0x688] sm:$0xff] %v618_v17  ;;  %v622_v19 = vld [vmem:[%s8579_s6 + $0xcc8] sm:$0xff]  ;;  %v624_v20 = vld [vmem:[%s8579_s6 + $0xcd0] sm:$0xff] }
  0x7c   : > { %621 = vst [vmem:[%s8584_s7 + $0x690] sm:$0xff] %v620_v18  ;;  %623 = vst [vmem:[%s8584_s7 + $0x698] sm:$0xff] %v622_v19  ;;  %v626_v21 = vld [vmem:[%s8579_s6 + $0xcd8] sm:$0xff]  ;;  %v628_v22 = vld [vmem:[%s8579_s6 + $0xce0] sm:$0xff] }
  0x7d   : > { %625 = vst [vmem:[%s8584_s7 + $0x6a0] sm:$0xff] %v624_v20  ;;  %v630_v23 = vld [vmem:[%s8579_s6 + $0xce8] sm:$0xff]  ;;  %627 = vst [vmem:[%s8584_s7 + $0x6a8] sm:$0xff] %v626_v21  ;;  %v632_v24 = vld [vmem:[%s8579_s6 + $0xd80] sm:$0xff] }
  0x7e   : > { %629 = vst [vmem:[%s8584_s7 + $0x6b0] sm:$0xff] %v628_v22  ;;  %631 = vst [vmem:[%s8584_s7 + $0x6b8] sm:$0xff] %v630_v23  ;;  %v634_v25 = vld [vmem:[%s8579_s6 + $0xd88] sm:$0xff]  ;;  %v636_v26 = vld [vmem:[%s8579_s6 + $0xd90] sm:$0xff] }
  0x7f   : > { %633 = vst [vmem:[%s8584_s7 + $0x6c0] sm:$0xff] %v632_v24  ;;  %635 = vst [vmem:[%s8584_s7 + $0x6c8] sm:$0xff] %v634_v25  ;;  %v638_v27 = vld [vmem:[%s8579_s6 + $0xd98] sm:$0xff]  ;;  %v640_v28 = vld [vmem:[%s8579_s6 + $0xda0] sm:$0xff] }
  0x80   : > { %637 = vst [vmem:[%s8584_s7 + $0x6d0] sm:$0xff] %v636_v26  ;;  %v642_v29 = vld [vmem:[%s8579_s6 + $0xda8] sm:$0xff]  ;;  %639 = vst [vmem:[%s8584_s7 + $0x6d8] sm:$0xff] %v638_v27  ;;  %v644_v30 = vld [vmem:[%s8579_s6 + $0xdb0] sm:$0xff] }
  0x81   : > { %641 = vst [vmem:[%s8584_s7 + $0x6e0] sm:$0xff] %v640_v28  ;;  %643 = vst [vmem:[%s8584_s7 + $0x6e8] sm:$0xff] %v642_v29  ;;  %v646_v31 = vld [vmem:[%s8579_s6 + $0xdb8] sm:$0xff]  ;;  %v648_v32 = vld [vmem:[%s8579_s6 + $0xdc0] sm:$0xff] }
  0x82   : > { %645 = vst [vmem:[%s8584_s7 + $0x6f0] sm:$0xff] %v644_v30  ;;  %647 = vst [vmem:[%s8584_s7 + $0x6f8] sm:$0xff] %v646_v31  ;;  %v650_v33 = vld [vmem:[%s8579_s6 + $0xdc8] sm:$0xff]  ;;  %v652_v34 = vld [vmem:[%s8579_s6 + $0xdd0] sm:$0xff] }
  0x83   : > { %649 = vst [vmem:[%s8584_s7 + $0x700] sm:$0xff] %v648_v32  ;;  %v654_v35 = vld [vmem:[%s8579_s6 + $0xdd8] sm:$0xff]  ;;  %651 = vst [vmem:[%s8584_s7 + $0x708] sm:$0xff] %v650_v33  ;;  %v656_v36 = vld [vmem:[%s8579_s6 + $0xde0] sm:$0xff] }
  0x84   : > { %653 = vst [vmem:[%s8584_s7 + $0x710] sm:$0xff] %v652_v34  ;;  %655 = vst [vmem:[%s8584_s7 + $0x718] sm:$0xff] %v654_v35  ;;  %v658_v37 = vld [vmem:[%s8579_s6 + $0xde8] sm:$0xff]  ;;  %v660_v38 = vld [vmem:[%s8579_s6 + $0xdf0] sm:$0xff] }
  0x85   : > { %657 = vst [vmem:[%s8584_s7 + $0x720] sm:$0xff] %v656_v36  ;;  %659 = vst [vmem:[%s8584_s7 + $0x728] sm:$0xff] %v658_v37  ;;  %v662_v39 = vld [vmem:[%s8579_s6 + $0xdf8] sm:$0xff]  ;;  %v664_v40 = vld [vmem:[%s8579_s6 + $0xe00] sm:$0xff] }
  0x86   : > { %661 = vst [vmem:[%s8584_s7 + $0x730] sm:$0xff] %v660_v38  ;;  %v666_v41 = vld [vmem:[%s8579_s6 + $0xe08] sm:$0xff]  ;;  %663 = vst [vmem:[%s8584_s7 + $0x738] sm:$0xff] %v662_v39  ;;  %v668_v42 = vld [vmem:[%s8579_s6 + $0xea0] sm:$0xff] }
  0x87   : > { %665 = vst [vmem:[%s8584_s7 + $0x740] sm:$0xff] %v664_v40  ;;  %667 = vst [vmem:[%s8584_s7 + $0x748] sm:$0xff] %v666_v41  ;;  %v670_v43 = vld [vmem:[%s8579_s6 + $0xea8] sm:$0xff]  ;;  %v672_v44 = vld [vmem:[%s8579_s6 + $0xeb0] sm:$0xff] }
  0x88   : > { %669 = vst [vmem:[%s8584_s7 + $0x750] sm:$0xff] %v668_v42  ;;  %671 = vst [vmem:[%s8584_s7 + $0x758] sm:$0xff] %v670_v43  ;;  %v674_v45 = vld [vmem:[%s8579_s6 + $0xeb8] sm:$0xff]  ;;  %v676_v46 = vld [vmem:[%s8579_s6 + $0xec0] sm:$0xff] }
  0x89   : > { %673 = vst [vmem:[%s8584_s7 + $0x760] sm:$0xff] %v672_v44  ;;  %v678_v47 = vld [vmem:[%s8579_s6 + $0xec8] sm:$0xff]  ;;  %675 = vst [vmem:[%s8584_s7 + $0x768] sm:$0xff] %v674_v45  ;;  %v680_v48 = vld [vmem:[%s8579_s6 + $0xed0] sm:$0xff] }
  0x8a   : > { %677 = vst [vmem:[%s8584_s7 + $0x770] sm:$0xff] %v676_v46  ;;  %679 = vst [vmem:[%s8584_s7 + $0x778] sm:$0xff] %v678_v47  ;;  %v682_v49 = vld [vmem:[%s8579_s6 + $0xed8] sm:$0xff]  ;;  %v684_v50 = vld [vmem:[%s8579_s6 + $0xee0] sm:$0xff] }
  0x8b   : > { %681 = vst [vmem:[%s8584_s7 + $0x780] sm:$0xff] %v680_v48  ;;  %683 = vst [vmem:[%s8584_s7 + $0x788] sm:$0xff] %v682_v49  ;;  %v686_v51 = vld [vmem:[%s8579_s6 + $0xee8] sm:$0xff]  ;;  %v688_v52 = vld [vmem:[%s8579_s6 + $0xef0] sm:$0xff] }
  0x8c   : > { %685 = vst [vmem:[%s8584_s7 + $0x790] sm:$0xff] %v684_v50  ;;  %v690_v53 = vld [vmem:[%s8579_s6 + $0xef8] sm:$0xff]  ;;  %687 = vst [vmem:[%s8584_s7 + $0x798] sm:$0xff] %v686_v51  ;;  %v692_v54 = vld [vmem:[%s8579_s6 + $0xf00] sm:$0xff] }
  0x8d   : > { %689 = vst [vmem:[%s8584_s7 + $0x7a0] sm:$0xff] %v688_v52  ;;  %691 = vst [vmem:[%s8584_s7 + $0x7a8] sm:$0xff] %v690_v53  ;;  %v694_v55 = vld [vmem:[%s8579_s6 + $0xf08] sm:$0xff]  ;;  %v696_v56 = vld [vmem:[%s8579_s6 + $0xf10] sm:$0xff] }
  0x8e   : > { %693 = vst [vmem:[%s8584_s7 + $0x7b0] sm:$0xff] %v692_v54  ;;  %695 = vst [vmem:[%s8584_s7 + $0x7b8] sm:$0xff] %v694_v55  ;;  %v698_v57 = vld [vmem:[%s8579_s6 + $0xf18] sm:$0xff]  ;;  %v700_v58 = vld [vmem:[%s8579_s6 + $0xf20] sm:$0xff] }
  0x8f   : > { %697 = vst [vmem:[%s8584_s7 + $0x7c0] sm:$0xff] %v696_v56  ;;  %v702_v59 = vld [vmem:[%s8579_s6 + $0xf28] sm:$0xff]  ;;  %699 = vst [vmem:[%s8584_s7 + $0x7c8] sm:$0xff] %v698_v57  ;;  %v704_v60 = vld [vmem:[%s8579_s6 + $0xfc0] sm:$0xff] }
  0x90   : > { %701 = vst [vmem:[%s8584_s7 + $0x7d0] sm:$0xff] %v700_v58  ;;  %703 = vst [vmem:[%s8584_s7 + $0x7d8] sm:$0xff] %v702_v59  ;;  %v706_v61 = vld [vmem:[%s8579_s6 + $0xfc8] sm:$0xff]  ;;  %v708_v62 = vld [vmem:[%s8579_s6 + $0xfd0] sm:$0xff] }
  0x91   : > { %705 = vst [vmem:[%s8584_s7 + $0x7e0] sm:$0xff] %v704_v60  ;;  %707 = vst [vmem:[%s8584_s7 + $0x7e8] sm:$0xff] %v706_v61  ;;  %v710_v63 = vld [vmem:[%s8579_s6 + $0xfd8] sm:$0xff]  ;;  %v712_v0 = vld [vmem:[%s8579_s6 + $0xfe0] sm:$0xff] }
  0x92   : > { %709 = vst [vmem:[%s8584_s7 + $0x7f0] sm:$0xff] %v708_v62  ;;  %v714_v1 = vld [vmem:[%s8579_s6 + $0xfe8] sm:$0xff]  ;;  %711 = vst [vmem:[%s8584_s7 + $0x7f8] sm:$0xff] %v710_v63  ;;  %v716_v2 = vld [vmem:[%s8579_s6 + $0xff0] sm:$0xff] }
  0x93   : > { %713 = vst [vmem:[%s8584_s7 + $0x800] sm:$0xff] %v712_v0  ;;  %715 = vst [vmem:[%s8584_s7 + $0x808] sm:$0xff] %v714_v1  ;;  %v718_v3 = vld [vmem:[%s8579_s6 + $0xff8] sm:$0xff]  ;;  %v720_v4 = vld [vmem:[%s8579_s6 + $0x1000] sm:$0xff] }
  0x94   : > { %717 = vst [vmem:[%s8584_s7 + $0x810] sm:$0xff] %v716_v2  ;;  %719 = vst [vmem:[%s8584_s7 + $0x818] sm:$0xff] %v718_v3  ;;  %v722_v5 = vld [vmem:[%s8579_s6 + $0x1008] sm:$0xff]  ;;  %v724_v6 = vld [vmem:[%s8579_s6 + $0x1010] sm:$0xff] }
  0x95   : > { %721 = vst [vmem:[%s8584_s7 + $0x820] sm:$0xff] %v720_v4  ;;  %v726_v7 = vld [vmem:[%s8579_s6 + $0x1018] sm:$0xff]  ;;  %723 = vst [vmem:[%s8584_s7 + $0x828] sm:$0xff] %v722_v5  ;;  %v728_v8 = vld [vmem:[%s8579_s6 + $0x1020] sm:$0xff] }
  0x96   : > { %725 = vst [vmem:[%s8584_s7 + $0x830] sm:$0xff] %v724_v6  ;;  %727 = vst [vmem:[%s8584_s7 + $0x838] sm:$0xff] %v726_v7  ;;  %v730_v9 = vld [vmem:[%s8579_s6 + $0x1028] sm:$0xff]  ;;  %v732_v10 = vld [vmem:[%s8579_s6 + $0x1030] sm:$0xff] }
  0x97   : > { %729 = vst [vmem:[%s8584_s7 + $0x840] sm:$0xff] %v728_v8  ;;  %731 = vst [vmem:[%s8584_s7 + $0x848] sm:$0xff] %v730_v9  ;;  %v734_v11 = vld [vmem:[%s8579_s6 + $0x1038] sm:$0xff]  ;;  %v736_v12 = vld [vmem:[%s8579_s6 + $0x1040] sm:$0xff] }
  0x98   : > { %733 = vst [vmem:[%s8584_s7 + $0x850] sm:$0xff] %v732_v10  ;;  %v738_v13 = vld [vmem:[%s8579_s6 + $0x1048] sm:$0xff]  ;;  %735 = vst [vmem:[%s8584_s7 + $0x858] sm:$0xff] %v734_v11  ;;  %v740_v14 = vld [vmem:[%s8579_s6 + $0x10e0] sm:$0xff] }
  0x99   : > { %737 = vst [vmem:[%s8584_s7 + $0x860] sm:$0xff] %v736_v12  ;;  %739 = vst [vmem:[%s8584_s7 + $0x868] sm:$0xff] %v738_v13  ;;  %v742_v15 = vld [vmem:[%s8579_s6 + $0x10e8] sm:$0xff]  ;;  %v744_v16 = vld [vmem:[%s8579_s6 + $0x10f0] sm:$0xff] }
  0x9a   : > { %741 = vst [vmem:[%s8584_s7 + $0x870] sm:$0xff] %v740_v14  ;;  %743 = vst [vmem:[%s8584_s7 + $0x878] sm:$0xff] %v742_v15  ;;  %v746_v17 = vld [vmem:[%s8579_s6 + $0x10f8] sm:$0xff]  ;;  %v748_v18 = vld [vmem:[%s8579_s6 + $0x1100] sm:$0xff] }
  0x9b   : > { %745 = vst [vmem:[%s8584_s7 + $0x880] sm:$0xff] %v744_v16  ;;  %v750_v19 = vld [vmem:[%s8579_s6 + $0x1108] sm:$0xff]  ;;  %747 = vst [vmem:[%s8584_s7 + $0x888] sm:$0xff] %v746_v17  ;;  %v752_v20 = vld [vmem:[%s8579_s6 + $0x1110] sm:$0xff] }
  0x9c   : > { %749 = vst [vmem:[%s8584_s7 + $0x890] sm:$0xff] %v748_v18  ;;  %751 = vst [vmem:[%s8584_s7 + $0x898] sm:$0xff] %v750_v19  ;;  %v754_v21 = vld [vmem:[%s8579_s6 + $0x1118] sm:$0xff]  ;;  %v756_v22 = vld [vmem:[%s8579_s6 + $0x1120] sm:$0xff] }
  0x9d   : > { %753 = vst [vmem:[%s8584_s7 + $0x8a0] sm:$0xff] %v752_v20  ;;  %755 = vst [vmem:[%s8584_s7 + $0x8a8] sm:$0xff] %v754_v21  ;;  %v758_v23 = vld [vmem:[%s8579_s6 + $0x1128] sm:$0xff]  ;;  %v760_v24 = vld [vmem:[%s8579_s6 + $0x1130] sm:$0xff] }
  0x9e   : > { %757 = vst [vmem:[%s8584_s7 + $0x8b0] sm:$0xff] %v756_v22  ;;  %v762_v25 = vld [vmem:[%s8579_s6 + $0x1138] sm:$0xff]  ;;  %759 = vst [vmem:[%s8584_s7 + $0x8b8] sm:$0xff] %v758_v23  ;;  %v764_v26 = vld [vmem:[%s8579_s6 + $0x1140] sm:$0xff] }
  0x9f   : > { %761 = vst [vmem:[%s8584_s7 + $0x8c0] sm:$0xff] %v760_v24  ;;  %763 = vst [vmem:[%s8584_s7 + $0x8c8] sm:$0xff] %v762_v25  ;;  %v766_v27 = vld [vmem:[%s8579_s6 + $0x1148] sm:$0xff]  ;;  %v768_v28 = vld [vmem:[%s8579_s6 + $0x1150] sm:$0xff] }
  0xa0   : > { %765 = vst [vmem:[%s8584_s7 + $0x8d0] sm:$0xff] %v764_v26  ;;  %767 = vst [vmem:[%s8584_s7 + $0x8d8] sm:$0xff] %v766_v27  ;;  %v770_v29 = vld [vmem:[%s8579_s6 + $0x1158] sm:$0xff]  ;;  %v772_v30 = vld [vmem:[%s8579_s6 + $0x1160] sm:$0xff] }
  0xa1   : > { %769 = vst [vmem:[%s8584_s7 + $0x8e0] sm:$0xff] %v768_v28  ;;  %v774_v31 = vld [vmem:[%s8579_s6 + $0x1168] sm:$0xff]  ;;  %771 = vst [vmem:[%s8584_s7 + $0x8e8] sm:$0xff] %v770_v29 }
  0xa2   : > { %773 = vst [vmem:[%s8584_s7 + $0x8f0] sm:$0xff] %v772_v30  ;;  %775 = vst [vmem:[%s8584_s7 + $0x8f8] sm:$0xff] %v774_v31 }
  0xa3 PF: > { %p6714_p5 = scmp.ge.s32.totalorder %s8508_s20, 1  ;;  %p797_p6 = scmp.lt.s32.totalorder %s8508_s20, 3 }
  0xa5   : > { %p798_p7 = pnand %p6714_p5, %p797_p6 }
  0xa6   : > { %s804_s8 = sand.u32 (!%p798_p7), 1, %s8500_s18   ;;  %s836_s9 = smul.u32 (!%p798_p7), 36, %s8559_s21 }
  0xa7   : > { %801 = sbr.rel (%p798_p7) target bundleno = 1334 (0x536), region = 59  ;;  %p6716_p10 = scmp.ne.s32.totalorder (!%p798_p7), %s8559_s21, 0 }
  0xa8   : > { %s7697_s10 = smul.u32 (!%p798_p7), 2304, %s804_s8  ;;  %p837_p8 = scmp.lt.s32.totalorder (!%p798_p7), %s836_s9, 71 }
  0xa9   : > { %s841_s11 = smul.u32 (!%p798_p7), 576, %s8559_s21 }
  0xaa   : > { %s9174_s23 = scalar_lea.vmem (!%p798_p7), [#allocation2], %s7697_s10 }
  0xab   : > { %p842_p9 = scmp.lt.s32.totalorder (!%p798_p7), %s841_s11, 1151 }
  0xae   : > { %s10074_s9 = smov (!%p837_p8, %s836_s9), 71  ;;  %s10076_s11 = smov (!%p842_p9, %s841_s11), 1151 }
  0xaf   : > { %s9167_s14 = scalar_lea.vmem %s10066_s2, %s10074_s9  ;;  %s6715_s15 = sshll.u32 %s10076_s11, 2  ;;  %vm852_vm0 = vcmask (!%p6716_p10), 523264   ;;  %v8510_v32 = vmov (!%p6716_p10), 0.0  }
  0xb0   : > { %s9172_s20 = scalar_lea.vmem %s10067_s3, %s6715_s15  ;;  %851 = sbr.rel (%p6716_p10) target bundleno = 183 (0xb7), region = 67  ;;  %853 = vst.msk [vmem:[#allocation3] sm:$0xff] (!%p6716_p10), %vm852_vm0, %v8510_v32 }
  0xb7 PF: > { %v7731_v33 = vld [vmem:[%s9174_s23 + $0x4] ss:$144 sps:$4 sm:$0xff]   ;;  %v7733_v34 = vld [vmem:[%s9174_s23 + $0xc] ss:$144 sps:$4 sm:$0xff]   ;;  %v8511_v35 = vmov 0   ;;  %vm6609_vm1 = vcmask 523264  }
  0xb8   : > { %2805 = vmatprep.mubr.bf16.mxu0 %v8511_v35  ;;  %2846 = vmatprep.mubr.bf16.mxu1 %v8511_v35  ;;  %v7735_v36 = vld [vmem:[%s9174_s23] ss:$144 sps:$4 sm:$0xff]   ;;  %v7736_v37 = vld [vmem:[%s9174_s23 + $0x8] ss:$144 sps:$4 sm:$0xff]   ;;  %v7737_v38 = vld [vmem:[%s9174_s23 + $0x124] ss:$144 sps:$4 sm:$0xff]  }
  0xb9   : > { %2773 = vmatprep.subr.bf16.mxu0 %v7731_v33  ;;  %2814 = vmatprep.subr.bf16.mxu1 %v7733_v34  ;;  %v7739_v39 = vld [vmem:[%s9174_s23 + $0x12c] ss:$144 sps:$4 sm:$0xff]   ;;  %v7741_v40 = vld [vmem:[%s9174_s23 + $0x120] ss:$144 sps:$4 sm:$0xff]   ;;  %v7742_v41 = vld [vmem:[%s9174_s23 + $0x128] ss:$144 sps:$4 sm:$0xff]  }
  0xba   : > { %2774 = vmatpush1.bf16.msra.mxu0 %v7735_v36  ;;  %2815 = vmatpush1.bf16.msra.mxu1 %v7736_v37  ;;  %v7743_v42 = vld [vmem:[%s9174_s23 + $0x244] ss:$144 sps:$4 sm:$0xff]   ;;  %v7745_v43 = vld [vmem:[%s9174_s23 + $0x24c] ss:$144 sps:$4 sm:$0xff]   ;;  %v7747_v44 = vld [vmem:[%s9174_s23 + $0x240] ss:$144 sps:$4 sm:$0xff]  }
  0xbb   : > { %2775 = vmatprep.subr.bf16.mxu0 %v7737_v38  ;;  %2816 = vmatprep.subr.bf16.mxu1 %v7739_v39  ;;  %v7748_v45 = vld [vmem:[%s9174_s23 + $0x248] ss:$144 sps:$4 sm:$0xff]   ;;  %v7749_v46 = vld [vmem:[%s9174_s23 + $0x364] ss:$144 sps:$4 sm:$0xff]   ;;  %v7751_v47 = vld [vmem:[%s9174_s23 + $0x36c] ss:$144 sps:$4 sm:$0xff]  }
  0xbc   : > { %v7753_v48 = vld [vmem:[%s9174_s23 + $0x360] ss:$144 sps:$4 sm:$0xff]   ;;  %v7754_v49 = vld [vmem:[%s9174_s23 + $0x368] ss:$144 sps:$4 sm:$0xff]   ;;  %v7755_v50 = vld [vmem:[%s9174_s23 + $0x484] ss:$144 sps:$4 sm:$0xff]  }
  0xbd   : > { %v7757_v51 = vld [vmem:[%s9174_s23 + $0x48c] ss:$144 sps:$4 sm:$0xff]   ;;  %v7759_v52 = vld [vmem:[%s9174_s23 + $0x480] ss:$144 sps:$4 sm:$0xff]   ;;  %v7760_v53 = vld [vmem:[%s9174_s23 + $0x488] ss:$144 sps:$4 sm:$0xff]  }
  0xbe   : > { %2776 = vmatpush1.bf16.msra.mxu0 %v7741_v40  ;;  %2817 = vmatpush1.bf16.msra.mxu1 %v7742_v41  ;;  %v7761_v54 = vld [vmem:[%s9174_s23 + $0x5a4] ss:$144 sps:$4 sm:$0xff]   ;;  %v7763_v55 = vld [vmem:[%s9174_s23 + $0x5ac] ss:$144 sps:$4 sm:$0xff]   ;;  %v7765_v56 = vld [vmem:[%s9174_s23 + $0x5a0] ss:$144 sps:$4 sm:$0xff]  }
  0xbf   : > { %2777 = vmatprep.subr.bf16.mxu0 %v7743_v42  ;;  %2818 = vmatprep.subr.bf16.mxu1 %v7745_v43  ;;  %v7766_v57 = vld [vmem:[%s9174_s23 + $0x5a8] ss:$144 sps:$4 sm:$0xff]   ;;  %v7767_v58 = vld [vmem:[%s9174_s23 + $0x6c4] ss:$144 sps:$4 sm:$0xff]   ;;  %v7769_v59 = vld [vmem:[%s9174_s23 + $0x6cc] ss:$144 sps:$4 sm:$0xff]  }
  0xc0   : > { %v7771_v60 = vld [vmem:[%s9174_s23 + $0x6c0] ss:$144 sps:$4 sm:$0xff]   ;;  %v7772_v61 = vld [vmem:[%s9174_s23 + $0x6c8] ss:$144 sps:$4 sm:$0xff]   ;;  %v7773_v62 = vld [vmem:[%s9174_s23 + $0x7e4] ss:$144 sps:$4 sm:$0xff]  }
  0xc1   : > { %v7775_v63 = vld [vmem:[%s9174_s23 + $0x7ec] ss:$144 sps:$4 sm:$0xff]   ;;  %v7777_v0 = vld [vmem:[%s9174_s23 + $0x7e0] ss:$144 sps:$4 sm:$0xff]   ;;  %v7778_v1 = vld [vmem:[%s9174_s23 + $0x7e8] ss:$144 sps:$4 sm:$0xff]  }
  0xc2   : > { %2778 = vmatpush1.bf16.msra.mxu0 %v7747_v44  ;;  %2819 = vmatpush1.bf16.msra.mxu1 %v7748_v45  ;;  %v7781_v2 = vld [vmem:[%s9174_s23 + $0x14] ss:$144 sps:$4 sm:$0xff]   ;;  %v7784_v3 = vld [vmem:[%s9174_s23 + $0x1c] ss:$144 sps:$4 sm:$0xff]   ;;  %v9216_v4 = vld [vmem:[%s10064_s0] sm:$0xf] }
  0xc3   : > { %2779 = vmatprep.subr.bf16.mxu0 %v7749_v46  ;;  %2820 = vmatprep.subr.bf16.mxu1 %v7751_v47  ;;  %v7779_v5 = vld [vmem:[%s9174_s23 + $0x10] ss:$144 sps:$4 sm:$0xff]   ;;  %v7782_v6 = vld [vmem:[%s9174_s23 + $0x18] ss:$144 sps:$4 sm:$0xff]   ;;  %v7787_v7 = vld [vmem:[%s9174_s23 + $0x134] ss:$144 sps:$4 sm:$0xff]  }
  0xc4   : > { %v7790_v8 = vld [vmem:[%s9174_s23 + $0x13c] ss:$144 sps:$4 sm:$0xff]   ;;  %v7785_v9 = vld [vmem:[%s9174_s23 + $0x130] ss:$144 sps:$4 sm:$0xff]   ;;  %v7788_v10 = vld [vmem:[%s9174_s23 + $0x138] ss:$144 sps:$4 sm:$0xff]  }
  0xc5   : > { %v7793_v11 = vld [vmem:[%s9174_s23 + $0x254] ss:$144 sps:$4 sm:$0xff]   ;;  %v7796_v12 = vld [vmem:[%s9174_s23 + $0x25c] ss:$144 sps:$4 sm:$0xff]   ;;  %v7791_v13 = vld [vmem:[%s9174_s23 + $0x250] ss:$144 sps:$4 sm:$0xff]  }
  0xc6   : > { %2780 = vmatpush1.bf16.msra.mxu0 %v7753_v48  ;;  %2821 = vmatpush1.bf16.msra.mxu1 %v7754_v49  ;;  %v7794_v14 = vld [vmem:[%s9174_s23 + $0x258] ss:$144 sps:$4 sm:$0xff]   ;;  %v7799_v15 = vld [vmem:[%s9174_s23 + $0x374] ss:$144 sps:$4 sm:$0xff]   ;;  %v7802_v16 = vld [vmem:[%s9174_s23 + $0x37c] ss:$144 sps:$4 sm:$0xff]  }
  0xc7   : > { %2781 = vmatprep.subr.bf16.mxu0 %v7755_v50  ;;  %2822 = vmatprep.subr.bf16.mxu1 %v7757_v51  ;;  %v7797_v17 = vld [vmem:[%s9174_s23 + $0x370] ss:$144 sps:$4 sm:$0xff]   ;;  %v7800_v18 = vld [vmem:[%s9174_s23 + $0x378] ss:$144 sps:$4 sm:$0xff]   ;;  %v7805_v19 = vld [vmem:[%s9174_s23 + $0x494] ss:$144 sps:$4 sm:$0xff]  }
  0xc8   : > { %v7808_v20 = vld [vmem:[%s9174_s23 + $0x49c] ss:$144 sps:$4 sm:$0xff]   ;;  %v7803_v21 = vld [vmem:[%s9174_s23 + $0x490] ss:$144 sps:$4 sm:$0xff]   ;;  %v7806_v22 = vld [vmem:[%s9174_s23 + $0x498] ss:$144 sps:$4 sm:$0xff]  }
  0xc9   : > { %v7811_v23 = vld [vmem:[%s9174_s23 + $0x5b4] ss:$144 sps:$4 sm:$0xff]   ;;  %v7814_v24 = vld [vmem:[%s9174_s23 + $0x5bc] ss:$144 sps:$4 sm:$0xff]   ;;  %v7809_v25 = vld [vmem:[%s9174_s23 + $0x5b0] ss:$144 sps:$4 sm:$0xff]  }
  0xca   : > { %2782 = vmatpush1.bf16.msra.mxu0 %v7759_v52  ;;  %2823 = vmatpush1.bf16.msra.mxu1 %v7760_v53  ;;  %v7812_v26 = vld [vmem:[%s9174_s23 + $0x5b8] ss:$144 sps:$4 sm:$0xff]   ;;  %v7817_v27 = vld [vmem:[%s9174_s23 + $0x6d4] ss:$144 sps:$4 sm:$0xff]   ;;  %v7820_v28 = vld [vmem:[%s9174_s23 + $0x6dc] ss:$144 sps:$4 sm:$0xff]  }
  0xcb   : > { %2783 = vmatprep.subr.bf16.mxu0 %v7761_v54  ;;  %2824 = vmatprep.subr.bf16.mxu1 %v7763_v55  ;;  %v7815_v29 = vld [vmem:[%s9174_s23 + $0x6d0] ss:$144 sps:$4 sm:$0xff]   ;;  %v7818_v30 = vld [vmem:[%s9174_s23 + $0x6d8] ss:$144 sps:$4 sm:$0xff]   ;;  %v7823_v31 = vld [vmem:[%s9174_s23 + $0x7f4] ss:$144 sps:$4 sm:$0xff]  }
  0xcc   : > { %v7826_v32 = vld [vmem:[%s9174_s23 + $0x7fc] ss:$144 sps:$4 sm:$0xff]   ;;  %v7821_v33 = vld [vmem:[%s9174_s23 + $0x7f0] ss:$144 sps:$4 sm:$0xff]   ;;  %v7824_v34 = vld [vmem:[%s9174_s23 + $0x7f8] ss:$144 sps:$4 sm:$0xff]  }
  0xcd   : > { %v7829_v36 = vld [vmem:[%s9174_s23 + $0x24] ss:$144 sps:$4 sm:$0xff]   ;;  %v7832_v37 = vld [vmem:[%s9174_s23 + $0x2c] ss:$144 sps:$4 sm:$0xff]   ;;  %v7827_v38 = vld [vmem:[%s9174_s23 + $0x20] ss:$144 sps:$4 sm:$0xff]  }
  0xce   : > { %2784 = vmatpush1.bf16.msra.mxu0 %v7765_v56  ;;  %2825 = vmatpush1.bf16.msra.mxu1 %v7766_v57  ;;  %v7830_v39 = vld [vmem:[%s9174_s23 + $0x28] ss:$144 sps:$4 sm:$0xff]   ;;  %v7835_v40 = vld [vmem:[%s9174_s23 + $0x144] ss:$144 sps:$4 sm:$0xff]   ;;  %v7838_v41 = vld [vmem:[%s9174_s23 + $0x14c] ss:$144 sps:$4 sm:$0xff]  }
  0xcf   : > { %2785 = vmatprep.subr.bf16.mxu0 %v7767_v58  ;;  %2826 = vmatprep.subr.bf16.mxu1 %v7769_v59  ;;  %v7833_v42 = vld [vmem:[%s9174_s23 + $0x140] ss:$144 sps:$4 sm:$0xff]   ;;  %v7836_v43 = vld [vmem:[%s9174_s23 + $0x148] ss:$144 sps:$4 sm:$0xff]   ;;  %v7841_v44 = vld [vmem:[%s9174_s23 + $0x264] ss:$144 sps:$4 sm:$0xff]  }
  0xd0   : > { %v7844_v45 = vld [vmem:[%s9174_s23 + $0x26c] ss:$144 sps:$4 sm:$0xff]   ;;  %v7839_v46 = vld [vmem:[%s9174_s23 + $0x260] ss:$144 sps:$4 sm:$0xff]   ;;  %v7842_v47 = vld [vmem:[%s9174_s23 + $0x268] ss:$144 sps:$4 sm:$0xff]  }
  0xd1   : > { %v7847_v48 = vld [vmem:[%s9174_s23 + $0x384] ss:$144 sps:$4 sm:$0xff]   ;;  %v7850_v49 = vld [vmem:[%s9174_s23 + $0x38c] ss:$144 sps:$4 sm:$0xff]   ;;  %v7845_v50 = vld [vmem:[%s9174_s23 + $0x380] ss:$144 sps:$4 sm:$0xff]  }
  0xd2   : > { %2786 = vmatpush1.bf16.msra.mxu0 %v7771_v60  ;;  %2827 = vmatpush1.bf16.msra.mxu1 %v7772_v61  ;;  %v7848_v51 = vld [vmem:[%s9174_s23 + $0x388] ss:$144 sps:$4 sm:$0xff]   ;;  %v7853_v52 = vld [vmem:[%s9174_s23 + $0x4a4] ss:$144 sps:$4 sm:$0xff]   ;;  %v7856_v53 = vld [vmem:[%s9174_s23 + $0x4ac] ss:$144 sps:$4 sm:$0xff]  }
  0xd3   : > { %2787 = vmatprep.subr.bf16.mxu0 %v7773_v62  ;;  %2828 = vmatprep.subr.bf16.mxu1 %v7775_v63  ;;  %v7851_v54 = vld [vmem:[%s9174_s23 + $0x4a0] ss:$144 sps:$4 sm:$0xff]   ;;  %v7854_v55 = vld [vmem:[%s9174_s23 + $0x4a8] ss:$144 sps:$4 sm:$0xff]   ;;  %v7859_v56 = vld [vmem:[%s9174_s23 + $0x5c4] ss:$144 sps:$4 sm:$0xff]  }
  0xd4   : > { %v7862_v57 = vld [vmem:[%s9174_s23 + $0x5cc] ss:$144 sps:$4 sm:$0xff]   ;;  %v7857_v58 = vld [vmem:[%s9174_s23 + $0x5c0] ss:$144 sps:$4 sm:$0xff]   ;;  %v7860_v59 = vld [vmem:[%s9174_s23 + $0x5c8] ss:$144 sps:$4 sm:$0xff]  }
  0xd5   : > { %v7865_v60 = vld [vmem:[%s9174_s23 + $0x6e4] ss:$144 sps:$4 sm:$0xff]   ;;  %v7868_v61 = vld [vmem:[%s9174_s23 + $0x6ec] ss:$144 sps:$4 sm:$0xff]   ;;  %v7863_v62 = vld [vmem:[%s9174_s23 + $0x6e0] ss:$144 sps:$4 sm:$0xff]  }
  0xd6   : > { %2788 = vmatpush1.bf16.msra.mxu0 %v7777_v0  ;;  %2829 = vmatpush1.bf16.msra.mxu1 %v7778_v1  ;;  %v7866_v63 = vld [vmem:[%s9174_s23 + $0x6e8] ss:$144 sps:$4 sm:$0xff]   ;;  %v7871_v0 = vld [vmem:[%s9174_s23 + $0x804] ss:$144 sps:$4 sm:$0xff]   ;;  %v7874_v1 = vld [vmem:[%s9174_s23 + $0x80c] ss:$144 sps:$4 sm:$0xff]  }
  0xd7   : > { %2855 = vmatprep.subr.bf16.mxu0 %v7781_v2  ;;  %2896 = vmatprep.subr.bf16.mxu1 %v7784_v3  ;;  %v7869_v2 = vld [vmem:[%s9174_s23 + $0x800] ss:$144 sps:$4 sm:$0xff]   ;;  %v7872_v3 = vld [vmem:[%s9174_s23 + $0x808] ss:$144 sps:$4 sm:$0xff]   ;;  %p7293_p11 = scmp.ne.s32.totalorder %s8559_s21, 1 }
  0xd9   : > { %2806 = vmatmul.mubr.bf16.vlgmr.msra.gmra.mrb[0].mxu0 %v9216_v4  ;;  %2847 = vmatmul.mubr.bf16.vlgmr.msra.gmra.mrb[0].mxu1 %v9216_v4 }
  0xda   : > { %2856 = vmatpush1.bf16.msra.mxu0 %v7779_v5  ;;  %2897 = vmatpush1.bf16.msra.mxu1 %v7782_v6  ;;  %v7877_v5 = vld [vmem:[%s9174_s23 + $0x34] ss:$144 sps:$4 sm:$0xff]   ;;  %v7880_v6 = vld [vmem:[%s9174_s23 + $0x3c] ss:$144 sps:$4 sm:$0xff]  }
  0xdb   : > { %2857 = vmatprep.subr.bf16.mxu0 %v7787_v7  ;;  %2898 = vmatprep.subr.bf16.mxu1 %v7790_v8  ;;  %v7875_v7 = vld [vmem:[%s9174_s23 + $0x30] ss:$144 sps:$4 sm:$0xff]   ;;  %v7878_v8 = vld [vmem:[%s9174_s23 + $0x38] ss:$144 sps:$4 sm:$0xff]  }
  0xdc   : > { %2887 = vmatprep.mubr.bf16.mxu0 %v8511_v35  ;;  %2928 = vmatprep.mubr.bf16.mxu1 %v8511_v35 }
  0xde   : > { %2858 = vmatpush1.bf16.msra.mxu0 %v7785_v9  ;;  %2899 = vmatpush1.bf16.msra.mxu1 %v7788_v10  ;;  %v7883_v9 = vld [vmem:[%s9174_s23 + $0x154] ss:$144 sps:$4 sm:$0xff]   ;;  %v7886_v10 = vld [vmem:[%s9174_s23 + $0x15c] ss:$144 sps:$4 sm:$0xff]  }
  0xdf   : > { %2859 = vmatprep.subr.bf16.mxu0 %v7793_v11  ;;  %2900 = vmatprep.subr.bf16.mxu1 %v7796_v12  ;;  %v7881_v11 = vld [vmem:[%s9174_s23 + $0x150] ss:$144 sps:$4 sm:$0xff]   ;;  %v7884_v12 = vld [vmem:[%s9174_s23 + $0x158] ss:$144 sps:$4 sm:$0xff]  }
  0xe2   : > { %2860 = vmatpush1.bf16.msra.mxu0 %v7791_v13  ;;  %2901 = vmatpush1.bf16.msra.mxu1 %v7794_v14  ;;  %v7889_v13 = vld [vmem:[%s9174_s23 + $0x274] ss:$144 sps:$4 sm:$0xff]   ;;  %v7892_v14 = vld [vmem:[%s9174_s23 + $0x27c] ss:$144 sps:$4 sm:$0xff]  }
  0xe3   : > { %2861 = vmatprep.subr.bf16.mxu0 %v7799_v15  ;;  %2902 = vmatprep.subr.bf16.mxu1 %v7802_v16  ;;  %v7887_v15 = vld [vmem:[%s9174_s23 + $0x270] ss:$144 sps:$4 sm:$0xff]   ;;  %v7890_v16 = vld [vmem:[%s9174_s23 + $0x278] ss:$144 sps:$4 sm:$0xff]  }
  0xe6   : > { %2862 = vmatpush1.bf16.msra.mxu0 %v7797_v17  ;;  %2903 = vmatpush1.bf16.msra.mxu1 %v7800_v18  ;;  %v7895_v17 = vld [vmem:[%s9174_s23 + $0x394] ss:$144 sps:$4 sm:$0xff]   ;;  %v7898_v18 = vld [vmem:[%s9174_s23 + $0x39c] ss:$144 sps:$4 sm:$0xff]  }
  0xe7   : > { %2863 = vmatprep.subr.bf16.mxu0 %v7805_v19  ;;  %2904 = vmatprep.subr.bf16.mxu1 %v7808_v20  ;;  %v7893_v19 = vld [vmem:[%s9174_s23 + $0x390] ss:$144 sps:$4 sm:$0xff]   ;;  %v7896_v20 = vld [vmem:[%s9174_s23 + $0x398] ss:$144 sps:$4 sm:$0xff]  }
  0xea   : > { %2864 = vmatpush1.bf16.msra.mxu0 %v7803_v21  ;;  %2905 = vmatpush1.bf16.msra.mxu1 %v7806_v22  ;;  %v7901_v21 = vld [vmem:[%s9174_s23 + $0x4b4] ss:$144 sps:$4 sm:$0xff]   ;;  %v7904_v22 = vld [vmem:[%s9174_s23 + $0x4bc] ss:$144 sps:$4 sm:$0xff]  }
  0xeb   : > { %2865 = vmatprep.subr.bf16.mxu0 %v7811_v23  ;;  %2906 = vmatprep.subr.bf16.mxu1 %v7814_v24  ;;  %v7899_v23 = vld [vmem:[%s9174_s23 + $0x4b0] ss:$144 sps:$4 sm:$0xff]   ;;  %v7902_v24 = vld [vmem:[%s9174_s23 + $0x4b8] ss:$144 sps:$4 sm:$0xff]  }
  0xee   : > { %2866 = vmatpush1.bf16.msra.mxu0 %v7809_v25  ;;  %2907 = vmatpush1.bf16.msra.mxu1 %v7812_v26  ;;  %v7907_v25 = vld [vmem:[%s9174_s23 + $0x5d4] ss:$144 sps:$4 sm:$0xff]   ;;  %v7910_v26 = vld [vmem:[%s9174_s23 + $0x5dc] ss:$144 sps:$4 sm:$0xff]  }
  0xef   : > { %2867 = vmatprep.subr.bf16.mxu0 %v7817_v27  ;;  %2908 = vmatprep.subr.bf16.mxu1 %v7820_v28  ;;  %v7905_v27 = vld [vmem:[%s9174_s23 + $0x5d0] ss:$144 sps:$4 sm:$0xff]   ;;  %v7908_v28 = vld [vmem:[%s9174_s23 + $0x5d8] ss:$144 sps:$4 sm:$0xff]  }
  0xf2   : > { %2868 = vmatpush1.bf16.msra.mxu0 %v7815_v29  ;;  %2909 = vmatpush1.bf16.msra.mxu1 %v7818_v30  ;;  %v7913_v29 = vld [vmem:[%s9174_s23 + $0x6f4] ss:$144 sps:$4 sm:$0xff]   ;;  %v7916_v30 = vld [vmem:[%s9174_s23 + $0x6fc] ss:$144 sps:$4 sm:$0xff]  }
  0xf3   : > { %2869 = vmatprep.subr.bf16.mxu0 %v7823_v31  ;;  %2910 = vmatprep.subr.bf16.mxu1 %v7826_v32  ;;  %v7911_v31 = vld [vmem:[%s9174_s23 + $0x6f0] ss:$144 sps:$4 sm:$0xff]   ;;  %v7914_v32 = vld [vmem:[%s9174_s23 + $0x6f8] ss:$144 sps:$4 sm:$0xff]  }
  0xf6   : > { %2870 = vmatpush1.bf16.msra.mxu0 %v7821_v33  ;;  %2911 = vmatpush1.bf16.msra.mxu1 %v7824_v34  ;;  %v7919_v33 = vld [vmem:[%s9174_s23 + $0x814] ss:$144 sps:$4 sm:$0xff]   ;;  %v7922_v34 = vld [vmem:[%s9174_s23 + $0x81c] ss:$144 sps:$4 sm:$0xff]  }
  0xf7   : > { %2937 = vmatprep.subr.bf16.mxu0 %v7829_v36  ;;  %2978 = vmatprep.subr.bf16.mxu1 %v7832_v37  ;;  %v7917_v36 = vld [vmem:[%s9174_s23 + $0x810] ss:$144 sps:$4 sm:$0xff]   ;;  %v7920_v37 = vld [vmem:[%s9174_s23 + $0x818] ss:$144 sps:$4 sm:$0xff]  }
  0xf9   : > { %2888 = vmatmul.mubr.bf16.vlgmr.msra.gmra.mrb[4].mxu0 %v9216_v4  ;;  %2929 = vmatmul.mubr.bf16.vlgmr.msra.gmra.mrb[4].mxu1 %v9216_v4 }
  0xfa   : > { %2938 = vmatpush1.bf16.msra.mxu0 %v7827_v38  ;;  %2979 = vmatpush1.bf16.msra.mxu1 %v7830_v39  ;;  %v7925_v38 = vld [vmem:[%s9174_s23 + $0x44] ss:$144 sps:$4 sm:$0xff]   ;;  %v7928_v39 = vld [vmem:[%s9174_s23 + $0x4c] ss:$144 sps:$4 sm:$0xff]  }
  0xfb   : > { %2939 = vmatprep.subr.bf16.mxu0 %v7835_v40  ;;  %2980 = vmatprep.subr.bf16.mxu1 %v7838_v41  ;;  %v7923_v40 = vld [vmem:[%s9174_s23 + $0x40] ss:$144 sps:$4 sm:$0xff]   ;;  %v7926_v41 = vld [vmem:[%s9174_s23 + $0x48] ss:$144 sps:$4 sm:$0xff]  }
  0xfc   : > { %2969 = vmatprep.mubr.bf16.mxu0 %v8511_v35  ;;  %3010 = vmatprep.mubr.bf16.mxu1 %v8511_v35 }
  0xfe   : > { %2940 = vmatpush1.bf16.msra.mxu0 %v7833_v42  ;;  %2981 = vmatpush1.bf16.msra.mxu1 %v7836_v43  ;;  %v7931_v42 = vld [vmem:[%s9174_s23 + $0x164] ss:$144 sps:$4 sm:$0xff]   ;;  %v7934_v43 = vld [vmem:[%s9174_s23 + $0x16c] ss:$144 sps:$4 sm:$0xff]  }
  0xff   : > { %2941 = vmatprep.subr.bf16.mxu0 %v7841_v44  ;;  %2982 = vmatprep.subr.bf16.mxu1 %v7844_v45  ;;  %v7929_v44 = vld [vmem:[%s9174_s23 + $0x160] ss:$144 sps:$4 sm:$0xff]   ;;  %v7932_v45 = vld [vmem:[%s9174_s23 + $0x168] ss:$144 sps:$4 sm:$0xff]  }
 0x102   : > { %2942 = vmatpush1.bf16.msra.mxu0 %v7839_v46  ;;  %2983 = vmatpush1.bf16.msra.mxu1 %v7842_v47  ;;  %v7937_v46 = vld [vmem:[%s9174_s23 + $0x284] ss:$144 sps:$4 sm:$0xff]   ;;  %v7940_v47 = vld [vmem:[%s9174_s23 + $0x28c] ss:$144 sps:$4 sm:$0xff]  }
 0x103   : > { %2943 = vmatprep.subr.bf16.mxu0 %v7847_v48  ;;  %2984 = vmatprep.subr.bf16.mxu1 %v7850_v49  ;;  %v7935_v48 = vld [vmem:[%s9174_s23 + $0x280] ss:$144 sps:$4 sm:$0xff]   ;;  %v7938_v49 = vld [vmem:[%s9174_s23 + $0x288] ss:$144 sps:$4 sm:$0xff]  }
 0x106   : > { %2944 = vmatpush1.bf16.msra.mxu0 %v7845_v50  ;;  %2985 = vmatpush1.bf16.msra.mxu1 %v7848_v51  ;;  %v7943_v50 = vld [vmem:[%s9174_s23 + $0x3a4] ss:$144 sps:$4 sm:$0xff]   ;;  %v7946_v51 = vld [vmem:[%s9174_s23 + $0x3ac] ss:$144 sps:$4 sm:$0xff]  }
 0x107   : > { %2945 = vmatprep.subr.bf16.mxu0 %v7853_v52  ;;  %2986 = vmatprep.subr.bf16.mxu1 %v7856_v53  ;;  %v7941_v52 = vld [vmem:[%s9174_s23 + $0x3a0] ss:$144 sps:$4 sm:$0xff]   ;;  %v7944_v53 = vld [vmem:[%s9174_s23 + $0x3a8] ss:$144 sps:$4 sm:$0xff]  }
 0x10a   : > { %2946 = vmatpush1.bf16.msra.mxu0 %v7851_v54  ;;  %2987 = vmatpush1.bf16.msra.mxu1 %v7854_v55  ;;  %v7949_v54 = vld [vmem:[%s9174_s23 + $0x4c4] ss:$144 sps:$4 sm:$0xff]   ;;  %v7952_v55 = vld [vmem:[%s9174_s23 + $0x4cc] ss:$144 sps:$4 sm:$0xff]  }
 0x10b   : > { %2947 = vmatprep.subr.bf16.mxu0 %v7859_v56  ;;  %2988 = vmatprep.subr.bf16.mxu1 %v7862_v57  ;;  %v7947_v56 = vld [vmem:[%s9174_s23 + $0x4c0] ss:$144 sps:$4 sm:$0xff]   ;;  %v7950_v57 = vld [vmem:[%s9174_s23 + $0x4c8] ss:$144 sps:$4 sm:$0xff]  }
 0x10e   : > { %2948 = vmatpush1.bf16.msra.mxu0 %v7857_v58  ;;  %2989 = vmatpush1.bf16.msra.mxu1 %v7860_v59  ;;  %v7955_v58 = vld [vmem:[%s9174_s23 + $0x5e4] ss:$144 sps:$4 sm:$0xff]   ;;  %v7958_v59 = vld [vmem:[%s9174_s23 + $0x5ec] ss:$144 sps:$4 sm:$0xff]  }
 0x10f   : > { %2949 = vmatprep.subr.bf16.mxu0 %v7865_v60  ;;  %2990 = vmatprep.subr.bf16.mxu1 %v7868_v61  ;;  %v7953_v60 = vld [vmem:[%s9174_s23 + $0x5e0] ss:$144 sps:$4 sm:$0xff]   ;;  %v7956_v61 = vld [vmem:[%s9174_s23 + $0x5e8] ss:$144 sps:$4 sm:$0xff]  }
 0x112   : > { %2950 = vmatpush1.bf16.msra.mxu0 %v7863_v62  ;;  %2991 = vmatpush1.bf16.msra.mxu1 %v7866_v63  ;;  %v7961_v62 = vld [vmem:[%s9174_s23 + $0x704] ss:$144 sps:$4 sm:$0xff]   ;;  %v7964_v63 = vld [vmem:[%s9174_s23 + $0x70c] ss:$144 sps:$4 sm:$0xff]  }
 0x113   : > { %2951 = vmatprep.subr.bf16.mxu0 %v7871_v0  ;;  %2992 = vmatprep.subr.bf16.mxu1 %v7874_v1  ;;  %v7959_v0 = vld [vmem:[%s9174_s23 + $0x700] ss:$144 sps:$4 sm:$0xff]   ;;  %v7962_v1 = vld [vmem:[%s9174_s23 + $0x708] ss:$144 sps:$4 sm:$0xff]  }
 0x116   : > { %2952 = vmatpush1.bf16.msra.mxu0 %v7869_v2  ;;  %2993 = vmatpush1.bf16.msra.mxu1 %v7872_v3  ;;  %v7967_v2 = vld [vmem:[%s9174_s23 + $0x824] ss:$144 sps:$4 sm:$0xff]   ;;  %v7970_v3 = vld [vmem:[%s9174_s23 + $0x82c] ss:$144 sps:$4 sm:$0xff]  }
 0x117   : > { %3019 = vmatprep.subr.bf16.mxu0 %v7877_v5  ;;  %3060 = vmatprep.subr.bf16.mxu1 %v7880_v6  ;;  %v7965_v5 = vld [vmem:[%s9174_s23 + $0x820] ss:$144 sps:$4 sm:$0xff]   ;;  %v7968_v6 = vld [vmem:[%s9174_s23 + $0x828] ss:$144 sps:$4 sm:$0xff]  }
 0x119   : > { %2970 = vmatmul.mubr.bf16.vlgmr.msra.gmra.mrb[8].mxu0 %v9216_v4  ;;  %3011 = vmatmul.mubr.bf16.vlgmr.msra.gmra.mrb[8].mxu1 %v9216_v4 }
 0x11a   : > { %3020 = vmatpush1.bf16.msra.mxu0 %v7875_v7  ;;  %3061 = vmatpush1.bf16.msra.mxu1 %v7878_v8  ;;  %v7973_v7 = vld [vmem:[%s9174_s23 + $0x54] ss:$144 sps:$4 sm:$0xff]   ;;  %v7976_v8 = vld [vmem:[%s9174_s23 + $0x5c] ss:$144 sps:$4 sm:$0xff]  }
 0x11b   : > { %3021 = vmatprep.subr.bf16.mxu0 %v7883_v9  ;;  %3062 = vmatprep.subr.bf16.mxu1 %v7886_v10  ;;  %v7971_v9 = vld [vmem:[%s9174_s23 + $0x50] ss:$144 sps:$4 sm:$0xff]   ;;  %v7974_v10 = vld [vmem:[%s9174_s23 + $0x58] ss:$144 sps:$4 sm:$0xff]  }
 0x11c   : > { %3051 = vmatprep.mubr.bf16.mxu0 %v8511_v35  ;;  %3092 = vmatprep.mubr.bf16.mxu1 %v8511_v35 }
 0x11e   : > { %3022 = vmatpush1.bf16.msra.mxu0 %v7881_v11  ;;  %3063 = vmatpush1.bf16.msra.mxu1 %v7884_v12  ;;  %v7979_v11 = vld [vmem:[%s9174_s23 + $0x174] ss:$144 sps:$4 sm:$0xff]   ;;  %v7982_v12 = vld [vmem:[%s9174_s23 + $0x17c] ss:$144 sps:$4 sm:$0xff]  }
 0x11f   : > { %3023 = vmatprep.subr.bf16.mxu0 %v7889_v13  ;;  %3064 = vmatprep.subr.bf16.mxu1 %v7892_v14  ;;  %v7977_v13 = vld [vmem:[%s9174_s23 + $0x170] ss:$144 sps:$4 sm:$0xff]   ;;  %v7980_v14 = vld [vmem:[%s9174_s23 + $0x178] ss:$144 sps:$4 sm:$0xff]  }
 0x122   : > { %3024 = vmatpush1.bf16.msra.mxu0 %v7887_v15  ;;  %3065 = vmatpush1.bf16.msra.mxu1 %v7890_v16  ;;  %v7985_v15 = vld [vmem:[%s9174_s23 + $0x294] ss:$144 sps:$4 sm:$0xff]   ;;  %v7988_v16 = vld [vmem:[%s9174_s23 + $0x29c] ss:$144 sps:$4 sm:$0xff]  }
 0x123   : > { %3025 = vmatprep.subr.bf16.mxu0 %v7895_v17  ;;  %3066 = vmatprep.subr.bf16.mxu1 %v7898_v18  ;;  %v7986_v17 = vld [vmem:[%s9174_s23 + $0x298] ss:$144 sps:$4 sm:$0xff]   ;;  %v7991_v18 = vld [vmem:[%s9174_s23 + $0x3b4] ss:$144 sps:$4 sm:$0xff]  }
 0x126   : > { %3026 = vmatpush1.bf16.msra.mxu0 %v7893_v19  ;;  %3067 = vmatpush1.bf16.msra.mxu1 %v7896_v20  ;;  %v7994_v19 = vld [vmem:[%s9174_s23 + $0x3bc] ss:$144 sps:$4 sm:$0xff]   ;;  %v7989_v20 = vld [vmem:[%s9174_s23 + $0x3b0] ss:$144 sps:$4 sm:$0xff]  }
 0x127   : > { %3027 = vmatprep.subr.bf16.mxu0 %v7901_v21  ;;  %3068 = vmatprep.subr.bf16.mxu1 %v7904_v22  ;;  %v7992_v21 = vld [vmem:[%s9174_s23 + $0x3b8] ss:$144 sps:$4 sm:$0xff]   ;;  %v7997_v22 = vld [vmem:[%s9174_s23 + $0x4d4] ss:$144 sps:$4 sm:$0xff]  }
 0x12a   : > { %3028 = vmatpush1.bf16.msra.mxu0 %v7899_v23  ;;  %3069 = vmatpush1.bf16.msra.mxu1 %v7902_v24  ;;  %v8000_v23 = vld [vmem:[%s9174_s23 + $0x4dc] ss:$144 sps:$4 sm:$0xff]   ;;  %v7995_v24 = vld [vmem:[%s9174_s23 + $0x4d0] ss:$144 sps:$4 sm:$0xff]  }
 0x12b   : > { %3029 = vmatprep.subr.bf16.mxu0 %v7907_v25  ;;  %3070 = vmatprep.subr.bf16.mxu1 %v7910_v26  ;;  %v7998_v25 = vld [vmem:[%s9174_s23 + $0x4d8] ss:$144 sps:$4 sm:$0xff]   ;;  %v8003_v26 = vld [vmem:[%s9174_s23 + $0x5f4] ss:$144 sps:$4 sm:$0xff]  }
 0x12e   : > { %3030 = vmatpush1.bf16.msra.mxu0 %v7905_v27  ;;  %3071 = vmatpush1.bf16.msra.mxu1 %v7908_v28  ;;  %v8006_v27 = vld [vmem:[%s9174_s23 + $0x5fc] ss:$144 sps:$4 sm:$0xff]   ;;  %v8001_v28 = vld [vmem:[%s9174_s23 + $0x5f0] ss:$144 sps:$4 sm:$0xff]  }
 0x12f   : > { %3031 = vmatprep.subr.bf16.mxu0 %v7913_v29  ;;  %3072 = vmatprep.subr.bf16.mxu1 %v7916_v30  ;;  %v8004_v29 = vld [vmem:[%s9174_s23 + $0x5f8] ss:$144 sps:$4 sm:$0xff]   ;;  %v8009_v30 = vld [vmem:[%s9174_s23 + $0x714] ss:$144 sps:$4 sm:$0xff]  }
 0x132   : > { %3032 = vmatpush1.bf16.msra.mxu0 %v7911_v31  ;;  %3073 = vmatpush1.bf16.msra.mxu1 %v7914_v32  ;;  %v8012_v31 = vld [vmem:[%s9174_s23 + $0x71c] ss:$144 sps:$4 sm:$0xff]   ;;  %v8007_v32 = vld [vmem:[%s9174_s23 + $0x710] ss:$144 sps:$4 sm:$0xff]  }
 0x133   : > { %3033 = vmatprep.subr.bf16.mxu0 %v7919_v33  ;;  %3074 = vmatprep.subr.bf16.mxu1 %v7922_v34  ;;  %v8010_v33 = vld [vmem:[%s9174_s23 + $0x718] ss:$144 sps:$4 sm:$0xff]   ;;  %v8015_v34 = vld [vmem:[%s9174_s23 + $0x834] ss:$144 sps:$4 sm:$0xff]  }
 0x136   : > { %3034 = vmatpush1.bf16.msra.mxu0 %v7917_v36  ;;  %3075 = vmatpush1.bf16.msra.mxu1 %v7920_v37  ;;  %v8018_v36 = vld [vmem:[%s9174_s23 + $0x83c] ss:$144 sps:$4 sm:$0xff]   ;;  %v1153_v37 = vlaneseq }
 0x137   : > { %3101 = vmatprep.subr.bf16.mxu0 %v7925_v38  ;;  %3142 = vmatprep.subr.bf16.mxu1 %v7928_v39  ;;  %v8013_v38 = vld [vmem:[%s9174_s23 + $0x830] ss:$144 sps:$4 sm:$0xff]   ;;  %v8016_v39 = vld [vmem:[%s9174_s23 + $0x838] ss:$144 sps:$4 sm:$0xff]  }
 0x139   : > { %3052 = vmatmul.mubr.bf16.vlgmr.msra.gmra.mrb[12].mxu0 %v9216_v4  ;;  %3093 = vmatmul.mubr.bf16.vlgmr.msra.gmra.mrb[12].mxu1 %v9216_v4 }
 0x13a   : > { %3102 = vmatpush1.bf16.msra.mxu0 %v7923_v40  ;;  %3143 = vmatpush1.bf16.msra.mxu1 %v7926_v41  ;;  %v8021_v40 = vld [vmem:[%s9174_s23 + $0x64] ss:$144 sps:$4 sm:$0xff]   ;;  %v8024_v41 = vld [vmem:[%s9174_s23 + $0x6c] ss:$144 sps:$4 sm:$0xff]  }
 0x13b   : > { %3103 = vmatprep.subr.bf16.mxu0 %v7931_v42  ;;  %3144 = vmatprep.subr.bf16.mxu1 %v7934_v43  ;;  %v8019_v42 = vld [vmem:[%s9174_s23 + $0x60] ss:$144 sps:$4 sm:$0xff]   ;;  %v9399_v43 = vshrl.u32 %v1153_v37, 7  ;;  %v8100_v37 = vld [vmem:[%s9174_s23 + $0x618] ss:$144 sps:$4 sm:$0xff]  }
 0x13c   : > { %3133 = vmatprep.mubr.bf16.mxu0 %v8511_v35  ;;  %3174 = vmatprep.mubr.bf16.mxu1 %v8511_v35 }
 0x13e   : > { %3104 = vmatpush1.bf16.msra.mxu0 %v7929_v44  ;;  %3145 = vmatpush1.bf16.msra.mxu1 %v7932_v45  ;;  %v8022_v44 = vld [vmem:[%s9174_s23 + $0x68] ss:$144 sps:$4 sm:$0xff]   ;;  %v8027_v45 = vld [vmem:[%s9174_s23 + $0x184] ss:$144 sps:$4 sm:$0xff]  }
 0x13f   : > { %3105 = vmatprep.subr.bf16.mxu0 %v7937_v46  ;;  %3146 = vmatprep.subr.bf16.mxu1 %v7940_v47  ;;  %v8030_v46 = vld [vmem:[%s9174_s23 + $0x18c] ss:$144 sps:$4 sm:$0xff]   ;;  %v8025_v47 = vld [vmem:[%s9174_s23 + $0x180] ss:$144 sps:$4 sm:$0xff]  }
 0x142   : > { %3106 = vmatpush1.bf16.msra.mxu0 %v7935_v48  ;;  %3147 = vmatpush1.bf16.msra.mxu1 %v7938_v49  ;;  %v9408_v48 = vld [vmem:[%s10064_s0] sm:$0xf]  ;;  %v8028_v49 = vld [vmem:[%s9174_s23 + $0x188] ss:$144 sps:$4 sm:$0xff]  }
 0x143   : > { %3107 = vmatprep.subr.bf16.mxu0 %v7943_v50  ;;  %3148 = vmatprep.subr.bf16.mxu1 %v7946_v51  ;;  %v8033_v50 = vld [vmem:[%s9174_s23 + $0x2a4] ss:$144 sps:$4 sm:$0xff]   ;;  %v8036_v51 = vld [vmem:[%s9174_s23 + $0x2ac] ss:$144 sps:$4 sm:$0xff]  }
 0x146   : > { %3108 = vmatpush1.bf16.msra.mxu0 %v7941_v52  ;;  %3149 = vmatpush1.bf16.msra.mxu1 %v7944_v53  ;;  %v8031_v52 = vld [vmem:[%s9174_s23 + $0x2a0] ss:$144 sps:$4 sm:$0xff]   ;;  %v8034_v53 = vld [vmem:[%s9174_s23 + $0x2a8] ss:$144 sps:$4 sm:$0xff]  }
 0x147   : > { %3109 = vmatprep.subr.bf16.mxu0 %v7949_v54  ;;  %3150 = vmatprep.subr.bf16.mxu1 %v7952_v55  ;;  %v8039_v54 = vld [vmem:[%s9174_s23 + $0x3c4] ss:$144 sps:$4 sm:$0xff]   ;;  %v8042_v55 = vld [vmem:[%s9174_s23 + $0x3cc] ss:$144 sps:$4 sm:$0xff]  }
 0x14a   : > { %3110 = vmatpush1.bf16.msra.mxu0 %v7947_v56  ;;  %3151 = vmatpush1.bf16.msra.mxu1 %v7950_v57  ;;  %v8037_v56 = vld [vmem:[%s9174_s23 + $0x3c0] ss:$144 sps:$4 sm:$0xff]   ;;  %v8040_v57 = vld [vmem:[%s9174_s23 + $0x3c8] ss:$144 sps:$4 sm:$0xff]  }
 0x14b   : > { %3111 = vmatprep.subr.bf16.mxu0 %v7955_v58  ;;  %3152 = vmatprep.subr.bf16.mxu1 %v7958_v59  ;;  %v8045_v58 = vld [vmem:[%s9174_s23 + $0x4e4] ss:$144 sps:$4 sm:$0xff]   ;;  %v8048_v59 = vld [vmem:[%s9174_s23 + $0x4ec] ss:$144 sps:$4 sm:$0xff]  }
 0x14e   : > { %3112 = vmatpush1.bf16.msra.mxu0 %v7953_v60  ;;  %3153 = vmatpush1.bf16.msra.mxu1 %v7956_v61  ;;  %v8043_v60 = vld [vmem:[%s9174_s23 + $0x4e0] ss:$144 sps:$4 sm:$0xff]   ;;  %v8046_v61 = vld [vmem:[%s9174_s23 + $0x4e8] ss:$144 sps:$4 sm:$0xff]  }
 0x14f   : > { %3113 = vmatprep.subr.bf16.mxu0 %v7961_v62  ;;  %3154 = vmatprep.subr.bf16.mxu1 %v7964_v63  ;;  %v8051_v62 = vld [vmem:[%s9174_s23 + $0x604] ss:$144 sps:$4 sm:$0xff]   ;;  %v8054_v63 = vld [vmem:[%s9174_s23 + $0x60c] ss:$144 sps:$4 sm:$0xff]  }
 0x152   : > { %3114 = vmatpush1.bf16.msra.mxu0 %v7959_v0  ;;  %3155 = vmatpush1.bf16.msra.mxu1 %v7962_v1  ;;  %v9430_v0 = vsub.s32 1, %v9399_v43  ;;  %v8049_v1 = vld [vmem:[%s9174_s23 + $0x600] ss:$144 sps:$4 sm:$0xff]  }
 0x153   : > { %3115 = vmatprep.subr.bf16.mxu0 %v7967_v2  ;;  %3156 = vmatprep.subr.bf16.mxu1 %v7970_v3  ;;  %v8052_v2 = vld [vmem:[%s9174_s23 + $0x608] ss:$144 sps:$4 sm:$0xff]   ;;  %v8057_v3 = vld [vmem:[%s9174_s23 + $0x724] ss:$144 sps:$4 sm:$0xff]  }
 0x156   : > { %3116 = vmatpush1.bf16.msra.mxu0 %v7965_v5  ;;  %3157 = vmatpush1.bf16.msra.mxu1 %v7968_v6  ;;  %v8060_v5 = vld [vmem:[%s9174_s23 + $0x72c] ss:$144 sps:$4 sm:$0xff]   ;;  %v8055_v6 = vld [vmem:[%s9174_s23 + $0x720] ss:$144 sps:$4 sm:$0xff]  }
 0x157   : > { %3183 = vmatprep.subr.bf16.mxu0 %v7973_v7  ;;  %3224 = vmatprep.subr.bf16.mxu1 %v7976_v8  ;;  %v8058_v7 = vld [vmem:[%s9174_s23 + $0x728] ss:$144 sps:$4 sm:$0xff]   ;;  %v8063_v8 = vld [vmem:[%s9174_s23 + $0x844] ss:$144 sps:$4 sm:$0xff]  }
 0x159   : > { %3134 = vmatmul.mubr.bf16.vlgmr.msra.gmra.mrb[16].mxu0 %v9216_v4  ;;  %3175 = vmatmul.mubr.bf16.vlgmr.msra.gmra.mrb[16].mxu1 %v9216_v4  ;;  %v7983_v4 = vld [vmem:[%s9174_s23 + $0x290] ss:$144 sps:$4 sm:$0xff]  }
 0x15a   : > { %3184 = vmatpush1.bf16.msra.mxu0 %v7971_v9  ;;  %3225 = vmatpush1.bf16.msra.mxu1 %v7974_v10  ;;  %v8066_v9 = vld [vmem:[%s9174_s23 + $0x84c] ss:$144 sps:$4 sm:$0xff]   ;;  %v8061_v10 = vld [vmem:[%s9174_s23 + $0x840] ss:$144 sps:$4 sm:$0xff]  }
 0x15b   : > { %3185 = vmatprep.subr.bf16.mxu0 %v7979_v11  ;;  %3226 = vmatprep.subr.bf16.mxu1 %v7982_v12  ;;  %v8064_v11 = vld [vmem:[%s9174_s23 + $0x848] ss:$144 sps:$4 sm:$0xff]   ;;  %v8069_v12 = vld [vmem:[%s9174_s23 + $0x74] ss:$144 sps:$4 sm:$0xff]  }
 0x15c   : > { %3215 = vmatprep.mubr.bf16.mxu0 %v8511_v35  ;;  %3256 = vmatprep.mubr.bf16.mxu1 %v8511_v35 }
 0x15e   : > { %3186 = vmatpush1.bf16.msra.mxu0 %v7977_v13  ;;  %3227 = vmatpush1.bf16.msra.mxu1 %v7980_v14  ;;  %v8072_v13 = vld [vmem:[%s9174_s23 + $0x7c] ss:$144 sps:$4 sm:$0xff]   ;;  %v8067_v14 = vld [vmem:[%s9174_s23 + $0x70] ss:$144 sps:$4 sm:$0xff]  }
 0x15f   : > { %3187 = vmatprep.subr.bf16.mxu0 %v7985_v15  ;;  %3228 = vmatprep.subr.bf16.mxu1 %v7988_v16  ;;  %v9446_v15 = vsub.s32 3, %v9399_v43  ;;  %v9449_v16 = vsub.s32 6, %v9399_v43 }
 0x162   : > { %3188 = vmatpush1.bf16.msra.mxu0 %v7983_v4  ;;  %3229 = vmatpush1.bf16.msra.mxu1 %v7986_v17  ;;  %v8070_v4 = vld [vmem:[%s9174_s23 + $0x78] ss:$144 sps:$4 sm:$0xff]   ;;  %v8075_v17 = vld [vmem:[%s9174_s23 + $0x194] ss:$144 sps:$4 sm:$0xff]  }
 0x163   : > { %3189 = vmatprep.subr.bf16.mxu0 %v7991_v18  ;;  %3230 = vmatprep.subr.bf16.mxu1 %v7994_v19  ;;  %v8078_v18 = vld [vmem:[%s9174_s23 + $0x19c] ss:$144 sps:$4 sm:$0xff]   ;;  %v8073_v19 = vld [vmem:[%s9174_s23 + $0x190] ss:$144 sps:$4 sm:$0xff]  }
 0x166   : > { %3190 = vmatpush1.bf16.msra.mxu0 %v7989_v20  ;;  %3231 = vmatpush1.bf16.msra.mxu1 %v7992_v21  ;;  %v8076_v20 = vld [vmem:[%s9174_s23 + $0x198] ss:$144 sps:$4 sm:$0xff]   ;;  %v8081_v21 = vld [vmem:[%s9174_s23 + $0x2b4] ss:$144 sps:$4 sm:$0xff]  }
 0x167   : > { %3191 = vmatprep.subr.bf16.mxu0 %v7997_v22  ;;  %3232 = vmatprep.subr.bf16.mxu1 %v8000_v23  ;;  %v8084_v22 = vld [vmem:[%s9174_s23 + $0x2bc] ss:$144 sps:$4 sm:$0xff]   ;;  %v8079_v23 = vld [vmem:[%s9174_s23 + $0x2b0] ss:$144 sps:$4 sm:$0xff]  }
 0x16a   : > { %3192 = vmatpush1.bf16.msra.mxu0 %v7995_v24  ;;  %3233 = vmatpush1.bf16.msra.mxu1 %v7998_v25  ;;  %v8082_v24 = vld [vmem:[%s9174_s23 + $0x2b8] ss:$144 sps:$4 sm:$0xff]   ;;  %v8087_v25 = vld [vmem:[%s9174_s23 + $0x3d4] ss:$144 sps:$4 sm:$0xff]  }
 0x16b   : > { %3193 = vmatprep.subr.bf16.mxu0 %v8003_v26  ;;  %3234 = vmatprep.subr.bf16.mxu1 %v8006_v27  ;;  %v8090_v26 = vld [vmem:[%s9174_s23 + $0x3dc] ss:$144 sps:$4 sm:$0xff]   ;;  %v8085_v27 = vld [vmem:[%s9174_s23 + $0x3d0] ss:$144 sps:$4 sm:$0xff]  }
 0x16e   : > { %3194 = vmatpush1.bf16.msra.mxu0 %v8001_v28  ;;  %3235 = vmatpush1.bf16.msra.mxu1 %v8004_v29  ;;  %v8088_v28 = vld [vmem:[%s9174_s23 + $0x3d8] ss:$144 sps:$4 sm:$0xff]   ;;  %v8093_v29 = vld [vmem:[%s9174_s23 + $0x4f4] ss:$144 sps:$4 sm:$0xff]  }
 0x16f   : > { %3195 = vmatprep.subr.bf16.mxu0 %v8009_v30  ;;  %3236 = vmatprep.subr.bf16.mxu1 %v8012_v31  ;;  %v8096_v30 = vld [vmem:[%s9174_s23 + $0x4fc] ss:$144 sps:$4 sm:$0xff]   ;;  %v8091_v31 = vld [vmem:[%s9174_s23 + $0x4f0] ss:$144 sps:$4 sm:$0xff]  }
 0x172   : > { %3196 = vmatpush1.bf16.msra.mxu0 %v8007_v32  ;;  %3237 = vmatpush1.bf16.msra.mxu1 %v8010_v33  ;;  %v8094_v32 = vld [vmem:[%s9174_s23 + $0x4f8] ss:$144 sps:$4 sm:$0xff]   ;;  %v8099_v33 = vld [vmem:[%s9174_s23 + $0x614] ss:$144 sps:$4 sm:$0xff]  }
 0x173   : > { %3197 = vmatprep.subr.bf16.mxu0 %v8015_v34  ;;  %3238 = vmatprep.subr.bf16.mxu1 %v8018_v36  ;;  %v8102_v34 = vld [vmem:[%s9174_s23 + $0x61c] ss:$144 sps:$4 sm:$0xff]   ;;  %v8097_v36 = vld [vmem:[%s9174_s23 + $0x610] ss:$144 sps:$4 sm:$0xff]  }
 0x176   : > { %3198 = vmatpush1.bf16.msra.mxu0 %v8013_v38  ;;  %3239 = vmatpush1.bf16.msra.mxu1 %v8016_v39  ;;  %v8105_v38 = vld [vmem:[%s9174_s23 + $0x734] ss:$144 sps:$4 sm:$0xff]   ;;  %v8108_v39 = vld [vmem:[%s9174_s23 + $0x73c] ss:$144 sps:$4 sm:$0xff]  }
 0x177   : > { %3265 = vmatprep.subr.bf16.mxu0 %v8021_v40  ;;  %3306 = vmatprep.subr.bf16.mxu1 %v8024_v41 }
 0x179   : > { %3216 = vmatmul.mubr.bf16.vlgmr.msra.gmra.mrb[20].mxu0 %v9408_v48  ;;  %3257 = vmatmul.mubr.bf16.vlgmr.msra.gmra.mrb[20].mxu1 %v9408_v48 }
 0x17a   : > { %3266 = vmatpush1.bf16.msra.mxu0 %v8019_v42  ;;  %3307 = vmatpush1.bf16.msra.mxu1 %v8022_v44  ;;  %v8103_v42 = vld [vmem:[%s9174_s23 + $0x730] ss:$144 sps:$4 sm:$0xff]   ;;  %v8106_v44 = vld [vmem:[%s9174_s23 + $0x738] ss:$144 sps:$4 sm:$0xff]  }
 0x17b   : > { %3267 = vmatprep.subr.bf16.mxu0 %v8027_v45  ;;  %3308 = vmatprep.subr.bf16.mxu1 %v8030_v46 }
 0x17c   : > { %3297 = vmatprep.mubr.bf16.mxu0 %v8511_v35  ;;  %3338 = vmatprep.mubr.bf16.mxu1 %v8511_v35 }
 0x17e   : > { %3268 = vmatpush1.bf16.msra.mxu0 %v8025_v47  ;;  %3309 = vmatpush1.bf16.msra.mxu1 %v8028_v49  ;;  %v8111_v47 = vld [vmem:[%s9174_s23 + $0x854] ss:$144 sps:$4 sm:$0xff]  }
 0x17f   : > { %3269 = vmatprep.subr.bf16.mxu0 %v8033_v50  ;;  %3310 = vmatprep.subr.bf16.mxu1 %v8036_v51 }
 0x182   : > { %3270 = vmatpush1.bf16.msra.mxu0 %v8031_v52  ;;  %3311 = vmatpush1.bf16.msra.mxu1 %v8034_v53  ;;  %v8114_v53 = vld [vmem:[%s9174_s23 + $0x85c] ss:$144 sps:$4 sm:$0xff]  }
 0x183   : > { %3271 = vmatprep.subr.bf16.mxu0 %v8039_v54  ;;  %3312 = vmatprep.subr.bf16.mxu1 %v8042_v55  ;;  %v8109_v54 = vld [vmem:[%s9174_s23 + $0x850] ss:$144 sps:$4 sm:$0xff]   ;;  %v8112_v55 = vld [vmem:[%s9174_s23 + $0x858] ss:$144 sps:$4 sm:$0xff]  }
 0x186   : > { %3272 = vmatpush1.bf16.msra.mxu0 %v8037_v56  ;;  %3313 = vmatpush1.bf16.msra.mxu1 %v8040_v57  ;;  %v8117_v56 = vld [vmem:[%s9174_s23 + $0x84] ss:$144 sps:$4 sm:$0xff]   ;;  %v8120_v57 = vld [vmem:[%s9174_s23 + $0x8c] ss:$144 sps:$4 sm:$0xff]  }
 0x187   : > { %3273 = vmatprep.subr.bf16.mxu0 %v8045_v58  ;;  %3314 = vmatprep.subr.bf16.mxu1 %v8048_v59  ;;  %v8115_v58 = vld [vmem:[%s9174_s23 + $0x80] ss:$144 sps:$4 sm:$0xff]   ;;  %v8118_v59 = vld [vmem:[%s9174_s23 + $0x88] ss:$144 sps:$4 sm:$0xff]  }
 0x18a   : > { %3274 = vmatpush1.bf16.msra.mxu0 %v8043_v60  ;;  %3315 = vmatpush1.bf16.msra.mxu1 %v8046_v61  ;;  %v8123_v60 = vld [vmem:[%s9174_s23 + $0x1a4] ss:$144 sps:$4 sm:$0xff]   ;;  %v8126_v61 = vld [vmem:[%s9174_s23 + $0x1ac] ss:$144 sps:$4 sm:$0xff]  }
 0x18b   : > { %3275 = vmatprep.subr.bf16.mxu0 %v8051_v62  ;;  %3316 = vmatprep.subr.bf16.mxu1 %v8054_v63  ;;  %v8121_v62 = vld [vmem:[%s9174_s23 + $0x1a0] ss:$144 sps:$4 sm:$0xff]   ;;  %v8124_v63 = vld [vmem:[%s9174_s23 + $0x1a8] ss:$144 sps:$4 sm:$0xff]  }
 0x18e   : > { %3276 = vmatpush1.bf16.msra.mxu0 %v8049_v1  ;;  %3317 = vmatpush1.bf16.msra.mxu1 %v8052_v2  ;;  %v8129_v1 = vld [vmem:[%s9174_s23 + $0x2c4] ss:$144 sps:$4 sm:$0xff]   ;;  %v8132_v2 = vld [vmem:[%s9174_s23 + $0x2cc] ss:$144 sps:$4 sm:$0xff]  }
 0x18f   : > { %3277 = vmatprep.subr.bf16.mxu0 %v8057_v3  ;;  %3318 = vmatprep.subr.bf16.mxu1 %v8060_v5  ;;  %v8127_v3 = vld [vmem:[%s9174_s23 + $0x2c0] ss:$144 sps:$4 sm:$0xff]   ;;  %v8130_v5 = vld [vmem:[%s9174_s23 + $0x2c8] ss:$144 sps:$4 sm:$0xff]  }
 0x192   : > { %3278 = vmatpush1.bf16.msra.mxu0 %v8055_v6  ;;  %3319 = vmatpush1.bf16.msra.mxu1 %v8058_v7  ;;  %v8135_v6 = vld [vmem:[%s9174_s23 + $0x3e4] ss:$144 sps:$4 sm:$0xff]   ;;  %v8138_v7 = vld [vmem:[%s9174_s23 + $0x3ec] ss:$144 sps:$4 sm:$0xff]  }
 0x193   : > { %3279 = vmatprep.subr.bf16.mxu0 %v8063_v8  ;;  %3320 = vmatprep.subr.bf16.mxu1 %v8066_v9  ;;  %v8133_v8 = vld [vmem:[%s9174_s23 + $0x3e0] ss:$144 sps:$4 sm:$0xff]   ;;  %v8136_v9 = vld [vmem:[%s9174_s23 + $0x3e8] ss:$144 sps:$4 sm:$0xff]  }
 0x196   : > { %3280 = vmatpush1.bf16.msra.mxu0 %v8061_v10  ;;  %3321 = vmatpush1.bf16.msra.mxu1 %v8064_v11  ;;  %v8141_v10 = vld [vmem:[%s9174_s23 + $0x504] ss:$144 sps:$4 sm:$0xff]   ;;  %v8139_v11 = vld [vmem:[%s9174_s23 + $0x500] ss:$144 sps:$4 sm:$0xff]  }
 0x197   : > { %3347 = vmatprep.subr.bf16.mxu0 %v8069_v12  ;;  %3388 = vmatprep.subr.bf16.mxu1 %v8072_v13  ;;  %v8142_v12 = vld [vmem:[%s9174_s23 + $0x508] ss:$144 sps:$4 sm:$0xff]   ;;  %v9517_v13 = vld [vmem:[%s9167_s14] sm:$0xff] }
 0x199   : > { %3298 = vmatmul.mubr.bf16.vlgmr.msra.gmra.mrb[24].mxu0 %v9408_v48  ;;  %3339 = vmatmul.mubr.bf16.vlgmr.msra.gmra.mrb[24].mxu1 %v9408_v48 }
 0x19a   : > { %3348 = vmatpush1.bf16.msra.mxu0 %v8067_v14  ;;  %3389 = vmatpush1.bf16.msra.mxu1 %v8070_v4  ;;  %v8147_v14 = vld [vmem:[%s9174_s23 + $0x624] ss:$144 sps:$4 sm:$0xff]   ;;  %v8150_v4 = vld [vmem:[%s9174_s23 + $0x62c] ss:$144 sps:$4 sm:$0xff]  }
 0x19b   : > { %3349 = vmatprep.subr.bf16.mxu0 %v8075_v17  ;;  %3390 = vmatprep.subr.bf16.mxu1 %v8078_v18  ;;  %v8145_v17 = vld [vmem:[%s9174_s23 + $0x620] ss:$144 sps:$4 sm:$0xff]   ;;  %v1180_v18 = vrot.slane %v9517_v13, %v9449_v16 }
 0x19c   : > { %3379 = vmatprep.mubr.bf16.mxu0 %v8511_v35  ;;  %3420 = vmatprep.mubr.bf16.mxu1 %v8511_v35 }
 0x19e   : > { %3350 = vmatpush1.bf16.msra.mxu0 %v8073_v19  ;;  %3391 = vmatpush1.bf16.msra.mxu1 %v8076_v20  ;;  %v8148_v19 = vld [vmem:[%s9174_s23 + $0x628] ss:$144 sps:$4 sm:$0xff]   ;;  %v8153_v20 = vld [vmem:[%s9174_s23 + $0x744] ss:$144 sps:$4 sm:$0xff]  }
 0x19f   : > { %3351 = vmatprep.subr.bf16.mxu0 %v8081_v21  ;;  %3392 = vmatprep.subr.bf16.mxu1 %v8084_v22  ;;  %v8156_v21 = vld [vmem:[%s9174_s23 + $0x74c] ss:$144 sps:$4 sm:$0xff]   ;;  %v1160_v22 = vrot.slane %v9517_v13, %v9430_v0 }
 0x1a2   : > { %3352 = vmatpush1.bf16.msra.mxu0 %v8079_v23  ;;  %3393 = vmatpush1.bf16.msra.mxu1 %v8082_v24 }
 0x1a3   : > { %3353 = vmatprep.subr.bf16.mxu0 %v8087_v25  ;;  %3394 = vmatprep.subr.bf16.mxu1 %v8090_v26  ;;  %v8151_v25 = vld [vmem:[%s9174_s23 + $0x740] ss:$144 sps:$4 sm:$0xff]   ;;  %v8154_v26 = vld [vmem:[%s9174_s23 + $0x748] ss:$144 sps:$4 sm:$0xff]  }
 0x1a6   : > { %3354 = vmatpush1.bf16.msra.mxu0 %v8085_v27  ;;  %3395 = vmatpush1.bf16.msra.mxu1 %v8088_v28  ;;  %v1168_v27 = vrot.slane %v9517_v13, %v9446_v15 }
 0x1a7   : > { %3355 = vmatprep.subr.bf16.mxu0 %v8093_v29  ;;  %3396 = vmatprep.subr.bf16.mxu1 %v8096_v30 }
 0x1aa   : > { %3356 = vmatpush1.bf16.msra.mxu0 %v8091_v31  ;;  %3397 = vmatpush1.bf16.msra.mxu1 %v8094_v32  ;;  %v8159_v31 = vld [vmem:[%s9174_s23 + $0x864] ss:$144 sps:$4 sm:$0xff]  }
 0x1ab   : > { %3357 = vmatprep.subr.bf16.mxu0 %v8099_v33  ;;  %3398 = vmatprep.subr.bf16.mxu1 %v8102_v34 }
 0x1ac   : > { %v9478_v40 = vpop.f32.mrb[0].mxu0  ;;  %v9480_v41 = vpop.f32.mrb[0].mxu1 }
 0x1ad   : > { %v9484_v45 = vpop.f32.mrb[1].mxu0  ;;  %v9486_v46 = vpop.f32.mrb[1].mxu1 }
 0x1ae   : > { %v2811_v49 = vpop.f32.mrb[2].mxu0  ;;  %v2852_v50 = vpop.f32.mrb[2].mxu1  ;;  %3358 = vmatpush1.bf16.msra.mxu0 %v8097_v36  ;;  %3399 = vmatpush1.bf16.msra.mxu1 %v8100_v37  ;;  %v8162_v37 = vld [vmem:[%s9174_s23 + $0x86c] ss:$144 sps:$4 sm:$0xff]  }
 0x1af   : > { %v2812_v51 = vpop.f32.mrb[3].mxu0  ;;  %v2853_v52 = vpop.f32.mrb[3].mxu1  ;;  %3359 = vmatprep.subr.bf16.mxu0 %v8105_v38  ;;  %3400 = vmatprep.subr.bf16.mxu1 %v8108_v39  ;;  %v2810_v38 = vadd.f32 %v9484_v45, %v1160_v22  ;;  %v8157_v39 = vld [vmem:[%s9174_s23 + $0x860] ss:$144 sps:$4 sm:$0xff]  }
 0x1b0   : > { %v8164_v49 = vld [vmem:[%s9172_s20 + $0xc0] sm:$0xff]   ;;  %v8189_v22 = vld [vmem:[%s9172_s20 + $0x30] sm:$0xff]  }
 0x1b1   : > { %v3512_v50 = vmax.f32 %v2810_v38, 0.0  ;;  %v8165_v52 = vld [vmem:[%s9172_s20] sm:$0xff]   ;;  %v8191_v38 = vld [vmem:[%s9172_s20 + $0x78] sm:$0xff]  }
 0x1b2   : > { %3360 = vmatpush1.bf16.msra.mxu0 %v8103_v42  ;;  %3401 = vmatpush1.bf16.msra.mxu1 %v8106_v44  ;;  %v8160_v42 = vld [vmem:[%s9174_s23 + $0x868] ss:$144 sps:$4 sm:$0xff]   ;;  %v2851_v44 = vadd.f32 %v9486_v46, %v1168_v27  ;;  %v8166_v45 = vld [vmem:[%s9172_s20 + $0x80] sm:$0xff]  }
 0x1b3   : > { %3361 = vmatprep.subr.bf16.mxu0 %v8111_v47  ;;  %3402 = vmatprep.subr.bf16.mxu1 %v8114_v53  ;;  %v8163_v47 = vld [vmem:[%s9172_s20 + $0x40] sm:$0xff]   ;;  %v8167_v46 = vld [vmem:[%s9172_s20 + $0x48] sm:$0xff]   ;;  %v3549_v53 = vpack.c.bf16 %v3512_v50, %v3512_v50 }
 0x1b4   : > { %v3514_v51 = vmax.f32 %v2851_v44, 0.0  ;;  %v8193_v44 = vld [vmem:[%s9172_s20 + $0x38] sm:$0xff]   ;;  %v8195_v50 = vld [vmem:[%s9172_s20 + $0x140] sm:$0xff]  }
 0x1b6   : > { %3362 = vmatpush1.bf16.msra.mxu0 %v8109_v54  ;;  %3403 = vmatpush1.bf16.msra.mxu1 %v8112_v55  ;;  %v8168_v54 = vld [vmem:[%s9172_s20 + $0xc8] sm:$0xff]   ;;  %v3551_v55 = vpack.c.bf16 %v3514_v51, %v3514_v51 }
 0x1b7   : > { %3429 = vmatprep.subr.bf16.mxu0 %v8117_v56  ;;  %3470 = vmatprep.subr.bf16.mxu1 %v8120_v57  ;;  %v8169_v56 = vld [vmem:[%s9172_s20 + $0x8] sm:$0xff]  }
 0x1b8   : > { %v8170_v57 = vld [vmem:[%s9172_s20 + $0x88] sm:$0xff]  }
 0x1b9   : > { %3380 = vmatmul.mubr.bf16.vlgmr.msra.gmra.mrb[28].mxu0 %v9408_v48  ;;  %3421 = vmatmul.mubr.bf16.vlgmr.msra.gmra.mrb[28].mxu1 %v9408_v48 }
 0x1ba   : > { %3430 = vmatpush1.bf16.msra.mxu0 %v8115_v58  ;;  %3471 = vmatpush1.bf16.msra.mxu1 %v8118_v59  ;;  %v8171_v58 = vld [vmem:[%s9172_s20 + $0x50] sm:$0xff]  }
 0x1bb   : > { %3431 = vmatprep.subr.bf16.mxu0 %v8123_v60  ;;  %3472 = vmatprep.subr.bf16.mxu1 %v8126_v61  ;;  %v8172_v59 = vld [vmem:[%s9172_s20 + $0xd0] sm:$0xff]   ;;  %v8175_v61 = vld [vmem:[%s9172_s20 + $0x58] sm:$0xff]  }
 0x1bc   : > { %3461 = vmatprep.mubr.bf16.mxu0 %v8511_v35  ;;  %3502 = vmatprep.mubr.bf16.mxu1 %v8511_v35  ;;  %v8144_v35 = vld [vmem:[%s9174_s23 + $0x50c] ss:$144 sps:$4 sm:$0xff]   ;;  %v8173_v60 = vld [vmem:[%s9172_s20 + $0x10] sm:$0xff]  }
 0x1be   : > { %3432 = vmatpush1.bf16.msra.mxu0 %v8121_v62  ;;  %3473 = vmatpush1.bf16.msra.mxu1 %v8124_v63  ;;  %v8176_v62 = vld [vmem:[%s9172_s20 + $0xd8] sm:$0xff]  }
 0x1bf   : > { %3433 = vmatprep.subr.bf16.mxu0 %v8129_v1  ;;  %3474 = vmatprep.subr.bf16.mxu1 %v8132_v2  ;;  %v8177_v63 = vld [vmem:[%s9172_s20 + $0x18] sm:$0xff]   ;;  %v8179_v2 = vld [vmem:[%s9172_s20 + $0x60] sm:$0xff]  }
 0x1c0   : > { %v8178_v1 = vld [vmem:[%s9172_s20 + $0x98] sm:$0xff]  }
 0x1c2   : > { %3434 = vmatpush1.bf16.msra.mxu0 %v8127_v3  ;;  %3475 = vmatpush1.bf16.msra.mxu1 %v8130_v5  ;;  %v8180_v3 = vld [vmem:[%s9172_s20 + $0xe0] sm:$0xff]  }
 0x1c3   : > { %3435 = vmatprep.subr.bf16.mxu0 %v8135_v6  ;;  %3476 = vmatprep.subr.bf16.mxu1 %v8138_v7  ;;  %v8181_v5 = vld [vmem:[%s9172_s20 + $0x20] sm:$0xff]   ;;  %v9570_v7 = vsub.s32 0, %v9399_v43 }
 0x1c4   : > { %v8182_v6 = vld [vmem:[%s9172_s20 + $0xa0] sm:$0xff]  }
 0x1c6   : > { %3436 = vmatpush1.bf16.msra.mxu0 %v8133_v8  ;;  %3477 = vmatpush1.bf16.msra.mxu1 %v8136_v9  ;;  %v8183_v8 = vld [vmem:[%s9172_s20 + $0x68] sm:$0xff]   ;;  %v9574_v9 = vsub.s32 2, %v9399_v43 }
 0x1c7   : > { %3437 = vmatprep.subr.bf16.mxu0 %v8141_v10  ;;  %3478 = vmatprep.subr.bf16.mxu1 %v8144_v35  ;;  %v8184_v10 = vld [vmem:[%s9172_s20 + $0xe8] sm:$0xff]   ;;  %v9578_v35 = vsub.s32 5, %v9399_v43 }
 0x1ca   : > { %3438 = vmatpush1.bf16.msra.mxu0 %v8139_v11  ;;  %3479 = vmatpush1.bf16.msra.mxu1 %v8142_v12  ;;  %v8185_v11 = vld [vmem:[%s9172_s20 + $0x28] sm:$0xff]   ;;  %v9582_v12 = vsub.s32 7, %v9399_v43 }
 0x1cb   : > { %3439 = vmatprep.subr.bf16.mxu0 %v8147_v14  ;;  %3480 = vmatprep.subr.bf16.mxu1 %v8150_v4  ;;  %v8186_v14 = vld [vmem:[%s9172_s20 + $0xa8] sm:$0xff]   ;;  %v1156_v4 = vrot.slane %v9517_v13, %v9570_v7 }
 0x1cc   : > { %v9529_v23 = vpop.f32.mrb[4].mxu0  ;;  %v2930_v24 = vpop.f32.mrb[4].mxu1  ;;  %v1184_v27 = vrot.slane %v9517_v13, %v9582_v12 }
 0x1cd   : > { %v9535_v28 = vadd.f32 %v2930_v24, %v1180_v18  ;;  %v9537_v29 = vpop.f32.mrb[5].mxu0  ;;  %v9539_v30 = vpop.f32.mrb[5].mxu1  ;;  %v1164_v18 = vrot.slane %v9517_v13, %v9574_v9  ;;  %v1176_v24 = vrot.slane %v9517_v13, %v9578_v35 }
 0x1ce   : > { %v2893_v32 = vpop.f32.mrb[6].mxu0  ;;  %v2934_v33 = vpop.f32.mrb[6].mxu1  ;;  %3440 = vmatpush1.bf16.msra.mxu0 %v8145_v17  ;;  %3481 = vmatpush1.bf16.msra.mxu1 %v8148_v19  ;;  %v8187_v17 = vld [vmem:[%s9172_s20 + $0x70] sm:$0xff]  }
 0x1cf   : > { %v2894_v34 = vpop.f32.mrb[7].mxu0  ;;  %v2935_v36 = vpop.f32.mrb[7].mxu1  ;;  %3441 = vmatprep.subr.bf16.mxu0 %v8153_v20  ;;  %3482 = vmatprep.subr.bf16.mxu1 %v8156_v21  ;;  %v8188_v21 = vld [vmem:[%s9172_s20 + $0xf0] sm:$0xff]   ;;  %v2808_v33 = vadd.f32 %v9478_v40, %v1156_v4  ;;  %v2933_v40 = vadd.f32 %v9539_v30, %v1184_v27  ;;  %v8200_v30 = vld [vmem:[%s9172_s20 + $0x1c8] sm:$0xff]   ;;  %v9635_v4 = vsub.s32 4, %v9399_v43 }
 0x1d1   : > { %v3511_v51 = vmax.f32 %v2808_v33, 0.0  ;;  %v1172_v27 = vrot.slane %v9517_v13, %v9635_v4  ;;  %v8221_v13 = vld [vmem:[%s9172_s20 + $0x130] sm:$0xff]  }
 0x1d2   : > { %3442 = vmatpush1.bf16.msra.mxu0 %v8151_v25  ;;  %3483 = vmatpush1.bf16.msra.mxu1 %v8154_v26 }
 0x1d3   : > { %3443 = vmatprep.subr.bf16.mxu0 %v8159_v31  ;;  %3484 = vmatprep.subr.bf16.mxu1 %v8162_v37  ;;  %v8190_v37 = vld [vmem:[%s9172_s20 + $0xb0] sm:$0xff]  }
 0x1d6   : > { %3444 = vmatpush1.bf16.msra.mxu0 %v8157_v39  ;;  %3485 = vmatpush1.bf16.msra.mxu1 %v8160_v42  ;;  %v8192_v39 = vld [vmem:[%s9172_s20 + $0xf8] sm:$0xff]   ;;  %v2849_v42 = vadd.f32 %v9480_v41, %v1164_v18  ;;  %v8197_v41 = vld [vmem:[%s9172_s20 + $0x100] sm:$0xff]   ;;  %v9639_v18 = vld [vmem:[%s9167_s14 + $0x8] sm:$0xff] }
 0x1d7   : > { %7300 = vmatprep.subr.bf16.mxu0 %v8163_v47  ;;  %7322 = vmatprep.subr.bf16.mxu1 %v8164_v49  ;;  %v2892_v47 = vadd.f32 %v9537_v29, %v1176_v24  ;;  %v8194_v49 = vld [vmem:[%s9172_s20 + $0xb8] sm:$0xff]   ;;  %v8199_v29 = vld [vmem:[%s9172_s20 + $0x148] sm:$0xff]   ;;  %v8219_v24 = vld [vmem:[%s9172_s20 + $0x170] sm:$0xff]   ;;  %v1192_v33 = vrot.slane %v9639_v18, %v9430_v0 }
 0x1d9   : > { %3462 = vmatmul.mubr.bf16.vlgmr.msra.gmra.mrb[32].mxu0 %v9408_v48  ;;  %3503 = vmatmul.mubr.bf16.vlgmr.msra.gmra.mrb[32].mxu1 %v9408_v48  ;;  %v8174_v48 = vld [vmem:[%s9172_s20 + $0x90] sm:$0xff]  }
 0x1da   : > { %7301 = vmatpush3.bf16.msra.mxu0 %v8165_v52  ;;  %5920 = vmatprep.mubr.bf16.mxu0 %v3549_v53  ;;  %v8196_v52 = vld [vmem:[%s9172_s20 + $0x1c0] sm:$0xff]  }
 0x1db   : > { %7323 = vmatpush3.bf16.msra.mxu1 %v8166_v45  ;;  %5960 = vmatprep.mubr.bf16.mxu1 %v3551_v55  ;;  %v3513_v45 = vmax.f32 %v2849_v42, 0.0  ;;  %v8198_v53 = vld [vmem:[%s9172_s20 + $0x180] sm:$0xff]   ;;  %v3548_v55 = vpack.c.bf16 %v3511_v51, %v3511_v51  ;;  %v2890_v42 = vadd.f32 %v9529_v23, %v1172_v27  ;;  %v1188_v27 = vrot.slane %v9639_v18, %v9570_v7 }
 0x1dc   : > { %7302 = vmatprep.subr.bf16.mxu0 %v8167_v46  ;;  %7324 = vmatprep.subr.bf16.mxu1 %v8168_v54  ;;  %v3516_v46 = vmax.f32 %v2892_v47, 0.0  ;;  %v3518_v54 = vmax.f32 %v2933_v40, 0.0  ;;  %v8223_v40 = vld [vmem:[%s9172_s20 + $0x178] sm:$0xff]  }
 0x1dd   : > { %v3515_v23 = vmax.f32 %v2890_v42, 0.0  ;;  %v1208_v42 = vrot.slane %v9639_v18, %v9578_v35 }
 0x1de   : > { %7303 = vmatpush3.bf16.msra.mxu0 %v8169_v56  ;;  %v3550_v56 = vpack.c.bf16 %v3513_v45, %v3513_v45 }
 0x1df   : > { %7325 = vmatpush3.bf16.msra.mxu1 %v8170_v57  ;;  %7304 = vmatprep.subr.bf16.mxu0 %v8171_v58  ;;  %v8201_v57 = vld [vmem:[%s9172_s20 + $0x108] sm:$0xff]   ;;  %v3553_v58 = vpack.c.bf16 %v3516_v46, %v3516_v46  ;;  %v8227_v46 = vld [vmem:[%s9172_s20 + $0x240] sm:$0xff]  }
 0x1e0   : > { %7326 = vmatprep.subr.bf16.mxu1 %v8172_v59  ;;  %v8202_v59 = vld [vmem:[%s9172_s20 + $0x188] sm:$0xff]  }
 0x1e2   : > { %7305 = vmatpush3.bf16.msra.mxu0 %v8173_v60  ;;  %v3555_v60 = vpack.c.bf16 %v3518_v54, %v3518_v54  ;;  %v8228_v54 = vld [vmem:[%s9172_s20 + $0x2c0] sm:$0xff]  }
 0x1e3   : > { %7327 = vmatpush3.bf16.msra.mxu1 %v8174_v48  ;;  %7306 = vmatprep.subr.bf16.mxu0 %v8175_v61  ;;  %v8203_v48 = vld [vmem:[%s9172_s20 + $0x150] sm:$0xff]  }
 0x1e4   : > { %7328 = vmatprep.subr.bf16.mxu1 %v8176_v62  ;;  %v8204_v61 = vld [vmem:[%s9172_s20 + $0x1d0] sm:$0xff]  }
 0x1e5   : > { %v8205_v62 = vld [vmem:[%s9172_s20 + $0x110] sm:$0xff]  }
 0x1e6   : > { %7307 = vmatpush3.bf16.msra.mxu0 %v8177_v63  ;;  %v8206_v63 = vld [vmem:[%s9172_s20 + $0x190] sm:$0xff]  }
 0x1e7   : > { %7329 = vmatpush3.bf16.msra.mxu1 %v8178_v1  ;;  %7308 = vmatprep.subr.bf16.mxu0 %v8179_v2  ;;  %v8207_v1 = vld [vmem:[%s9172_s20 + $0x158] sm:$0xff]  }
 0x1e8   : > { %7330 = vmatprep.subr.bf16.mxu1 %v8180_v3  ;;  %v8208_v2 = vld [vmem:[%s9172_s20 + $0x1d8] sm:$0xff]  }
 0x1e9   : > { %v8209_v3 = vld [vmem:[%s9172_s20 + $0x118] sm:$0xff]  }
 0x1ea   : > { %7309 = vmatpush3.bf16.msra.mxu0 %v8181_v5  ;;  %v8210_v5 = vld [vmem:[%s9172_s20 + $0x198] sm:$0xff]  }
 0x1eb   : > { %7331 = vmatpush3.bf16.msra.mxu1 %v8182_v6  ;;  %7310 = vmatprep.subr.bf16.mxu0 %v8183_v8  ;;  %v8211_v6 = vld [vmem:[%s9172_s20 + $0x160] sm:$0xff]  }
 0x1ec   : > { %v9590_v19 = vpop.f32.mrb[8].mxu0  ;;  %v9592_v20 = vpop.f32.mrb[8].mxu1  ;;  %7332 = vmatprep.subr.bf16.mxu1 %v8184_v10  ;;  %v8212_v8 = vld [vmem:[%s9172_s20 + $0x1e0] sm:$0xff]  }
 0x1ed   : > { %v9598_v25 = vpop.f32.mrb[9].mxu0  ;;  %v9600_v26 = vpop.f32.mrb[9].mxu1  ;;  %v8213_v10 = vld [vmem:[%s9172_s20 + $0x120] sm:$0xff]  }
 0x1ee   : > { %v2975_v31 = vpop.f32.mrb[10].mxu0  ;;  %v3016_v32 = vpop.f32.mrb[10].mxu1  ;;  %7311 = vmatpush3.bf16.msra.mxu0 %v8185_v11  ;;  %v8214_v11 = vld [vmem:[%s9172_s20 + $0x1a0] sm:$0xff]   ;;  %v2974_v51 = vadd.f32 %v9598_v25, %v1192_v33  ;;  %v1196_v33 = vrot.slane %v9639_v18, %v9574_v9 }
 0x1ef   : > { %7333 = vmatpush3.bf16.msra.mxu1 %v8186_v14  ;;  %v2976_v34 = vpop.f32.mrb[11].mxu0  ;;  %v3017_v36 = vpop.f32.mrb[11].mxu1  ;;  %7312 = vmatprep.subr.bf16.mxu0 %v8187_v17  ;;  %v8215_v14 = vld [vmem:[%s9172_s20 + $0x168] sm:$0xff]   ;;  %v8220_v31 = vld [vmem:[%s9172_s20 + $0x1f0] sm:$0xff]  }
 0x1f0   : > { %7334 = vmatprep.subr.bf16.mxu1 %v8188_v21  ;;  %v8216_v17 = vld [vmem:[%s9172_s20 + $0x1e8] sm:$0xff]  }
 0x1f1   : > { %v8217_v21 = vld [vmem:[%s9172_s20 + $0x128] sm:$0xff]  }
 0x1f2   : > { %7313 = vmatpush3.bf16.msra.mxu0 %v8189_v22  ;;  %v8218_v22 = vld [vmem:[%s9172_s20 + $0x1a8] sm:$0xff]  }
 0x1f3   : > { %7335 = vmatpush3.bf16.msra.mxu1 %v8190_v37  ;;  %7314 = vmatprep.subr.bf16.mxu0 %v8191_v38  ;;  %v1200_v37 = vrot.slane %v9639_v18, %v9446_v15 }
 0x1f4   : > { %7336 = vmatprep.subr.bf16.mxu1 %v8192_v39 }
 0x1f5   : > { %v3015_v45 = vadd.f32 %v9600_v26, %v1200_v37  ;;  %v3552_v26 = vpack.c.bf16 %v3515_v23, %v3515_v23  ;;  %v8255_v23 = vld [vmem:[%s9172_s20 + $0x278] sm:$0xff]  }
 0x1f6   : > { %7315 = vmatpush3.bf16.msra.mxu0 %v8193_v44 }
 0x1f7   : > { %7337 = vmatpush3.bf16.msra.mxu1 %v8194_v49  ;;  %7344 = vmatprep.subr.bf16.mxu0 %v8195_v50  ;;  %v8222_v49 = vld [vmem:[%s9172_s20 + $0x1b0] sm:$0xff]   ;;  %v8224_v50 = vld [vmem:[%s9172_s20 + $0x1f8] sm:$0xff]   ;;  %v3522_v25 = vmax.f32 %v3015_v45, 0.0 }
 0x1f8   : > { %7366 = vmatprep.subr.bf16.mxu1 %v8196_v52  ;;  %v8225_v52 = vld [vmem:[%s9172_s20 + $0x138] sm:$0xff]  }
 0x1f9   : > { %5921 = vmatmul.mubr.bf16.vlgmr.msra.gmra.mrb[36].mxu0 %v3548_v55  ;;  %v8229_v55 = vld [vmem:[%s9172_s20 + $0x200] sm:$0xff]  }
 0x1fa   : > { %5961 = vmatmul.mubr.bf16.vlgmr.msra.gmra.mrb[36].mxu1 %v3550_v56  ;;  %7345 = vmatpush3.bf16.msra.mxu0 %v8197_v41  ;;  %v8226_v41 = vld [vmem:[%s9172_s20 + $0x1b8] sm:$0xff]   ;;  %v8231_v56 = vld [vmem:[%s9172_s20 + $0x248] sm:$0xff]  }
 0x1fb   : > { %6000 = vmatprep.mubr.bf16.mxu0 %v3553_v58  ;;  %7367 = vmatpush3.bf16.msra.mxu1 %v8198_v53  ;;  %v3517_v53 = vmax.f32 %v9535_v28, 0.0  ;;  %v8232_v58 = vld [vmem:[%s9172_s20 + $0x2c8] sm:$0xff]  }
 0x1fc   : > { %6040 = vmatprep.mubr.bf16.mxu1 %v3555_v60  ;;  %7346 = vmatprep.subr.bf16.mxu0 %v8199_v29  ;;  %v3520_v29 = vmax.f32 %v2974_v51, 0.0  ;;  %v3559_v60 = vpack.c.bf16 %v3522_v25, %v3522_v25  ;;  %v2972_v51 = vadd.f32 %v9590_v19, %v1188_v27  ;;  %v8259_v25 = vld [vmem:[%s9172_s20 + $0x340] sm:$0xff]   ;;  %v8280_v27 = vld [vmem:[%s9172_s20 + $0x3e8] sm:$0xff]  }
 0x1fd   : > { %7368 = vmatprep.subr.bf16.mxu1 %v8200_v30  ;;  %v8230_v30 = vld [vmem:[%s9172_s20 + $0x280] sm:$0xff]  }
 0x1fe   : > { %7347 = vmatpush3.bf16.msra.mxu0 %v8201_v57  ;;  %v3554_v57 = vpack.c.bf16 %v3517_v53, %v3517_v53  ;;  %v3557_v28 = vpack.c.bf16 %v3520_v29, %v3520_v29  ;;  %v3013_v53 = vadd.f32 %v9592_v20, %v1196_v33  ;;  %v8261_v20 = vld [vmem:[%s9172_s20 + $0x300] sm:$0xff]   ;;  %v8281_v33 = vld [vmem:[%s9172_s20 + $0x328] sm:$0xff]  }
 0x1ff   : > { %7369 = vmatpush3.bf16.msra.mxu1 %v8202_v59  ;;  %7348 = vmatprep.subr.bf16.mxu0 %v8203_v48  ;;  %v8233_v59 = vld [vmem:[%s9172_s20 + $0x208] sm:$0xff]  }
 0x200   : > { %7370 = vmatprep.subr.bf16.mxu1 %v8204_v61  ;;  %v8234_v48 = vld [vmem:[%s9172_s20 + $0x288] sm:$0xff]   ;;  %v8235_v61 = vld [vmem:[%s9172_s20 + $0x250] sm:$0xff]  }
 0x202   : > { %7349 = vmatpush3.bf16.msra.mxu0 %v8205_v62  ;;  %v8236_v62 = vld [vmem:[%s9172_s20 + $0x2d0] sm:$0xff]  }
 0x203   : > { %7371 = vmatpush3.bf16.msra.mxu1 %v8206_v63  ;;  %7350 = vmatprep.subr.bf16.mxu0 %v8207_v1  ;;  %v8237_v63 = vld [vmem:[%s9172_s20 + $0x210] sm:$0xff]  }
 0x204   : > { %7372 = vmatprep.subr.bf16.mxu1 %v8208_v2  ;;  %v8238_v1 = vld [vmem:[%s9172_s20 + $0x290] sm:$0xff]   ;;  %v8239_v2 = vld [vmem:[%s9172_s20 + $0x258] sm:$0xff]  }
 0x206   : > { %7351 = vmatpush3.bf16.msra.mxu0 %v8209_v3  ;;  %v8240_v3 = vld [vmem:[%s9172_s20 + $0x2d8] sm:$0xff]  }
 0x207   : > { %7373 = vmatpush3.bf16.msra.mxu1 %v8210_v5  ;;  %7352 = vmatprep.subr.bf16.mxu0 %v8211_v6  ;;  %v8241_v5 = vld [vmem:[%s9172_s20 + $0x218] sm:$0xff]  }
 0x208   : > { %7374 = vmatprep.subr.bf16.mxu1 %v8212_v8  ;;  %v8242_v6 = vld [vmem:[%s9172_s20 + $0x298] sm:$0xff]   ;;  %v8243_v8 = vld [vmem:[%s9172_s20 + $0x260] sm:$0xff]  }
 0x20a   : > { %7353 = vmatpush3.bf16.msra.mxu0 %v8213_v10  ;;  %v8244_v10 = vld [vmem:[%s9172_s20 + $0x2e0] sm:$0xff]  }
 0x20b   : > { %7375 = vmatpush3.bf16.msra.mxu1 %v8214_v11  ;;  %7354 = vmatprep.subr.bf16.mxu0 %v8215_v14  ;;  %v8245_v11 = vld [vmem:[%s9172_s20 + $0x220] sm:$0xff]  }
 0x20c   : > { %v9647_v32 = vpop.f32.mrb[12].mxu0  ;;  %v9649_v43 = vpop.f32.mrb[12].mxu1  ;;  %7376 = vmatprep.subr.bf16.mxu1 %v8216_v17  ;;  %v8246_v14 = vld [vmem:[%s9172_s20 + $0x2a0] sm:$0xff]   ;;  %v8247_v17 = vld [vmem:[%s9172_s20 + $0x268] sm:$0xff]  }
 0x20d   : > { %v9653_v34 = vpop.f32.mrb[13].mxu0  ;;  %v9655_v36 = vpop.f32.mrb[13].mxu1 }
 0x20e   : > { %v3057_v38 = vpop.f32.mrb[14].mxu0  ;;  %v3098_v39 = vpop.f32.mrb[14].mxu1  ;;  %7355 = vmatpush3.bf16.msra.mxu0 %v8217_v21  ;;  %v8248_v21 = vld [vmem:[%s9172_s20 + $0x2e8] sm:$0xff]   ;;  %v3056_v29 = vadd.f32 %v9653_v34, %v1208_v42  ;;  %v1204_v42 = vrot.slane %v9639_v18, %v9635_v4 }
 0x20f   : > { %7377 = vmatpush3.bf16.msra.mxu1 %v8218_v22  ;;  %v3058_v44 = vpop.f32.mrb[15].mxu0  ;;  %v3099_v47 = vpop.f32.mrb[15].mxu1  ;;  %7356 = vmatprep.subr.bf16.mxu0 %v8219_v24  ;;  %v8249_v22 = vld [vmem:[%s9172_s20 + $0x228] sm:$0xff]   ;;  %v8252_v38 = vld [vmem:[%s9172_s20 + $0x2f0] sm:$0xff]  }
 0x210   : > { %7378 = vmatprep.subr.bf16.mxu1 %v8220_v31  ;;  %v8250_v24 = vld [vmem:[%s9172_s20 + $0x2a8] sm:$0xff]   ;;  %v8251_v31 = vld [vmem:[%s9172_s20 + $0x270] sm:$0xff]  }
 0x211   : > { %v8253_v39 = vld [vmem:[%s9172_s20 + $0x230] sm:$0xff]   ;;  %v8263_v34 = vld [vmem:[%s9172_s20 + $0x348] sm:$0xff]  }
 0x212   : > { %7357 = vmatpush3.bf16.msra.mxu0 %v8221_v13 }
 0x213   : > { %7379 = vmatpush3.bf16.msra.mxu1 %v8222_v49  ;;  %7358 = vmatprep.subr.bf16.mxu0 %v8223_v40  ;;  %v1216_v49 = vrot.slane %v9639_v18, %v9582_v12 }
 0x214   : > { %7380 = vmatprep.subr.bf16.mxu1 %v8224_v50 }
 0x215   : > { %v3097_v19 = vadd.f32 %v9655_v36, %v1216_v49  ;;  %v8264_v36 = vld [vmem:[%s9172_s20 + $0x3c8] sm:$0xff]   ;;  %v8284_v49 = vld [vmem:[%s9172_s20 + $0x3f0] sm:$0xff]  }
 0x216   : > { %7359 = vmatpush3.bf16.msra.mxu0 %v8225_v52 }
 0x217   : > { %7381 = vmatpush3.bf16.msra.mxu1 %v8226_v41  ;;  %7388 = vmatprep.subr.bf16.mxu0 %v8227_v46  ;;  %v8254_v41 = vld [vmem:[%s9172_s20 + $0x2b0] sm:$0xff]   ;;  %v8256_v46 = vld [vmem:[%s9172_s20 + $0x2f8] sm:$0xff]  }
 0x218   : > { %7410 = vmatprep.subr.bf16.mxu1 %v8228_v54  ;;  %v8257_v54 = vld [vmem:[%s9172_s20 + $0x238] sm:$0xff]  }
 0x219   : > { %6001 = vmatmul.mubr.bf16.vlgmr.msra.gmra.mrb[40].mxu0 %v3552_v26  ;;  %v8260_v26 = vld [vmem:[%s9172_s20 + $0x3c0] sm:$0xff]  }
 0x21a   : > { %6041 = vmatmul.mubr.bf16.vlgmr.msra.gmra.mrb[40].mxu1 %v3554_v57  ;;  %7389 = vmatpush3.bf16.msra.mxu0 %v8229_v55  ;;  %v8258_v55 = vld [vmem:[%s9172_s20 + $0x2b8] sm:$0xff]   ;;  %v3524_v57 = vmax.f32 %v3056_v29, 0.0 }
 0x21b   : > { %6080 = vmatprep.mubr.bf16.mxu0 %v3557_v28  ;;  %7411 = vmatpush3.bf16.msra.mxu1 %v8230_v30  ;;  %v3519_v30 = vmax.f32 %v2972_v51, 0.0  ;;  %v3526_v28 = vmax.f32 %v3097_v19, 0.0  ;;  %v8286_v19 = vld [vmem:[%s9172_s20 + $0x3b0] sm:$0xff]  }
 0x21c   : > { %6120 = vmatprep.mubr.bf16.mxu1 %v3559_v60  ;;  %7390 = vmatprep.subr.bf16.mxu0 %v8231_v56  ;;  %v3521_v56 = vmax.f32 %v3013_v53, 0.0 }
 0x21d   : > { %7412 = vmatprep.subr.bf16.mxu1 %v8232_v58  ;;  %v8262_v58 = vld [vmem:[%s9172_s20 + $0x380] sm:$0xff]  }
 0x21e   : > { %7391 = vmatpush3.bf16.msra.mxu0 %v8233_v59  ;;  %v3556_v59 = vpack.c.bf16 %v3519_v30, %v3519_v30  ;;  %v3558_v60 = vpack.c.bf16 %v3521_v56, %v3521_v56 }
 0x21f   : > { %7413 = vmatpush3.bf16.msra.mxu1 %v8234_v48  ;;  %7392 = vmatprep.subr.bf16.mxu0 %v8235_v61  ;;  %v8265_v48 = vld [vmem:[%s9172_s20 + $0x308] sm:$0xff]   ;;  %v3561_v61 = vpack.c.bf16 %v3524_v57, %v3524_v57 }
 0x220   : > { %7414 = vmatprep.subr.bf16.mxu1 %v8236_v62  ;;  %v8266_v62 = vld [vmem:[%s9172_s20 + $0x388] sm:$0xff]  }
 0x222   : > { %7393 = vmatpush3.bf16.msra.mxu0 %v8237_v63  ;;  %v3563_v63 = vpack.c.bf16 %v3526_v28, %v3526_v28  ;;  %v8291_v28 = vld [vmem:[%s9172_s20 + $0x440] sm:$0xff]  }
 0x223   : > { %7415 = vmatpush3.bf16.msra.mxu1 %v8238_v1  ;;  %7394 = vmatprep.subr.bf16.mxu0 %v8239_v2  ;;  %v8267_v1 = vld [vmem:[%s9172_s20 + $0x350] sm:$0xff]  }
 0x224   : > { %7416 = vmatprep.subr.bf16.mxu1 %v8240_v3  ;;  %v8268_v2 = vld [vmem:[%s9172_s20 + $0x3d0] sm:$0xff]  }
 0x225   : > { %v8269_v3 = vld [vmem:[%s9172_s20 + $0x310] sm:$0xff]  }
 0x226   : > { %7395 = vmatpush3.bf16.msra.mxu0 %v8241_v5  ;;  %v8270_v5 = vld [vmem:[%s9172_s20 + $0x390] sm:$0xff]  }
 0x227   : > { %7417 = vmatpush3.bf16.msra.mxu1 %v8242_v6  ;;  %7396 = vmatprep.subr.bf16.mxu0 %v8243_v8  ;;  %v8271_v6 = vld [vmem:[%s9172_s20 + $0x358] sm:$0xff]  }
 0x228   : > { %7418 = vmatprep.subr.bf16.mxu1 %v8244_v10  ;;  %v8272_v8 = vld [vmem:[%s9172_s20 + $0x3d8] sm:$0xff]  }
 0x229   : > { %v8273_v10 = vld [vmem:[%s9172_s20 + $0x318] sm:$0xff]  }
 0x22a   : > { %7397 = vmatpush3.bf16.msra.mxu0 %v8245_v11  ;;  %v8274_v11 = vld [vmem:[%s9172_s20 + $0x398] sm:$0xff]  }
 0x22b   : > { %7419 = vmatpush3.bf16.msra.mxu1 %v8246_v14  ;;  %7398 = vmatprep.subr.bf16.mxu0 %v8247_v17  ;;  %v8275_v14 = vld [vmem:[%s9172_s20 + $0x360] sm:$0xff]  }
 0x22c   : > { %v9698_v13 = vpop.f32.mrb[16].mxu0  ;;  %v9700_v37 = vpop.f32.mrb[16].mxu1  ;;  %7420 = vmatprep.subr.bf16.mxu1 %v8248_v21  ;;  %v8276_v17 = vld [vmem:[%s9172_s20 + $0x3e0] sm:$0xff]  }
 0x22d   : > { %v9706_v44 = vpop.f32.mrb[17].mxu0  ;;  %v9708_v47 = vpop.f32.mrb[17].mxu1  ;;  %v8277_v21 = vld [vmem:[%s9172_s20 + $0x320] sm:$0xff]  }
 0x22e   : > { %v3139_v40 = vpop.f32.mrb[18].mxu0  ;;  %v3180_v50 = vpop.f32.mrb[18].mxu1  ;;  %7399 = vmatpush3.bf16.msra.mxu0 %v8249_v22  ;;  %v8278_v22 = vld [vmem:[%s9172_s20 + $0x3a0] sm:$0xff]  }
 0x22f   : > { %7421 = vmatpush3.bf16.msra.mxu1 %v8250_v24  ;;  %v3140_v52 = vpop.f32.mrb[19].mxu0  ;;  %v3181_v45 = vpop.f32.mrb[19].mxu1  ;;  %7400 = vmatprep.subr.bf16.mxu0 %v8251_v31  ;;  %v8279_v24 = vld [vmem:[%s9172_s20 + $0x368] sm:$0xff]   ;;  %v9744_v31 = vld [vmem:[%s9167_s14 + $0x10] sm:$0xff]  ;;  %v1212_v40 = vrot.slane %v9639_v18, %v9449_v16 }
 0x230   : > { %7422 = vmatprep.subr.bf16.mxu1 %v8252_v38  ;;  %v8282_v38 = vld [vmem:[%s9172_s20 + $0x3a8] sm:$0xff]   ;;  %v1224_v52 = vrot.slane %v9744_v31, %v9430_v0 }
 0x231   : > { %v3095_v30 = vadd.f32 %v9649_v43, %v1212_v40  ;;  %v8292_v43 = vld [vmem:[%s9172_s20 + $0x4c0] sm:$0xff]   ;;  %v1220_v40 = vrot.slane %v9744_v31, %v9570_v7 }
 0x232   : > { %7401 = vmatpush3.bf16.msra.mxu0 %v8253_v39  ;;  %v8283_v39 = vld [vmem:[%s9172_s20 + $0x370] sm:$0xff]   ;;  %v3138_v56 = vadd.f32 %v9706_v44, %v1224_v52  ;;  %v8294_v44 = vld [vmem:[%s9172_s20 + $0x480] sm:$0xff]  }
 0x233   : > { %7423 = vmatpush3.bf16.msra.mxu1 %v8254_v41  ;;  %7402 = vmatprep.subr.bf16.mxu0 %v8255_v23  ;;  %v8285_v23 = vld [vmem:[%s9172_s20 + $0x330] sm:$0xff]  }
 0x234   : > { %7424 = vmatprep.subr.bf16.mxu1 %v8256_v46  ;;  %v1232_v46 = vrot.slane %v9744_v31, %v9446_v15  ;;  %v8315_v52 = vld [vmem:[%s9172_s20 + $0x470] sm:$0xff]  }
 0x236   : > { %7403 = vmatpush3.bf16.msra.mxu0 %v8257_v54  ;;  %v3054_v54 = vadd.f32 %v9647_v32, %v1204_v42  ;;  %v8289_v32 = vld [vmem:[%s9172_s20 + $0x338] sm:$0xff]   ;;  %v8313_v42 = vld [vmem:[%s9172_s20 + $0x428] sm:$0xff]  }
 0x237   : > { %7425 = vmatpush3.bf16.msra.mxu1 %v8258_v55  ;;  %7432 = vmatprep.subr.bf16.mxu0 %v8259_v25  ;;  %v8287_v25 = vld [vmem:[%s9172_s20 + $0x378] sm:$0xff]  }
 0x238   : > { %7454 = vmatprep.subr.bf16.mxu1 %v8260_v26  ;;  %v8288_v26 = vld [vmem:[%s9172_s20 + $0x3f8] sm:$0xff]   ;;  %v3523_v57 = vmax.f32 %v3054_v54, 0.0  ;;  %v8317_v54 = vld [vmem:[%s9172_s20 + $0x430] sm:$0xff]  }
 0x239   : > { %6081 = vmatmul.mubr.bf16.vlgmr.msra.gmra.mrb[44].mxu0 %v3556_v59  ;;  %v3528_v59 = vmax.f32 %v3138_v56, 0.0  ;;  %v3136_v56 = vadd.f32 %v9698_v13, %v1220_v40  ;;  %v8344_v40 = vld [vmem:[%s9172_s20 + $0x5e8] sm:$0xff]  }
 0x23a   : > { %6121 = vmatmul.mubr.bf16.vlgmr.msra.gmra.mrb[44].mxu1 %v3558_v60  ;;  %7433 = vmatpush3.bf16.msra.mxu0 %v8261_v20  ;;  %v3179_v20 = vadd.f32 %v9708_v47, %v1232_v46  ;;  %v3560_v47 = vpack.c.bf16 %v3523_v57, %v3523_v57  ;;  %v8318_v57 = vld [vmem:[%s9172_s20 + $0x4b0] sm:$0xff]  }
 0x23b   : > { %6160 = vmatprep.mubr.bf16.mxu0 %v3561_v61  ;;  %7455 = vmatpush3.bf16.msra.mxu1 %v8262_v58  ;;  %v8290_v58 = vld [vmem:[%s9172_s20 + $0x3b8] sm:$0xff]  }
 0x23c   : > { %6200 = vmatprep.mubr.bf16.mxu1 %v3563_v63  ;;  %7434 = vmatprep.subr.bf16.mxu0 %v8263_v34  ;;  %v3525_v34 = vmax.f32 %v3095_v30, 0.0  ;;  %v3530_v60 = vmax.f32 %v3179_v20, 0.0  ;;  %v3565_v63 = vpack.c.bf16 %v3528_v59, %v3528_v59 }
 0x23d   : > { %7456 = vmatprep.subr.bf16.mxu1 %v8264_v36  ;;  %v8293_v36 = vld [vmem:[%s9172_s20 + $0x400] sm:$0xff]  }
 0x23e   : > { %7435 = vmatpush3.bf16.msra.mxu0 %v8265_v48  ;;  %v8295_v48 = vld [vmem:[%s9172_s20 + $0x448] sm:$0xff]   ;;  %v3562_v61 = vpack.c.bf16 %v3525_v34, %v3525_v34 }
 0x23f   : > { %7457 = vmatpush3.bf16.msra.mxu1 %v8266_v62  ;;  %7436 = vmatprep.subr.bf16.mxu0 %v8267_v1  ;;  %v8296_v62 = vld [vmem:[%s9172_s20 + $0x4c8] sm:$0xff]  }
 0x240   : > { %7458 = vmatprep.subr.bf16.mxu1 %v8268_v2  ;;  %v8297_v1 = vld [vmem:[%s9172_s20 + $0x408] sm:$0xff]   ;;  %v3567_v2 = vpack.c.bf16 %v3530_v60, %v3530_v60  ;;  %v8323_v60 = vld [vmem:[%s9172_s20 + $0x540] sm:$0xff]  }
 0x242   : > { %7437 = vmatpush3.bf16.msra.mxu0 %v8269_v3  ;;  %v8298_v3 = vld [vmem:[%s9172_s20 + $0x488] sm:$0xff]  }
 0x243   : > { %7459 = vmatpush3.bf16.msra.mxu1 %v8270_v5  ;;  %7438 = vmatprep.subr.bf16.mxu0 %v8271_v6  ;;  %v8299_v5 = vld [vmem:[%s9172_s20 + $0x450] sm:$0xff]  }
 0x244   : > { %7460 = vmatprep.subr.bf16.mxu1 %v8272_v8  ;;  %v8300_v6 = vld [vmem:[%s9172_s20 + $0x4d0] sm:$0xff]  }
 0x245   : > { %v8301_v8 = vld [vmem:[%s9172_s20 + $0x410] sm:$0xff]  }
 0x246   : > { %7439 = vmatpush3.bf16.msra.mxu0 %v8273_v10  ;;  %v8302_v10 = vld [vmem:[%s9172_s20 + $0x490] sm:$0xff]  }
 0x247   : > { %7461 = vmatpush3.bf16.msra.mxu1 %v8274_v11  ;;  %7440 = vmatprep.subr.bf16.mxu0 %v8275_v14  ;;  %v8303_v11 = vld [vmem:[%s9172_s20 + $0x458] sm:$0xff]  }
 0x248   : > { %7462 = vmatprep.subr.bf16.mxu1 %v8276_v17  ;;  %v8304_v14 = vld [vmem:[%s9172_s20 + $0x4d8] sm:$0xff]  }
 0x249   : > { %v8305_v17 = vld [vmem:[%s9172_s20 + $0x418] sm:$0xff]  }
 0x24a   : > { %7441 = vmatpush3.bf16.msra.mxu0 %v8277_v21  ;;  %v8306_v21 = vld [vmem:[%s9172_s20 + $0x498] sm:$0xff]  }
 0x24b   : > { %7463 = vmatpush3.bf16.msra.mxu1 %v8278_v22  ;;  %7442 = vmatprep.subr.bf16.mxu0 %v8279_v24  ;;  %v8307_v22 = vld [vmem:[%s9172_s20 + $0x460] sm:$0xff]  }
 0x24c   : > { %v9754_v50 = vpop.f32.mrb[20].mxu0  ;;  %v9756_v51 = vpop.f32.mrb[20].mxu1  ;;  %7464 = vmatprep.subr.bf16.mxu1 %v8280_v27  ;;  %v8308_v24 = vld [vmem:[%s9172_s20 + $0x4e0] sm:$0xff]  }
 0x24d   : > { %v9760_v45 = vpop.f32.mrb[21].mxu0  ;;  %v9762_v41 = vpop.f32.mrb[21].mxu1  ;;  %v8309_v27 = vld [vmem:[%s9172_s20 + $0x420] sm:$0xff]  }
 0x24e   : > { %v3221_v18 = vpop.f32.mrb[22].mxu0  ;;  %v3262_v53 = vpop.f32.mrb[22].mxu1  ;;  %7443 = vmatpush3.bf16.msra.mxu0 %v8281_v33  ;;  %v8310_v33 = vld [vmem:[%s9172_s20 + $0x4a0] sm:$0xff]  }
 0x24f   : > { %7465 = vmatpush3.bf16.msra.mxu1 %v8282_v38  ;;  %v3222_v29 = vpop.f32.mrb[23].mxu0  ;;  %v3263_v55 = vpop.f32.mrb[23].mxu1  ;;  %7444 = vmatprep.subr.bf16.mxu0 %v8283_v39  ;;  %v8311_v38 = vld [vmem:[%s9172_s20 + $0x468] sm:$0xff]   ;;  %v8316_v53 = vld [vmem:[%s9172_s20 + $0x4f0] sm:$0xff]  }
 0x250   : > { %7466 = vmatprep.subr.bf16.mxu1 %v8284_v49  ;;  %v8312_v39 = vld [vmem:[%s9172_s20 + $0x4e8] sm:$0xff]   ;;  %v1240_v29 = vrot.slane %v9744_v31, %v9578_v35 }
 0x251   : > { %v8314_v49 = vld [vmem:[%s9172_s20 + $0x4a8] sm:$0xff]  }
 0x252   : > { %7445 = vmatpush3.bf16.msra.mxu0 %v8285_v23  ;;  %v1228_v23 = vrot.slane %v9744_v31, %v9574_v9  ;;  %v3220_v59 = vadd.f32 %v9760_v45, %v1240_v29  ;;  %v8327_v45 = vld [vmem:[%s9172_s20 + $0x548] sm:$0xff]   ;;  %v1236_v29 = vrot.slane %v9744_v31, %v9635_v4 }
 0x253   : > { %7467 = vmatpush3.bf16.msra.mxu1 %v8286_v19  ;;  %7446 = vmatprep.subr.bf16.mxu0 %v8287_v25  ;;  %v1248_v25 = vrot.slane %v9744_v31, %v9582_v12 }
 0x254   : > { %7468 = vmatprep.subr.bf16.mxu1 %v8288_v26  ;;  %v3177_v34 = vadd.f32 %v9700_v37, %v1228_v23  ;;  %v8325_v37 = vld [vmem:[%s9172_s20 + $0x500] sm:$0xff]   ;;  %v8345_v23 = vld [vmem:[%s9172_s20 + $0x528] sm:$0xff]  }
 0x255   : > { %v3261_v13 = vadd.f32 %v9762_v41, %v1248_v25  ;;  %v8328_v41 = vld [vmem:[%s9172_s20 + $0x5c8] sm:$0xff]   ;;  %v8348_v25 = vld [vmem:[%s9172_s20 + $0x5f0] sm:$0xff]  }
 0x256   : > { %7447 = vmatpush3.bf16.msra.mxu0 %v8289_v32 }
 0x257   : > { %7469 = vmatpush3.bf16.msra.mxu1 %v8290_v58  ;;  %7476 = vmatprep.subr.bf16.mxu0 %v8291_v28  ;;  %v8319_v58 = vld [vmem:[%s9172_s20 + $0x478] sm:$0xff]  }
 0x258   : > { %7498 = vmatprep.subr.bf16.mxu1 %v8292_v43  ;;  %v8320_v28 = vld [vmem:[%s9172_s20 + $0x4f8] sm:$0xff]  }
 0x259   : > { %6161 = vmatmul.mubr.bf16.vlgmr.msra.gmra.mrb[48].mxu0 %v3560_v47  ;;  %v8321_v43 = vld [vmem:[%s9172_s20 + $0x438] sm:$0xff]   ;;  %v8324_v47 = vld [vmem:[%s9172_s20 + $0x5c0] sm:$0xff]  }
 0x25a   : > { %6201 = vmatmul.mubr.bf16.vlgmr.msra.gmra.mrb[48].mxu1 %v3562_v61  ;;  %7477 = vmatpush3.bf16.msra.mxu0 %v8293_v36  ;;  %v8322_v36 = vld [vmem:[%s9172_s20 + $0x4b8] sm:$0xff]   ;;  %v3532_v61 = vmax.f32 %v3220_v59, 0.0 }
 0x25b   : > { %6240 = vmatprep.mubr.bf16.mxu0 %v3565_v63  ;;  %7499 = vmatpush3.bf16.msra.mxu1 %v8294_v44  ;;  %v3527_v44 = vmax.f32 %v3136_v56, 0.0  ;;  %v3534_v63 = vmax.f32 %v3261_v13, 0.0  ;;  %v8350_v13 = vld [vmem:[%s9172_s20 + $0x5b0] sm:$0xff]  }
 0x25c   : > { %6280 = vmatprep.mubr.bf16.mxu1 %v3567_v2  ;;  %7478 = vmatprep.subr.bf16.mxu0 %v8295_v48  ;;  %v3529_v48 = vmax.f32 %v3177_v34, 0.0 }
 0x25d   : > { %7500 = vmatprep.subr.bf16.mxu1 %v8296_v62  ;;  %v8326_v62 = vld [vmem:[%s9172_s20 + $0x580] sm:$0xff]  }
 0x25e   : > { %7479 = vmatpush3.bf16.msra.mxu0 %v8297_v1  ;;  %v3564_v1 = vpack.c.bf16 %v3527_v44, %v3527_v44  ;;  %v3566_v2 = vpack.c.bf16 %v3529_v48, %v3529_v48  ;;  %v8353_v48 = vld [vmem:[%s9172_s20 + $0x538] sm:$0xff]  }
 0x25f   : > { %7501 = vmatpush3.bf16.msra.mxu1 %v8298_v3  ;;  %7480 = vmatprep.subr.bf16.mxu0 %v8299_v5  ;;  %v8329_v3 = vld [vmem:[%s9172_s20 + $0x508] sm:$0xff]   ;;  %v3569_v5 = vpack.c.bf16 %v3532_v61, %v3532_v61 }
 0x260   : > { %7502 = vmatprep.subr.bf16.mxu1 %v8300_v6  ;;  %v8330_v6 = vld [vmem:[%s9172_s20 + $0x588] sm:$0xff]  }
 0x262   : > { %7481 = vmatpush3.bf16.msra.mxu0 %v8301_v8  ;;  %v3571_v8 = vpack.c.bf16 %v3534_v63, %v3534_v63  ;;  %v8355_v63 = vld [vmem:[%s9172_s20 + $0x640] sm:$0xff]  }
 0x263   : > { %7503 = vmatpush3.bf16.msra.mxu1 %v8302_v10  ;;  %7482 = vmatprep.subr.bf16.mxu0 %v8303_v11  ;;  %v8331_v10 = vld [vmem:[%s9172_s20 + $0x550] sm:$0xff]  }
 0x264   : > { %7504 = vmatprep.subr.bf16.mxu1 %v8304_v14  ;;  %v8332_v11 = vld [vmem:[%s9172_s20 + $0x5d0] sm:$0xff]  }
 0x265   : > { %v8333_v14 = vld [vmem:[%s9172_s20 + $0x510] sm:$0xff]  }
 0x266   : > { %7483 = vmatpush3.bf16.msra.mxu0 %v8305_v17  ;;  %v8334_v17 = vld [vmem:[%s9172_s20 + $0x590] sm:$0xff]  }
 0x267   : > { %7505 = vmatpush3.bf16.msra.mxu1 %v8306_v21  ;;  %7484 = vmatprep.subr.bf16.mxu0 %v8307_v22  ;;  %v8335_v21 = vld [vmem:[%s9172_s20 + $0x558] sm:$0xff]  }
 0x268   : > { %7506 = vmatprep.subr.bf16.mxu1 %v8308_v24  ;;  %v8336_v22 = vld [vmem:[%s9172_s20 + $0x5d8] sm:$0xff]  }
 0x269   : > { %v8337_v24 = vld [vmem:[%s9172_s20 + $0x518] sm:$0xff]  }
 0x26a   : > { %7485 = vmatpush3.bf16.msra.mxu0 %v8309_v27  ;;  %v8338_v27 = vld [vmem:[%s9172_s20 + $0x598] sm:$0xff]  }
 0x26b   : > { %7507 = vmatpush3.bf16.msra.mxu1 %v8310_v33  ;;  %7486 = vmatprep.subr.bf16.mxu0 %v8311_v38  ;;  %v8339_v33 = vld [vmem:[%s9172_s20 + $0x560] sm:$0xff]  }
 0x26c   : > { %v9805_v46 = vpop.f32.mrb[24].mxu0  ;;  %v9807_v18 = vpop.f32.mrb[24].mxu1  ;;  %7508 = vmatprep.subr.bf16.mxu1 %v8312_v39  ;;  %v8340_v38 = vld [vmem:[%s9172_s20 + $0x5e0] sm:$0xff]  }
 0x26d   : > { %v9813_v55 = vpop.f32.mrb[25].mxu0  ;;  %v9815_v19 = vpop.f32.mrb[25].mxu1  ;;  %v8341_v39 = vld [vmem:[%s9172_s20 + $0x520] sm:$0xff]  }
 0x26e   : > { %v3303_v30 = vpop.f32.mrb[26].mxu0  ;;  %v3344_v26 = vpop.f32.mrb[26].mxu1  ;;  %7487 = vmatpush3.bf16.msra.mxu0 %v8313_v42  ;;  %v8342_v42 = vld [vmem:[%s9172_s20 + $0x5a0] sm:$0xff]  }
 0x26f   : > { %7509 = vmatpush3.bf16.msra.mxu1 %v8314_v49  ;;  %v3304_v20 = vpop.f32.mrb[27].mxu0  ;;  %v3345_v32 = vpop.f32.mrb[27].mxu1  ;;  %7488 = vmatprep.subr.bf16.mxu0 %v8315_v52  ;;  %v8343_v49 = vld [vmem:[%s9172_s20 + $0x568] sm:$0xff]   ;;  %v9851_v52 = vld [vmem:[%s9167_s14 + $0x18] sm:$0xff]  ;;  %v1244_v30 = vrot.slane %v9744_v31, %v9449_v16 }
 0x270   : > { %7510 = vmatprep.subr.bf16.mxu1 %v8316_v53  ;;  %v8346_v53 = vld [vmem:[%s9172_s20 + $0x5a8] sm:$0xff]   ;;  %v1256_v20 = vrot.slane %v9851_v52, %v9430_v0  ;;  %v1264_v31 = vrot.slane %v9851_v52, %v9446_v15 }
 0x271   : > { %v3259_v44 = vadd.f32 %v9756_v51, %v1244_v30  ;;  %v8356_v51 = vld [vmem:[%s9172_s20 + $0x6c0] sm:$0xff]   ;;  %v8378_v30 = vld [vmem:[%s9172_s20 + $0x6a8] sm:$0xff]  }
 0x272   : > { %7489 = vmatpush3.bf16.msra.mxu0 %v8317_v54  ;;  %v8347_v54 = vld [vmem:[%s9172_s20 + $0x570] sm:$0xff]   ;;  %v3343_v61 = vadd.f32 %v9815_v19, %v1264_v31  ;;  %v8359_v19 = vld [vmem:[%s9172_s20 + $0x648] sm:$0xff]  }
 0x273   : > { %7511 = vmatpush3.bf16.msra.mxu1 %v8318_v57  ;;  %7490 = vmatprep.subr.bf16.mxu0 %v8319_v58  ;;  %v8349_v58 = vld [vmem:[%s9172_s20 + $0x530] sm:$0xff]  }
 0x274   : > { %7512 = vmatprep.subr.bf16.mxu1 %v8320_v28 }
 0x276   : > { %7491 = vmatpush3.bf16.msra.mxu0 %v8321_v43  ;;  %v3218_v43 = vadd.f32 %v9754_v50, %v1236_v29  ;;  %v8354_v50 = vld [vmem:[%s9172_s20 + $0x5b8] sm:$0xff]   ;;  %v8377_v29 = vld [vmem:[%s9172_s20 + $0x628] sm:$0xff]  }
 0x277   : > { %7513 = vmatpush3.bf16.msra.mxu1 %v8322_v36  ;;  %7520 = vmatprep.subr.bf16.mxu0 %v8323_v60  ;;  %v8351_v60 = vld [vmem:[%s9172_s20 + $0x578] sm:$0xff]  }
 0x278   : > { %7542 = vmatprep.subr.bf16.mxu1 %v8324_v47  ;;  %v8352_v47 = vld [vmem:[%s9172_s20 + $0x5f8] sm:$0xff]  }
 0x279   : > { %6241 = vmatmul.mubr.bf16.vlgmr.msra.gmra.mrb[52].mxu0 %v3564_v1 }
 0x27a   : > { %6281 = vmatmul.mubr.bf16.vlgmr.msra.gmra.mrb[52].mxu1 %v3566_v2  ;;  %7521 = vmatpush3.bf16.msra.mxu0 %v8325_v37  ;;  %v3302_v37 = vadd.f32 %v9813_v55, %v1256_v20  ;;  %v3538_v2 = vmax.f32 %v3343_v61, 0.0  ;;  %v8358_v55 = vld [vmem:[%s9172_s20 + $0x680] sm:$0xff]   ;;  %v8379_v20 = vld [vmem:[%s9172_s20 + $0x670] sm:$0xff]  }
 0x27b   : > { %6320 = vmatprep.mubr.bf16.mxu0 %v3569_v5  ;;  %7543 = vmatpush3.bf16.msra.mxu1 %v8326_v62  ;;  %v3531_v62 = vmax.f32 %v3218_v43, 0.0  ;;  %v1272_v43 = vrot.slane %v9851_v52, %v9578_v35  ;;  %v8382_v61 = vld [vmem:[%s9172_s20 + $0x6b0] sm:$0xff]  }
 0x27c   : > { %6360 = vmatprep.mubr.bf16.mxu1 %v3571_v8  ;;  %7522 = vmatprep.subr.bf16.mxu0 %v8327_v45  ;;  %v3533_v45 = vmax.f32 %v3259_v44, 0.0  ;;  %v3536_v1 = vmax.f32 %v3302_v37, 0.0 }
 0x27d   : > { %7544 = vmatprep.subr.bf16.mxu1 %v8328_v41  ;;  %v8357_v41 = vld [vmem:[%s9172_s20 + $0x600] sm:$0xff]  }
 0x27e   : > { %7523 = vmatpush3.bf16.msra.mxu0 %v8329_v3  ;;  %v3568_v3 = vpack.c.bf16 %v3531_v62, %v3531_v62  ;;  %v3570_v5 = vpack.c.bf16 %v3533_v45, %v3533_v45  ;;  %v3573_v8 = vpack.c.bf16 %v3536_v1, %v3536_v1  ;;  %v8386_v1 = vld [vmem:[%s9172_s20 + $0x6b8] sm:$0xff]  }
 0x27f   : > { %7545 = vmatpush3.bf16.msra.mxu1 %v8330_v6  ;;  %7524 = vmatprep.subr.bf16.mxu0 %v8331_v10  ;;  %v8360_v6 = vld [vmem:[%s9172_s20 + $0x6c8] sm:$0xff]  }
 0x280   : > { %7546 = vmatprep.subr.bf16.mxu1 %v8332_v11  ;;  %v8361_v10 = vld [vmem:[%s9172_s20 + $0x608] sm:$0xff]   ;;  %v3575_v11 = vpack.c.bf16 %v3538_v2, %v3538_v2 }
 0x282   : > { %7525 = vmatpush3.bf16.msra.mxu0 %v8333_v14  ;;  %v8362_v14 = vld [vmem:[%s9172_s20 + $0x688] sm:$0xff]  }
 0x283   : > { %7547 = vmatpush3.bf16.msra.mxu1 %v8334_v17  ;;  %7526 = vmatprep.subr.bf16.mxu0 %v8335_v21  ;;  %v8363_v17 = vld [vmem:[%s9172_s20 + $0x650] sm:$0xff]  }
 0x284   : > { %7548 = vmatprep.subr.bf16.mxu1 %v8336_v22  ;;  %v8364_v21 = vld [vmem:[%s9172_s20 + $0x6d0] sm:$0xff]  }
 0x285   : > { %v8365_v22 = vld [vmem:[%s9172_s20 + $0x610] sm:$0xff]  }
 0x286   : > { %7527 = vmatpush3.bf16.msra.mxu0 %v8337_v24  ;;  %v8366_v24 = vld [vmem:[%s9172_s20 + $0x690] sm:$0xff]  }
 0x287   : > { %7549 = vmatpush3.bf16.msra.mxu1 %v8338_v27  ;;  %7528 = vmatprep.subr.bf16.mxu0 %v8339_v33  ;;  %v8367_v27 = vld [vmem:[%s9172_s20 + $0x658] sm:$0xff]  }
 0x288   : > { %7550 = vmatprep.subr.bf16.mxu1 %v8340_v38  ;;  %v8368_v33 = vld [vmem:[%s9172_s20 + $0x6d8] sm:$0xff]  }
 0x289   : > { %v8369_v38 = vld [vmem:[%s9172_s20 + $0x618] sm:$0xff]  }
 0x28a   : > { %7529 = vmatpush3.bf16.msra.mxu0 %v8341_v39  ;;  %v8370_v39 = vld [vmem:[%s9172_s20 + $0x698] sm:$0xff]  }
 0x28b   : > { %7551 = vmatpush3.bf16.msra.mxu1 %v8342_v42  ;;  %7530 = vmatprep.subr.bf16.mxu0 %v8343_v49  ;;  %v8371_v42 = vld [vmem:[%s9172_s20 + $0x660] sm:$0xff]  }
 0x28c   : > { %v9861_v26 = vpop.f32.mrb[28].mxu0  ;;  %v9863_v56 = vpop.f32.mrb[28].mxu1  ;;  %7552 = vmatprep.subr.bf16.mxu1 %v8344_v40  ;;  %v8372_v49 = vld [vmem:[%s9172_s20 + $0x6e0] sm:$0xff]  }
 0x28d   : > { %v9867_v32 = vpop.f32.mrb[29].mxu0  ;;  %v9869_v57 = vpop.f32.mrb[29].mxu1  ;;  %v8373_v40 = vld [vmem:[%s9172_s20 + $0x620] sm:$0xff]  }
 0x28e   : > { %v3385_v28 = vpop.f32.mrb[30].mxu0  ;;  %v3426_v34 = vpop.f32.mrb[30].mxu1  ;;  %7531 = vmatpush3.bf16.msra.mxu0 %v8345_v23  ;;  %v8374_v23 = vld [vmem:[%s9172_s20 + $0x6a0] sm:$0xff]  }
 0x28f   : > { %7553 = vmatpush3.bf16.msra.mxu1 %v8346_v53  ;;  %v3386_v59 = vpop.f32.mrb[31].mxu0  ;;  %v3427_v36 = vpop.f32.mrb[31].mxu1  ;;  %7532 = vmatprep.subr.bf16.mxu0 %v8347_v54  ;;  %v8375_v53 = vld [vmem:[%s9172_s20 + $0x668] sm:$0xff]   ;;  %v8380_v34 = vld [vmem:[%s9172_s20 + $0x6f0] sm:$0xff]  }
 0x290   : > { %7554 = vmatprep.subr.bf16.mxu1 %v8348_v25  ;;  %v8376_v54 = vld [vmem:[%s9172_s20 + $0x6e8] sm:$0xff]   ;;  %v1252_v25 = vrot.slane %v9851_v52, %v9570_v7 }
 0x292   : > { %7533 = vmatpush3.bf16.msra.mxu0 %v8349_v58  ;;  %v1260_v58 = vrot.slane %v9851_v52, %v9574_v9 }
 0x293   : > { %7555 = vmatpush3.bf16.msra.mxu1 %v8350_v13  ;;  %7534 = vmatprep.subr.bf16.mxu0 %v8351_v60  ;;  %v1280_v13 = vrot.slane %v9851_v52, %v9582_v12  ;;  %v8384_v12 = vld [vmem:[%s9172_s20 + $0x6f8] sm:$0xff]  }
 0x294   : > { %7556 = vmatprep.subr.bf16.mxu1 %v8352_v47  ;;  %v8381_v47 = vld [vmem:[%s9172_s20 + $0x630] sm:$0xff]   ;;  %v3341_v62 = vadd.f32 %v9807_v18, %v1260_v58  ;;  %v8388_v18 = vld [vmem:[%s9172_s20 + $0x7c0] sm:$0xff]   ;;  %v8410_v58 = vld [vmem:[%s9172_s20 + $0x7a8] sm:$0xff]  }
 0x295   : > { %v3425_v45 = vadd.f32 %v9869_v57, %v1280_v13  ;;  %v8390_v57 = vld [vmem:[%s9172_s20 + $0x780] sm:$0xff]  }
 0x296   : > { %7535 = vmatpush3.bf16.msra.mxu0 %v8353_v48  ;;  %v3300_v48 = vadd.f32 %v9805_v46, %v1252_v25  ;;  %v8385_v46 = vld [vmem:[%s9172_s20 + $0x638] sm:$0xff]   ;;  %v3537_v2 = vmax.f32 %v3341_v62, 0.0  ;;  %v9958_v25 = vld [vmem:[%s9167_s14 + $0x20] sm:$0xf] }
 0x297   : > { %7557 = vmatpush3.bf16.msra.mxu1 %v8354_v50  ;;  %7564 = vmatprep.subr.bf16.mxu0 %v8355_v63  ;;  %v8383_v50 = vld [vmem:[%s9172_s20 + $0x678] sm:$0xff]   ;;  %v3384_v63 = vadd.f32 %v9867_v32, %v1272_v43  ;;  %v8389_v32 = vld [vmem:[%s9172_s20 + $0x700] sm:$0xff]   ;;  %v1276_v43 = vrot.slane %v9851_v52, %v9449_v16 }
 0x298   : > { %7586 = vmatprep.subr.bf16.mxu1 %v8356_v51  ;;  %v3535_v51 = vmax.f32 %v3300_v48, 0.0 }
 0x299   : > { %6321 = vmatmul.mubr.bf16.vlgmr.msra.gmra.mrb[56].mxu0 %v3568_v3  ;;  %v3542_v3 = vmax.f32 %v3425_v45, 0.0 }
 0x29a   : > { %6361 = vmatmul.mubr.bf16.vlgmr.msra.gmra.mrb[56].mxu1 %v3570_v5  ;;  %7565 = vmatpush3.bf16.msra.mxu0 %v8357_v41  ;;  %v8387_v41 = vld [vmem:[%s9172_s20 + $0x740] sm:$0xff]   ;;  %v3574_v5 = vpack.c.bf16 %v3537_v2, %v3537_v2 }
 0x29b   : > { %6400 = vmatprep.mubr.bf16.mxu0 %v3573_v8  ;;  %7587 = vmatpush3.bf16.msra.mxu1 %v8358_v55  ;;  %v3540_v55 = vmax.f32 %v3384_v63, 0.0  ;;  %v8415_v63 = vld [vmem:[%s9172_s20 + $0x778] sm:$0xff]  }
 0x29c   : > { %6440 = vmatprep.mubr.bf16.mxu1 %v3575_v11  ;;  %7566 = vmatprep.subr.bf16.mxu0 %v8359_v19  ;;  %v3572_v19 = vpack.c.bf16 %v3535_v51, %v3535_v51  ;;  %v3579_v11 = vpack.c.bf16 %v3542_v3, %v3542_v3  ;;  %v8420_v3 = vld [vmem:[%s9172_s20 + $0x8c0] sm:$0xff]  }
 0x29d   : > { %7588 = vmatprep.subr.bf16.mxu1 %v8360_v6  ;;  %v8391_v6 = vld [vmem:[%s9172_s20 + $0x748] sm:$0xff]   ;;  %v3577_v8 = vpack.c.bf16 %v3540_v55, %v3540_v55 }
 0x29e   : > { %7567 = vmatpush3.bf16.msra.mxu0 %v8361_v10  ;;  %v8392_v10 = vld [vmem:[%s9172_s20 + $0x7c8] sm:$0xff]  }
 0x29f   : > { %7589 = vmatpush3.bf16.msra.mxu1 %v8362_v14  ;;  %7568 = vmatprep.subr.bf16.mxu0 %v8363_v17  ;;  %v8393_v14 = vld [vmem:[%s9172_s20 + $0x708] sm:$0xff]  }
 0x2a0   : > { %7590 = vmatprep.subr.bf16.mxu1 %v8364_v21  ;;  %v8394_v17 = vld [vmem:[%s9172_s20 + $0x788] sm:$0xff]   ;;  %v8395_v21 = vld [vmem:[%s9172_s20 + $0x750] sm:$0xff]  }
 0x2a2   : > { %7569 = vmatpush3.bf16.msra.mxu0 %v8365_v22  ;;  %v8396_v22 = vld [vmem:[%s9172_s20 + $0x7d0] sm:$0xff]  }
 0x2a3   : > { %7591 = vmatpush3.bf16.msra.mxu1 %v8366_v24  ;;  %7570 = vmatprep.subr.bf16.mxu0 %v8367_v27  ;;  %v8397_v24 = vld [vmem:[%s9172_s20 + $0x710] sm:$0xff]  }
 0x2a4   : > { %7592 = vmatprep.subr.bf16.mxu1 %v8368_v33  ;;  %v8398_v27 = vld [vmem:[%s9172_s20 + $0x790] sm:$0xff]   ;;  %v8399_v33 = vld [vmem:[%s9172_s20 + $0x758] sm:$0xff]  }
 0x2a6   : > { %7571 = vmatpush3.bf16.msra.mxu0 %v8369_v38  ;;  %v8400_v38 = vld [vmem:[%s9172_s20 + $0x7d8] sm:$0xff]  }
 0x2a7   : > { %7593 = vmatpush3.bf16.msra.mxu1 %v8370_v39  ;;  %7572 = vmatprep.subr.bf16.mxu0 %v8371_v42  ;;  %v8401_v39 = vld [vmem:[%s9172_s20 + $0x718] sm:$0xff]  }
 0x2a8   : > { %7594 = vmatprep.subr.bf16.mxu1 %v8372_v49  ;;  %v8402_v42 = vld [vmem:[%s9172_s20 + $0x798] sm:$0xff]   ;;  %v8403_v49 = vld [vmem:[%s9172_s20 + $0x760] sm:$0xff]  }
 0x2aa   : > { %7573 = vmatpush3.bf16.msra.mxu0 %v8373_v40  ;;  %v8404_v40 = vld [vmem:[%s9172_s20 + $0x7e0] sm:$0xff]  }
 0x2ab   : > { %7595 = vmatpush3.bf16.msra.mxu1 %v8374_v23  ;;  %7574 = vmatprep.subr.bf16.mxu0 %v8375_v53  ;;  %v8405_v23 = vld [vmem:[%s9172_s20 + $0x720] sm:$0xff]  }
 0x2ac   : > { %v9912_v31 = vpop.f32.mrb[32].mxu0  ;;  %v9914_v28 = vpop.f32.mrb[32].mxu1  ;;  %7596 = vmatprep.subr.bf16.mxu1 %v8376_v54  ;;  %v8406_v53 = vld [vmem:[%s9172_s20 + $0x7a0] sm:$0xff]   ;;  %v8407_v54 = vld [vmem:[%s9172_s20 + $0x768] sm:$0xff]  }
 0x2ad   : > { %v9919_v59 = vpop.f32.mrb[33].mxu0  ;;  %v9921_v36 = vpop.f32.mrb[33].mxu1 }
 0x2ae   : > { %v3467_v60 = vpop.f32.mrb[34].mxu0  ;;  %v3508_v44 = vpop.f32.mrb[34].mxu1  ;;  %7575 = vmatpush3.bf16.msra.mxu0 %v8377_v29  ;;  %v8408_v29 = vld [vmem:[%s9172_s20 + $0x7e8] sm:$0xff]  }
 0x2af   : > { %7597 = vmatpush3.bf16.msra.mxu1 %v8378_v30  ;;  %v3468_v37 = vpop.f32.mrb[35].mxu0  ;;  %v3509_v35 = vpop.f32.mrb[35].mxu1  ;;  %7576 = vmatprep.subr.bf16.mxu0 %v8379_v20  ;;  %v8409_v30 = vld [vmem:[%s9172_s20 + $0x728] sm:$0xff]   ;;  %v1268_v20 = vrot.slane %v9851_v52, %v9635_v4  ;;  %v8412_v60 = vld [vmem:[%s9172_s20 + $0x7f0] sm:$0xff]   ;;  %v1288_v44 = vrot.slane %v9958_v25, %v9430_v0  ;;  %v1296_v4 = vrot.slane %v9958_v25, %v9446_v15 }
 0x2b0   : > { %7598 = vmatprep.subr.bf16.mxu1 %v8380_v34  ;;  %v8411_v34 = vld [vmem:[%s9172_s20 + $0x770] sm:$0xff]   ;;  %v3423_v15 = vadd.f32 %v9863_v56, %v1276_v43  ;;  %v8419_v56 = vld [vmem:[%s9172_s20 + $0x840] sm:$0xff]   ;;  %v1292_v43 = vrot.slane %v9958_v25, %v9574_v9 }
 0x2b1   : > { %v3382_v16 = vadd.f32 %v9861_v26, %v1268_v20  ;;  %v8414_v0 = vld [vmem:[%s9172_s20 + $0x7b0] sm:$0xff]   ;;  %v3466_v51 = vadd.f32 %v9919_v59, %v1288_v44  ;;  %v1284_v20 = vrot.slane %v9958_v25, %v9570_v7 }
 0x2b2   : > { %7577 = vmatpush3.bf16.msra.mxu0 %v8381_v47  ;;  %v3541_v55 = vmax.f32 %v3423_v15, 0.0  ;;  %v8445_v7 = vld [vmem:[%s9172_s20 + $0x830] sm:$0xff]   ;;  %v8449_v15 = vld [vmem:[%s9172_s20 + $0x838] sm:$0xff]  }
 0x2b3   : > { %7599 = vmatpush3.bf16.msra.mxu1 %v8382_v61  ;;  %7578 = vmatprep.subr.bf16.mxu0 %v8383_v50  ;;  %v8413_v50 = vld [vmem:[%s9172_s20 + $0x730] sm:$0xff]   ;;  %v3539_v2 = vmax.f32 %v3382_v16, 0.0  ;;  %v8447_v16 = vld [vmem:[%s9172_s20 + $0x878] sm:$0xff]  }
 0x2b4   : > { %7600 = vmatprep.subr.bf16.mxu1 %v8384_v12  ;;  %v8446_v25 = vld [vmem:[%s9172_s20 + $0x8b0] sm:$0xff]  }
 0x2b6   : > { %7579 = vmatpush3.bf16.msra.mxu0 %v8385_v46  ;;  %v8416_v46 = vld [vmem:[%s9172_s20 + $0x7f8] sm:$0xff]  }
 0x2b7   : > { %7601 = vmatpush3.bf16.msra.mxu1 %v8386_v1  ;;  %7608 = vmatprep.subr.bf16.mxu0 %v8387_v41  ;;  %v3507_v1 = vadd.f32 %v9921_v36, %v1296_v4  ;;  %v8417_v41 = vld [vmem:[%s9172_s20 + $0x738] sm:$0xff]   ;;  %v8422_v36 = vld [vmem:[%s9172_s20 + $0x880] sm:$0xff]  }
 0x2b8   : > { %7630 = vmatprep.subr.bf16.mxu1 %v8388_v18  ;;  %v8418_v18 = vld [vmem:[%s9172_s20 + $0x7b8] sm:$0xff]  }
 0x2b9   : > { %6401 = vmatmul.mubr.bf16.vlgmr.msra.gmra.mrb[60].mxu0 %v3572_v19  ;;  %v3546_v59 = vmax.f32 %v3507_v1, 0.0  ;;  %v8421_v19 = vld [vmem:[%s9172_s20 + $0x800] sm:$0xff]  }
 0x2ba   : > { %6441 = vmatmul.mubr.bf16.vlgmr.msra.gmra.mrb[60].mxu1 %v3574_v5  ;;  %7609 = vmatpush3.bf16.msra.mxu0 %v8389_v32  ;;  %v3544_v32 = vmax.f32 %v3466_v51, 0.0  ;;  %v3578_v5 = vpack.c.bf16 %v3541_v55, %v3541_v55 }
 0x2bb   : > { %6480 = vmatprep.mubr.bf16.mxu0 %v3577_v8  ;;  %7631 = vmatpush3.bf16.msra.mxu1 %v8390_v57  ;;  %v3576_v57 = vpack.c.bf16 %v3539_v2, %v3539_v2 }
 0x2bc   : > { %6520 = vmatprep.mubr.bf16.mxu1 %v3579_v11  ;;  %7610 = vmatprep.subr.bf16.mxu0 %v8391_v6  ;;  %v8423_v6 = vld [vmem:[%s9172_s20 + $0x848] sm:$0xff]   ;;  %v3581_v8 = vpack.c.bf16 %v3544_v32, %v3544_v32  ;;  %v3583_v11 = vpack.c.bf16 %v3546_v59, %v3546_v59 }
 0x2bd   : > { %7632 = vmatprep.subr.bf16.mxu1 %v8392_v10  ;;  %v8424_v10 = vld [vmem:[%s9172_s20 + $0x8c8] sm:$0xff]  }
 0x2be   : > { %7611 = vmatpush3.bf16.msra.mxu0 %v8393_v14  ;;  %v8425_v14 = vld [vmem:[%s9172_s20 + $0x808] sm:$0xff]  }
 0x2bf   : > { %7633 = vmatpush3.bf16.msra.mxu1 %v8394_v17  ;;  %7612 = vmatprep.subr.bf16.mxu0 %v8395_v21  ;;  %v8426_v17 = vld [vmem:[%s9172_s20 + $0x888] sm:$0xff]   ;;  %v8427_v21 = vld [vmem:[%s9172_s20 + $0x850] sm:$0xff]  }
 0x2c0   : > { %7634 = vmatprep.subr.bf16.mxu1 %v8396_v22  ;;  %v8428_v22 = vld [vmem:[%s9172_s20 + $0x8d0] sm:$0xff]  }
 0x2c2   : > { %7613 = vmatpush3.bf16.msra.mxu0 %v8397_v24  ;;  %v8429_v24 = vld [vmem:[%s9172_s20 + $0x810] sm:$0xff]  }
 0x2c3   : > { %7635 = vmatpush3.bf16.msra.mxu1 %v8398_v27  ;;  %7614 = vmatprep.subr.bf16.mxu0 %v8399_v33  ;;  %v8430_v27 = vld [vmem:[%s9172_s20 + $0x890] sm:$0xff]   ;;  %v8431_v33 = vld [vmem:[%s9172_s20 + $0x858] sm:$0xff]  }
 0x2c4   : > { %7636 = vmatprep.subr.bf16.mxu1 %v8400_v38  ;;  %v8432_v38 = vld [vmem:[%s9172_s20 + $0x8d8] sm:$0xff]  }
 0x2c6   : > { %7615 = vmatpush3.bf16.msra.mxu0 %v8401_v39  ;;  %v8433_v39 = vld [vmem:[%s9172_s20 + $0x818] sm:$0xff]  }
 0x2c7   : > { %7637 = vmatpush3.bf16.msra.mxu1 %v8402_v42  ;;  %7616 = vmatprep.subr.bf16.mxu0 %v8403_v49  ;;  %v8434_v42 = vld [vmem:[%s9172_s20 + $0x898] sm:$0xff]   ;;  %v8435_v49 = vld [vmem:[%s9172_s20 + $0x860] sm:$0xff]  }
 0x2c8   : > { %7638 = vmatprep.subr.bf16.mxu1 %v8404_v40  ;;  %v8436_v40 = vld [vmem:[%s9172_s20 + $0x8e0] sm:$0xff]  }
 0x2ca   : > { %7617 = vmatpush3.bf16.msra.mxu0 %v8405_v23  ;;  %v8437_v23 = vld [vmem:[%s9172_s20 + $0x820] sm:$0xff]  }
 0x2cb   : > { %7639 = vmatpush3.bf16.msra.mxu1 %v8406_v53  ;;  %7618 = vmatprep.subr.bf16.mxu0 %v8407_v54  ;;  %v8438_v53 = vld [vmem:[%s9172_s20 + $0x8a0] sm:$0xff]   ;;  %v8439_v54 = vld [vmem:[%s9172_s20 + $0x868] sm:$0xff]  }
 0x2cc   : > { %v7316_v13 = vpop.f32.mrb[36].mxu0  ;;  %7640 = vmatprep.subr.bf16.mxu1 %v8408_v29  ;;  %v8440_v29 = vld [vmem:[%s9172_s20 + $0x8e8] sm:$0xff]  }
 0x2cd   : > { %v7338_v47 = vpop.f32.mrb[36].mxu1  ;;  %v7317_v48 = vpop.f32.mrb[37].mxu0 }
 0x2ce   : > { %v7318_v37 = vadd.f32 %v7317_v48, %v7316_v13  ;;  %v7339_v35 = vpop.f32.mrb[37].mxu1  ;;  %v7319_v61 = vpop.f32.mrb[38].mxu0  ;;  %7619 = vmatpush3.bf16.msra.mxu0 %v8409_v30  ;;  %v8441_v30 = vld [vmem:[%s9172_s20 + $0x828] sm:$0xff]  }
 0x2cf   : > { %v7340_v52 = vadd.f32 %v7339_v35, %v7338_v47  ;;  %v7341_v62 = vpop.f32.mrb[38].mxu1  ;;  %7641 = vmatpush3.bf16.msra.mxu1 %v8410_v58  ;;  %v7320_v12 = vpop.f32.mrb[39].mxu0  ;;  %7620 = vmatprep.subr.bf16.mxu0 %v8411_v34  ;;  %v8442_v58 = vld [vmem:[%s9172_s20 + $0x8a8] sm:$0xff]   ;;  %v8443_v34 = vld [vmem:[%s9172_s20 + $0x870] sm:$0xff]   ;;  %v3464_v35 = vadd.f32 %v9912_v31, %v1284_v20  ;;  %v8450_v31 = vld [vmem:[%s9172_s20 + $0x8b8] sm:$0xff]  }
 0x2d0   : > { %v7342_v45 = vpop.f32.mrb[39].mxu1  ;;  %7642 = vmatprep.subr.bf16.mxu1 %v8412_v60  ;;  %v8444_v60 = vld [vmem:[%s9172_s20 + $0x8f0] sm:$0xff]  }
 0x2d1   : > { %v9979_v26 = vadd.f32 %v7340_v52, %v7318_v37  ;;  %v3505_v52 = vadd.f32 %v9914_v28, %v1292_v43  ;;  %v3543_v45 = vmax.f32 %v3464_v35, 0.0 }
 0x2d2   : > { %7621 = vmatpush3.bf16.msra.mxu0 %v8413_v50 }
 0x2d3   : > { %7643 = vmatpush3.bf16.msra.mxu1 %v8414_v0  ;;  %7622 = vmatprep.subr.bf16.mxu0 %v8415_v63  ;;  %v8448_v0 = vld [vmem:[%s9172_s20 + $0x8f8] sm:$0xff]   ;;  %v3580_v51 = vpack.c.bf16 %v3543_v45, %v3543_v45 }
 0x2d4   : > { %7644 = vmatprep.subr.bf16.mxu1 %v8416_v46  ;;  %v3545_v46 = vmax.f32 %v3505_v52, 0.0 }
 0x2d6   : > { %7623 = vmatpush3.bf16.msra.mxu0 %v8417_v41  ;;  %v3582_v1 = vpack.c.bf16 %v3545_v46, %v3545_v46 }
 0x2d7   : > { %7645 = vmatpush3.bf16.msra.mxu1 %v8418_v18  ;;  %7652 = vmatprep.subr.bf16.mxu0 %v8419_v56 }
 0x2d8   : > { %7674 = vmatprep.subr.bf16.mxu1 %v8420_v3 }
 0x2d9   : > { %6481 = vmatmul.mubr.bf16.vlgmr.msra.gmra.mrb[64].mxu0 %v3576_v57 }
 0x2da   : > { %6521 = vmatmul.mubr.bf16.vlgmr.msra.gmra.mrb[64].mxu1 %v3578_v5  ;;  %7653 = vmatpush3.bf16.msra.mxu0 %v8421_v19 }
 0x2db   : > { %6560 = vmatprep.mubr.bf16.mxu0 %v3581_v8  ;;  %7675 = vmatpush3.bf16.msra.mxu1 %v8422_v36 }
 0x2dc   : > { %6600 = vmatprep.mubr.bf16.mxu1 %v3583_v11  ;;  %7654 = vmatprep.subr.bf16.mxu0 %v8423_v6 }
 0x2dd   : > { %7676 = vmatprep.subr.bf16.mxu1 %v8424_v10 }
 0x2de   : > { %7655 = vmatpush3.bf16.msra.mxu0 %v8425_v14 }
 0x2df   : > { %7677 = vmatpush3.bf16.msra.mxu1 %v8426_v17  ;;  %7656 = vmatprep.subr.bf16.mxu0 %v8427_v21 }
 0x2e0   : > { %7678 = vmatprep.subr.bf16.mxu1 %v8428_v22 }
 0x2e2   : > { %7657 = vmatpush3.bf16.msra.mxu0 %v8429_v24 }
 0x2e3   : > { %7679 = vmatpush3.bf16.msra.mxu1 %v8430_v27  ;;  %7658 = vmatprep.subr.bf16.mxu0 %v8431_v33 }
 0x2e4   : > { %7680 = vmatprep.subr.bf16.mxu1 %v8432_v38 }
 0x2e6   : > { %7659 = vmatpush3.bf16.msra.mxu0 %v8433_v39 }
 0x2e7   : > { %7681 = vmatpush3.bf16.msra.mxu1 %v8434_v42  ;;  %7660 = vmatprep.subr.bf16.mxu0 %v8435_v49 }
 0x2e8   : > { %7682 = vmatprep.subr.bf16.mxu1 %v8436_v40 }
 0x2ea   : > { %7661 = vmatpush3.bf16.msra.mxu0 %v8437_v23 }
 0x2eb   : > { %7683 = vmatpush3.bf16.msra.mxu1 %v8438_v53  ;;  %7662 = vmatprep.subr.bf16.mxu0 %v8439_v54 }
 0x2ec   : > { %v7360_v13 = vpop.f32.mrb[40].mxu0  ;;  %7684 = vmatprep.subr.bf16.mxu1 %v8440_v29 }
 0x2ed   : > { %v7382_v44 = vpop.f32.mrb[40].mxu1  ;;  %v7361_v47 = vpop.f32.mrb[41].mxu0 }
 0x2ee   : > { %v7362_v48 = vadd.f32 %v7361_v47, %v7360_v13  ;;  %v7383_v4 = vpop.f32.mrb[41].mxu1  ;;  %v7363_v37 = vpop.f32.mrb[42].mxu0  ;;  %7663 = vmatpush3.bf16.msra.mxu0 %v8441_v30 }
 0x2ef   : > { %v7384_v61 = vadd.f32 %v7383_v4, %v7382_v44  ;;  %v7385_v50 = vpop.f32.mrb[42].mxu1  ;;  %7685 = vmatpush3.bf16.msra.mxu1 %v8442_v58  ;;  %v7364_v9 = vpop.f32.mrb[43].mxu0  ;;  %7664 = vmatprep.subr.bf16.mxu0 %v8443_v34 }
 0x2f0   : > { %v6003_v62 = vadd.f32 %v7362_v48, %v9979_v26  ;;  %v7386_v12 = vpop.f32.mrb[43].mxu1  ;;  %7686 = vmatprep.subr.bf16.mxu1 %v8444_v60 }
 0x2f2   : > { %v6043_v63 = vadd.f32 %v7384_v61, %v6003_v62  ;;  %7665 = vmatpush3.bf16.msra.mxu0 %v8445_v7 }
 0x2f3   : > { %7687 = vmatpush3.bf16.msra.mxu1 %v8446_v25  ;;  %7666 = vmatprep.subr.bf16.mxu0 %v8447_v16 }
 0x2f4   : > { %7688 = vmatprep.subr.bf16.mxu1 %v8448_v0 }
 0x2f6   : > { %7667 = vmatpush3.bf16.msra.mxu0 %v8449_v15 }
 0x2f7   : > { %7689 = vmatpush3.bf16.msra.mxu1 %v8450_v31 }
 0x2f9   : > { %6561 = vmatmul.mubr.bf16.vlgmr.msra.gmra.mrb[68].mxu0 %v3580_v51 }
 0x2fa   : > { %6601 = vmatmul.mubr.bf16.vlgmr.msra.gmra.mrb[68].mxu1 %v3582_v1 }
 0x30c   : > { %v7404_v28 = vpop.f32.mrb[44].mxu0 }
 0x30d   : > { %v7426_v26 = vpop.f32.mrb[44].mxu1  ;;  %v7405_v41 = vpop.f32.mrb[45].mxu0 }
 0x30e   : > { %v7406_v2 = vadd.f32 %v7405_v41, %v7404_v28  ;;  %v7427_v18 = vpop.f32.mrb[45].mxu1  ;;  %v7407_v56 = vpop.f32.mrb[46].mxu0 }
 0x30f   : > { %v7428_v55 = vadd.f32 %v7427_v18, %v7426_v26  ;;  %v7429_v3 = vpop.f32.mrb[46].mxu1  ;;  %v7408_v32 = vpop.f32.mrb[47].mxu0 }
 0x310   : > { %v6083_v59 = vadd.f32 %v7406_v2, %v6043_v63  ;;  %v7430_v19 = vpop.f32.mrb[47].mxu1 }
 0x312   : > { %v6123_v57 = vadd.f32 %v7428_v55, %v6083_v59 }
 0x32c   : > { %v7448_v36 = vpop.f32.mrb[48].mxu0 }
 0x32d   : > { %v7470_v5 = vpop.f32.mrb[48].mxu1  ;;  %v7449_v6 = vpop.f32.mrb[49].mxu0 }
 0x32e   : > { %v7450_v8 = vadd.f32 %v7449_v6, %v7448_v36  ;;  %v7471_v10 = vpop.f32.mrb[49].mxu1  ;;  %v7451_v11 = vpop.f32.mrb[50].mxu0 }
 0x32f   : > { %v7472_v14 = vadd.f32 %v7471_v10, %v7470_v5  ;;  %v7473_v17 = vpop.f32.mrb[50].mxu1  ;;  %v7452_v21 = vpop.f32.mrb[51].mxu0 }
 0x330   : > { %v6163_v22 = vadd.f32 %v7450_v8, %v6123_v57  ;;  %v7474_v24 = vpop.f32.mrb[51].mxu1  ;;  %v3547_v17 = vld [vmem:[#allocation3] sm:$0xff] }
 0x332   : > { %v6203_v27 = vadd.f32 %v7472_v14, %v6163_v22 }
 0x34c   : > { %v7492_v33 = vpop.f32.mrb[52].mxu0 }
 0x34d   : > { %v7514_v38 = vpop.f32.mrb[52].mxu1  ;;  %v7493_v39 = vpop.f32.mrb[53].mxu0 }
 0x34e   : > { %v7494_v42 = vadd.f32 %v7493_v39, %v7492_v33  ;;  %v7515_v49 = vpop.f32.mrb[53].mxu1  ;;  %v7495_v40 = vpop.f32.mrb[54].mxu0 }
 0x34f   : > { %v7516_v23 = vadd.f32 %v7515_v49, %v7514_v38  ;;  %v7517_v53 = vpop.f32.mrb[54].mxu1  ;;  %v7496_v54 = vpop.f32.mrb[55].mxu0 }
 0x350   : > { %v6243_v29 = vadd.f32 %v7494_v42, %v6203_v27  ;;  %v7518_v30 = vpop.f32.mrb[55].mxu1  ;;  %v7294_v27 = vld [vmem:[%s10068_s4] ss:$0 sm:$0xff] (!%p7293_p11) }
 0x352   : > { %v6283_v20 = vadd.f32 %v7516_v23, %v6243_v29 }
 0x36c   : > { %v7536_v58 = vpop.f32.mrb[56].mxu0 }
 0x36d   : > { %v7558_v34 = vpop.f32.mrb[56].mxu1  ;;  %v7537_v43 = vpop.f32.mrb[57].mxu0 }
 0x36e   : > { %v7538_v13 = vadd.f32 %v7537_v43, %v7536_v58  ;;  %v7559_v60 = vpop.f32.mrb[57].mxu1  ;;  %v7539_v44 = vpop.f32.mrb[58].mxu0 }
 0x36f   : > { %v7560_v47 = vadd.f32 %v7559_v60, %v7558_v34  ;;  %v7561_v48 = vpop.f32.mrb[58].mxu1  ;;  %v7540_v4 = vpop.f32.mrb[59].mxu0 }
 0x370   : > { %v6323_v37 = vadd.f32 %v7538_v13, %v6283_v20  ;;  %v7562_v7 = vpop.f32.mrb[59].mxu1 }
 0x372   : > { %v6363_v35 = vadd.f32 %v7560_v47, %v6323_v37 }
 0x38c   : > { %v7580_v61 = vpop.f32.mrb[60].mxu0 }
 0x38d   : > { %v7602_v50 = vpop.f32.mrb[60].mxu1  ;;  %v7581_v9 = vpop.f32.mrb[61].mxu0 }
 0x38e   : > { %v7582_v25 = vadd.f32 %v7581_v9, %v7580_v61  ;;  %v7603_v16 = vpop.f32.mrb[61].mxu1  ;;  %v7583_v52 = vpop.f32.mrb[62].mxu0 }
 0x38f   : > { %v7604_v62 = vadd.f32 %v7603_v16, %v7602_v50  ;;  %v7605_v12 = vpop.f32.mrb[62].mxu1  ;;  %v7584_v0 = vpop.f32.mrb[63].mxu0 }
 0x390   : > { %v6403_v63 = vadd.f32 %v7582_v25, %v6363_v35  ;;  %v7606_v15 = vpop.f32.mrb[63].mxu1 }
 0x392   : > { %v6443_v45 = vadd.f32 %v7604_v62, %v6403_v63 }
 0x3ac   : > { %v7624_v31 = vpop.f32.mrb[64].mxu0 }
 0x3ad   : > { %v7646_v46 = vpop.f32.mrb[64].mxu1  ;;  %v7625_v51 = vpop.f32.mrb[65].mxu0 }
 0x3ae   : > { %v7626_v1 = vadd.f32 %v7625_v51, %v7624_v31  ;;  %v7647_v28 = vpop.f32.mrb[65].mxu1  ;;  %v7627_v26 = vpop.f32.mrb[66].mxu0 }
 0x3af   : > { %v7648_v41 = vadd.f32 %v7647_v28, %v7646_v46  ;;  %v7649_v2 = vpop.f32.mrb[66].mxu1  ;;  %v7628_v18 = vpop.f32.mrb[67].mxu0 }
 0x3b0   : > { %v6483_v56 = vadd.f32 %v7626_v1, %v6443_v45  ;;  %v7650_v55 = vpop.f32.mrb[67].mxu1 }
 0x3b2   : > { %v6523_v3 = vadd.f32 %v7648_v41, %v6483_v56 }
 0x3cc   : > { %v7668_v32 = vpop.f32.mrb[68].mxu0 }
 0x3cd   : > { %v7690_v59 = vpop.f32.mrb[68].mxu1  ;;  %v7669_v19 = vpop.f32.mrb[69].mxu0 }
 0x3ce   : > { %v7670_v57 = vadd.f32 %v7669_v19, %v7668_v32  ;;  %v7691_v36 = vpop.f32.mrb[69].mxu1  ;;  %v7671_v5 = vpop.f32.mrb[70].mxu0 }
 0x3cf   : > { %v7692_v6 = vadd.f32 %v7691_v36, %v7690_v59  ;;  %v7693_v8 = vpop.f32.mrb[70].mxu1  ;;  %v7672_v10 = vpop.f32.mrb[71].mxu0 }
 0x3d0   : > { %v6563_v11 = vadd.f32 %v7670_v57, %v6523_v3  ;;  %v7694_v14 = vpop.f32.mrb[71].mxu1  ;;  %6614 = sbr.rel (%p7293_p11) target bundleno = 1309 (0x51d), region = 71 }
 0x3d2   : > { %v6603_v21 = vadd.f32 %v7692_v6, %v6563_v11 }
 0x3d4   : > { %v6608_v22 = vadd.f32 %v6603_v21, %v3547_v17 }
 0x3d6   : > { %6610 = vst.msk [vmem:[#allocation3] sm:$0xff] %vm6609_vm1, %v6608_v22 }
 0x3dd   : > { %v6615_v24 = vld [vmem:[#allocation3] sm:$0xff] }
 0x3de   : > { %v6623_v33 = vadd.f32 %v7294_v27, %v6615_v24 }
 0x3e0   : > { %v6624_v38 = vsel %vm6609_vm1, %v6623_v33, -inf }
 0x3e1   : > { %6625 = vmax.xlane.f32.xlu0 %v6624_v38 }
 0x46e   : > { %v6626_v39 = vpop.xlane.xlu0 %6625 }
 0x46f   : > { %v6627_v42 = vsub.f32 %v6623_v33, %v6626_v39 }
 0x471   : > { %v6628_v49 = vmul.f32 1.442695, %v6627_v42 }
 0x473   : > { %8452 = vpow2.f32 %v6628_v49 }
 0x47d   : > { %v8453_v40 = vpop.eup %8452 }
 0x47e   : > { %v6630_v23 = vsel %vm6609_vm1, %v8453_v40, 0.0 }
 0x47f   : > { %6631 = vadd.xlane.f32.xlu0 %v6630_v23 }
 0x50c   : > { %v6632_v53 = vpop.xlane.xlu0 %6631 }
 0x50d   : > { %8454 = vlog2.f32 %v6632_v53 }
 0x517   : > { %v8455_v54 = vpop.eup %8454 }
 0x518   : > { %v6634_v29 = vmul.f32 0.6931472, %v8455_v54 }
 0x51a   : > { %v6635_v30 = vsub.f32 %v6627_v42, %v6634_v29 }
 0x51c   : > { %6636 = vst.msk [vmem:[#allocation3] sm:$0xff] %vm6609_vm1, %v6635_v30 }
 0x51d PF: > { %p7702_p12 = scmp.eq.s32.totalorder %s8559_s21, 1  ;;  %s8512_s30 = smov [#allocation3]  }
 0x51e   : > { %s6644_s6 = sshll.u32 %s8512_s30, 4  ;;  %s6645_s6 = int_to_ptr.vmem [resolvable:$true] %s6644_s6 }
 0x51f   : > { %s8456_s7 = scalar_lea.vmem %s6645_s6, 128  ;;  %p8463_p2 = scmp.lt.s32.totalorder %s6645_s6, %s6645_s6 }
 0x520   : > { %p8457_p13 = scmp.ne.s32.totalorder %s6645_s6, %s8456_s7  ;;  %p8464_p3 = scmp.lt.s32.totalorder %s8456_s7, %s8456_s7 }
 0x522   : > { %p8458_p0 = pnand %p8457_p13, %p7702_p12  ;;  %p8465_p4 = por %p8464_p3, %p8463_p2 }
 0x524   : > { %p8459_p1 = pneg %p8458_p0 }
 0x526   : > { %p8466_p5 = pnand %p8465_p4, %p8459_p1 }
 0x528   : > { %8469 = shalt.err (!%p8466_p5)
}
 0x529   : > { %s8470_s10 = scalar_lea.hbm %s10069_s5, 128 }
 0x52a   : > { %p8471_p6 = scmp.ne.s32.totalorder %s10069_s5, %s8470_s10  ;;  %p8476_p9 = scmp.lt.u32.totalorder %s8470_s10, %s10069_s5 }
 0x52c   : > { %p8472_p7 = pnand %p8471_p6, %p7702_p12 }
 0x52e   : > { %p8473_p8 = pneg %p8472_p7 }
 0x530   : > { %p8478_p10 = pnand %p8476_p9, %p8473_p8 }
 0x532   : > { %8481 = shalt.err (!%p8478_p10)
}
 0x533   : > { %7699 = dma.vmem_to_hbm [thread:$0]  (%p7702_p12), %s6645_s6, 128, %s10069_s5, [#allocation4]  }
 0x534   : > { %8495 = dma.done.wait (%p7702_p12), [#allocation4], 128  }
 0x535   : > { %8497 = vsyncadd (%p7702_p12), [#allocation4], 4294967168 }
 0x536 PF: > { %p13_p11 = scmp.ge.s32.totalorder %s8562_s22, 4   ;;  %s10070_s18 = smov %s8504_s19 }
 0x537   : > { %s10071_s19 = smov %s8571_s25  ;;  %s10072_s20 = smov %s8562_s22 }
 0x538   :  { %15 = sbr.rel (!%p13_p11) target bundleno = 2 (0x2), region = 109 }
 0x53f   :  { %6657 = vsyncpa [#allocation4], 1 }
 0x540   :  { %6659 = vsyncpa [#allocation4 + $0x1], 1 }

</bundles_post_ra>
